<compile_context>
chip_gen: v6e
topology: v6e:2x2x1
jax: 0.10.0
libtpu: 0.0.40
codegen_flags: <defaults>
</compile_context>

<pallas_src>
import jax
import jax.numpy as jnp
from jax.experimental import pallas as pl
from jax.experimental.pallas import tpu as pltpu


# ---------------------------------------------------------------------------
# Pallas kernels
# ---------------------------------------------------------------------------

def _conv_gemm_kernel(w_ref, b_ref, p_ref, o_ref):
    # w: (Cout, K), p: (K, S), b: (Cout, 1)  ->  o: (Cout, S), ReLU fused.
    acc = jnp.dot(w_ref[...], p_ref[...], preferred_element_type=jnp.float32)
    o_ref[...] = jnp.maximum(acc + b_ref[...], 0.0).astype(o_ref.dtype)


def _fc_head_kernel(x_ref, w3_ref, b3_ref, w4_ref, b4_ref, o_ref, acc_ref):
    # K-tiled Linear(8192->256) + ReLU, with the Linear(256->A) head fused
    # into the finalize step.  acc_ref is a resident f32 VMEM accumulator.
    k = pl.program_id(0)

    @pl.when(k == 0)
    def _():
        acc_ref[...] = jnp.zeros_like(acc_ref)

    acc_ref[...] += jnp.dot(
        x_ref[...], w3_ref[...].astype(jnp.float32),
        preferred_element_type=jnp.float32)

    @pl.when(k == pl.num_programs(0) - 1)
    def _():
        h = jnp.maximum(acc_ref[...] + b3_ref[...], 0.0)          # (M, 256)
        out = jnp.dot(h, w4_ref[...].astype(jnp.float32),
                      preferred_element_type=jnp.float32) + b4_ref[...]
        o_ref[...] = out.astype(o_ref.dtype)


# ---------------------------------------------------------------------------
# Wrappers
# ---------------------------------------------------------------------------

def conv_gemm_relu(patches, w2d, b2d):
    """patches: (N, K, S), w2d: (Cout, K), b2d: (Cout, 1) -> (N, Cout, S)."""
    N, K, S = patches.shape
    Cout = w2d.shape[0]
    return pl.pallas_call(
        _conv_gemm_kernel,
        out_shape=jax.ShapeDtypeStruct((N, Cout, S), jnp.float32),
        grid=(N,),
        in_specs=[
            pl.BlockSpec((Cout, K), lambda n: (0, 0)),
            pl.BlockSpec((Cout, 1), lambda n: (0, 0)),
            pl.BlockSpec((None, K, S), lambda n: (n, 0, 0)),
        ],
        out_specs=pl.BlockSpec((None, Cout, S), lambda n: (n, 0, 0)),
        compiler_params=pltpu.CompilerParams(
            dimension_semantics=("parallel",)),
    )(w2d, b2d, patches)


def fc_relu_head(x, w3_p, b3, w4, b4, *, tk=2048):
    """y = (relu(x @ w3_p + b3)) @ w4 + b4, K-tiled and fused in one kernel.

    x: (M, K) f32, w3_p: (K, H) bf16, b3: (1, H), w4: (H, A), b4: (1, A).
    """
    M, K = x.shape
    H = w3_p.shape[1]
    A = w4.shape[1]
    assert K % tk == 0
    kt = K // tk
    return pl.pallas_call(
        _fc_head_kernel,
        out_shape=jax.ShapeDtypeStruct((M, A), jnp.float32),
        grid=(kt,),
        in_specs=[
            pl.BlockSpec((M, tk), lambda k: (0, k)),
            pl.BlockSpec((tk, H), lambda k: (k, 0)),
            pl.BlockSpec((1, H), lambda k: (0, 0)),
            pl.BlockSpec((H, A), lambda k: (0, 0)),
            pl.BlockSpec((1, A), lambda k: (0, 0)),
        ],
        out_specs=pl.BlockSpec((M, A), lambda k: (0, 0)),
        scratch_shapes=[pltpu.VMEM((M, H), jnp.float32)],
        compiler_params=pltpu.CompilerParams(
            dimension_semantics=("arbitrary",)),
    )(x, w3_p, b3, w4, b4)


def im2col(x_nchw, kh, kw, stride):
    """Patches in (N, Cin*kh*kw, Ho*Wo) order (feature order = PyTorch's
    (Cin, kh, kw) weight flatten; spatial order = y*Wo + x).  Slice + stack +
    reshape only -- no minor-dim transpose."""
    N, C, H, W = x_nchw.shape
    Ho = (H - kh) // stride + 1
    Wo = (W - kw) // stride + 1
    cols = []
    for i in range(kh):
        for j in range(kw):
            cols.append(
                x_nchw[:, :, i:i + stride * Ho:stride, j:j + stride * Wo:stride])
    p = jnp.stack(cols, axis=2)                    # (N, C, kh*kw, Ho, Wo)
    return p.reshape(N, C * kh * kw, Ho * Wo), Ho, Wo


# ---------------------------------------------------------------------------
# Parameters
# ---------------------------------------------------------------------------

def init_params(key, frames=4, number_of_actions=9):
    ks = jax.random.split(key, 8)

    def u(k, shape, fan_in):
        bound = 1.0 / jnp.sqrt(float(fan_in))
        return jax.random.uniform(k, shape, jnp.float32, -bound, bound)

    p = {}
    p["w1"] = u(ks[0], (16, frames, 8, 8), frames * 8 * 8)   # Conv2d(frames,16,8,4)
    p["b1"] = u(ks[1], (16,), frames * 8 * 8)
    p["w2"] = u(ks[2], (32, 16, 4, 4), 16 * 4 * 4)           # Conv2d(16,32,4,2)
    p["b2"] = u(ks[3], (32,), 16 * 4 * 4)
    p["w3"] = u(ks[4], (7904, 256), 7904)                    # Linear(7904,256)
    p["b3"] = u(ks[5], (256,), 7904)
    p["w4"] = u(ks[6], (256, number_of_actions), 256)        # Linear(256,actions)
    p["b4"] = u(ks[7], (256,) and (number_of_actions,), 256)
    return p


# conv2 output geometry implied by the hard-coded 7904-wide flatten.
_C2, _H2, _W2 = 32, 13, 19          # 32 * 13 * 19 = 7904
_S2 = _H2 * _W2                     # 247
_S2_PAD = 256                       # lane-dense padded spatial dim


def prepare_params(p):
    """One-time (outside the hot path) reshape / pad / cast of the weights."""
    # FC1 weight rows are re-indexed from c*247+s to c*256+s with zero rows
    # for the padded spatial slots, so padded conv2 columns contribute 0.
    w3_p = jnp.pad(p["w3"].reshape(_C2, _S2, 256),
                   ((0, 0), (0, _S2_PAD - _S2), (0, 0))).reshape(_C2 * _S2_PAD, 256)
    return {
        "w1_2d": p["w1"].reshape(16, -1),            # (16, 256)
        "b1": p["b1"].reshape(16, 1),
        "w2_2d": p["w2"].reshape(32, -1),            # (32, 256)
        "b2": p["b2"].reshape(32, 1),
        "w3_p": w3_p.astype(jnp.bfloat16),           # (8192, 256) bf16 stream
        "b3": p["b3"].reshape(1, 256),
        "w4": p["w4"],                               # (256, A)
        "b4": p["b4"].reshape(1, -1),
    }


# ---------------------------------------------------------------------------
# Forward pass
# ---------------------------------------------------------------------------

def dqn_forward(params, q):
    # q: (N, frames, 116, 164) NCHW, same as the PyTorch module.
    N = q.shape[0]

    # Conv1 (8x8, stride 4) + ReLU  ->  (N, 16, 28, 40)
    p1, h1o, w1o = im2col(q, 8, 8, 4)                          # (N, 256, 1120)
    h1 = conv_gemm_relu(p1, params["w1_2d"], params["b1"])     # (N, 16, 1120)
    h1 = h1.reshape(N, 16, h1o, w1o)

    # Conv2 (4x4, stride 2) + ReLU  ->  (N, 32, 13*19), spatial padded to 256
    p2, _, _ = im2col(h1, 4, 4, 2)                             # (N, 256, 247)
    p2 = jnp.pad(p2, ((0, 0), (0, 0), (0, _S2_PAD - _S2)))     # (N, 256, 256)
    h2 = conv_gemm_relu(p2, params["w2_2d"], params["b2"])     # (N, 32, 256)

    # Flatten (padded, matches permuted w3_p) + Linear+ReLU + fused head.
    x = h2.reshape(N, _C2 * _S2_PAD)                           # (N, 8192)
    return fc_relu_head(x, params["w3_p"], params["b3"],
                        params["w4"], params["b4"])            # (N, actions)


# TODO(synk): on v5e, the bf16 w3 stream could additionally be prefetched
# across pallas_calls (P10 cross-call DMA future) to hide it behind the convs.


if __name__ == "__main__":
    key = jax.random.PRNGKey(0)
    pkey, xkey = jax.random.split(key)
    params = prepare_params(init_params(pkey))
    # Smallest spatial size consistent with the hard-coded 7904-wide flatten:
    # (116, 164) -> conv1 (28, 40) -> conv2 (13, 19); 32*13*19 = 7904.
    x = jax.random.normal(xkey, (2, 4, 116, 164), dtype=jnp.float32)
    fwd = jax.jit(dqn_forward)
    out = jax.block_until_ready(fwd(params, x))
    assert out.shape == (2, 9), out.shape
    print("KERNEL_OK")
</pallas_src>

<mosaic_0001>
module attributes {stable_mosaic.version = 11 : i64} {
  func.func @_conv_gemm_kernel(%arg0: i32, %arg1: memref<16x256xf32, #tpu.memory_space<vmem>>, %arg2: memref<16x1xf32, #tpu.memory_space<vmem>>, %arg3: memref<1x256x1120xf32, #tpu.memory_space<vmem>>, %arg4: memref<1x16x1120xf32, #tpu.memory_space<vmem>>) attributes {dimension_semantics = [#tpu.dimension_semantics<parallel>], iteration_bounds = array<i64: 2>, scalar_prefetch = 0 : i64, scratch_operands = 0 : i64, tpu.core_type = #tpu.core_type<tc>, window_params = [{pipeline_mode = #tpu.pipeline_mode<synchronous>, transform_indices = @transform_0, window_bounds = array<i64: 16, 256>}, {pipeline_mode = #tpu.pipeline_mode<synchronous>, transform_indices = @transform_1, window_bounds = array<i64: 16, 1>}, {transform_indices = @transform_2, window_bounds = array<i64: 1, 256, 1120>}, {transform_indices = @transform_3, window_bounds = array<i64: 1, 16, 1120>}]} {
    %c0 = arith.constant 0 : index
    %c0_0 = arith.constant 0 : index
    %0 = vector.load %arg1[%c0, %c0_0] : memref<16x256xf32, #tpu.memory_space<vmem>>, vector<16x256xf32>
    %c0_1 = arith.constant 0 : index
    %c0_2 = arith.constant 0 : index
    %c0_3 = arith.constant 0 : index
    %1 = vector.load %arg3[%c0_1, %c0_2, %c0_3] : memref<1x256x1120xf32, #tpu.memory_space<vmem>>, vector<1x256x1120xf32>
    %2 = vector.shape_cast %1 : vector<1x256x1120xf32> to vector<256x1120xf32>
    %cst = arith.constant dense<0.000000e+00> : vector<16x1120xf32>
    %3 = tpu.matmul %0, %2, %cst {dimension_numbers = #tpu.dot_dimension_numbers<[1], [0], [0], [1], [0, 0, 1, 1], [], []>} : vector<16x256xf32>, vector<256x1120xf32>, vector<16x1120xf32> -> vector<16x1120xf32>
    %c0_4 = arith.constant 0 : index
    %c0_5 = arith.constant 0 : index
    %4 = vector.load %arg2[%c0_4, %c0_5] : memref<16x1xf32, #tpu.memory_space<vmem>>, vector<16x1xf32>
    %5 = vector.broadcast %4 : vector<16x1xf32> to vector<16x1120xf32>
    %6 = arith.addf %3, %5 : vector<16x1120xf32>
    %cst_6 = arith.constant 0.000000e+00 : f32
    %7 = vector.broadcast %cst_6 : f32 to vector<16x1120xf32>
    %8 = arith.maximumf %6, %7 : vector<16x1120xf32>
    %c0_7 = arith.constant 0 : index
    %c0_8 = arith.constant 0 : index
    %c0_9 = arith.constant 0 : index
    %9 = vector.load %arg4[%c0_7, %c0_8, %c0_9] : memref<1x16x1120xf32, #tpu.memory_space<vmem>>, vector<1x16x1120xf32>
    %10 = vector.shape_cast %9 : vector<1x16x1120xf32> to vector<16x1120xf32>
    %11 = vector.shape_cast %8 : vector<16x1120xf32> to vector<1x16x1120xf32>
    tpu.vector_store %arg4[%c0_7, %c0_8, %c0_9], %11 {strides = array<i32>} : memref<1x16x1120xf32, #tpu.memory_space<vmem>>, vector<1x16x1120xf32>,
    return
  }
  func.func @transform_0(%arg0: i32) -> (i32, i32) {
    %c0_i32 = arith.constant 0 : i32
    %c0_i32_0 = arith.constant 0 : i32
    %c0_i32_1 = arith.constant 0 : i32
    return %c0_i32, %c0_i32_0 : i32, i32
  }
  func.func @transform_1(%arg0: i32) -> (i32, i32) {
    %c0_i32 = arith.constant 0 : i32
    %c0_i32_0 = arith.constant 0 : i32
    %c0_i32_1 = arith.constant 0 : i32
    return %c0_i32, %c0_i32_0 : i32, i32
  }
  func.func @transform_2(%arg0: i32) -> (i32, i32, i32) {
    %c0_i32 = arith.constant 0 : i32
    %c0_i32_0 = arith.constant 0 : i32
    %c0_i32_1 = arith.constant 0 : i32
    return %arg0, %c0_i32, %c0_i32_0 : i32, i32, i32
  }
  func.func @transform_3(%arg0: i32) -> (i32, i32, i32) {
    %c0_i32 = arith.constant 0 : i32
    %c0_i32_0 = arith.constant 0 : i32
    %c0_i32_1 = arith.constant 0 : i32
    return %arg0, %c0_i32, %c0_i32_0 : i32, i32, i32
  }
}

module attributes {stable_mosaic.version = 11 : i64} {
  func.func @_conv_gemm_kernel(%arg0: i32, %arg1: memref<32x256xf32, #tpu.memory_space<vmem>>, %arg2: memref<32x1xf32, #tpu.memory_space<vmem>>, %arg3: memref<1x256x256xf32, #tpu.memory_space<vmem>>, %arg4: memref<1x32x256xf32, #tpu.memory_space<vmem>>) attributes {dimension_semantics = [#tpu.dimension_semantics<parallel>], iteration_bounds = array<i64: 2>, scalar_prefetch = 0 : i64, scratch_operands = 0 : i64, tpu.core_type = #tpu.core_type<tc>, window_params = [{pipeline_mode = #tpu.pipeline_mode<synchronous>, transform_indices = @transform_0, window_bounds = array<i64: 32, 256>}, {pipeline_mode = #tpu.pipeline_mode<synchronous>, transform_indices = @transform_1, window_bounds = array<i64: 32, 1>}, {transform_indices = @transform_2, window_bounds = array<i64: 1, 256, 256>}, {transform_indices = @transform_3, window_bounds = array<i64: 1, 32, 256>}]} {
    %c0 = arith.constant 0 : index
    %c0_0 = arith.constant 0 : index
    %0 = vector.load %arg1[%c0, %c0_0] : memref<32x256xf32, #tpu.memory_space<vmem>>, vector<32x256xf32>
    %c0_1 = arith.constant 0 : index
    %c0_2 = arith.constant 0 : index
    %c0_3 = arith.constant 0 : index
    %1 = vector.load %arg3[%c0_1, %c0_2, %c0_3] : memref<1x256x256xf32, #tpu.memory_space<vmem>>, vector<1x256x256xf32>
    %2 = vector.shape_cast %1 : vector<1x256x256xf32> to vector<256x256xf32>
    %cst = arith.constant dense<0.000000e+00> : vector<32x256xf32>
    %3 = tpu.matmul %0, %2, %cst {dimension_numbers = #tpu.dot_dimension_numbers<[1], [0], [0], [1], [0, 0, 1, 1], [], []>} : vector<32x256xf32>, vector<256x256xf32>, vector<32x256xf32> -> vector<32x256xf32>
    %c0_4 = arith.constant 0 : index
    %c0_5 = arith.constant 0 : index
    %4 = vector.load %arg2[%c0_4, %c0_5] : memref<32x1xf32, #tpu.memory_space<vmem>>, vector<32x1xf32>
    %5 = vector.broadcast %4 : vector<32x1xf32> to vector<32x256xf32>
    %6 = arith.addf %3, %5 : vector<32x256xf32>
    %cst_6 = arith.constant 0.000000e+00 : f32
    %7 = vector.broadcast %cst_6 : f32 to vector<32x256xf32>
    %8 = arith.maximumf %6, %7 : vector<32x256xf32>
    %c0_7 = arith.constant 0 : index
    %c0_8 = arith.constant 0 : index
    %c0_9 = arith.constant 0 : index
    %9 = vector.load %arg4[%c0_7, %c0_8, %c0_9] : memref<1x32x256xf32, #tpu.memory_space<vmem>>, vector<1x32x256xf32>
    %10 = vector.shape_cast %9 : vector<1x32x256xf32> to vector<32x256xf32>
    %11 = vector.shape_cast %8 : vector<32x256xf32> to vector<1x32x256xf32>
    tpu.vector_store %arg4[%c0_7, %c0_8, %c0_9], %11 {strides = array<i32>} : memref<1x32x256xf32, #tpu.memory_space<vmem>>, vector<1x32x256xf32>,
    return
  }
  func.func @transform_0(%arg0: i32) -> (i32, i32) {
    %c0_i32 = arith.constant 0 : i32
    %c0_i32_0 = arith.constant 0 : i32
    %c0_i32_1 = arith.constant 0 : i32
    return %c0_i32, %c0_i32_0 : i32, i32
  }
  func.func @transform_1(%arg0: i32) -> (i32, i32) {
    %c0_i32 = arith.constant 0 : i32
    %c0_i32_0 = arith.constant 0 : i32
    %c0_i32_1 = arith.constant 0 : i32
    return %c0_i32, %c0_i32_0 : i32, i32
  }
  func.func @transform_2(%arg0: i32) -> (i32, i32, i32) {
    %c0_i32 = arith.constant 0 : i32
    %c0_i32_0 = arith.constant 0 : i32
    %c0_i32_1 = arith.constant 0 : i32
    return %arg0, %c0_i32, %c0_i32_0 : i32, i32, i32
  }
  func.func @transform_3(%arg0: i32) -> (i32, i32, i32) {
    %c0_i32 = arith.constant 0 : i32
    %c0_i32_0 = arith.constant 0 : i32
    %c0_i32_1 = arith.constant 0 : i32
    return %arg0, %c0_i32, %c0_i32_0 : i32, i32, i32
  }
}

module attributes {stable_mosaic.version = 11 : i64} {
  func.func @_fc_head_kernel(%arg0: i32, %arg1: memref<2x2048xf32, #tpu.memory_space<vmem>>, %arg2: memref<2048x256xbf16, #tpu.memory_space<vmem>>, %arg3: memref<1x256xf32, #tpu.memory_space<vmem>>, %arg4: memref<256x9xf32, #tpu.memory_space<vmem>>, %arg5: memref<1x9xf32, #tpu.memory_space<vmem>>, %arg6: memref<2x9xf32, #tpu.memory_space<vmem>>, %arg7: memref<2x256xf32, #tpu.memory_space<vmem>>) attributes {dimension_semantics = [#tpu.dimension_semantics<arbitrary>], iteration_bounds = array<i64: 4>, scalar_prefetch = 0 : i64, scratch_operands = 1 : i64, tpu.core_type = #tpu.core_type<tc>, window_params = [{transform_indices = @transform_0, window_bounds = array<i64: 2, 2048>}, {transform_indices = @transform_1, window_bounds = array<i64: 2048, 256>}, {pipeline_mode = #tpu.pipeline_mode<synchronous>, transform_indices = @transform_2, window_bounds = array<i64: 1, 256>}, {pipeline_mode = #tpu.pipeline_mode<synchronous>, transform_indices = @transform_3, window_bounds = array<i64: 256, 9>}, {pipeline_mode = #tpu.pipeline_mode<synchronous>, transform_indices = @transform_4, window_bounds = array<i64: 1, 9>}, {pipeline_mode = #tpu.pipeline_mode<synchronous>, transform_indices = @transform_5, window_bounds = array<i64: 2, 9>}]} {
    %c0_i32 = arith.constant 0 : i32
    %0 = arith.cmpi eq, %arg0, %c0_i32 : i32
    %1 = arith.extui %0 : i1 to i32
    %c0_i32_0 = arith.constant 0 : i32
    %2 = arith.cmpi ne, %1, %c0_i32_0 : i32
    scf.if %2 {
      %cst_9 = arith.constant 0.000000e+00 : f32
      %13 = vector.broadcast %cst_9 : f32 to vector<2x256xf32>
      %c0_10 = arith.constant 0 : index
      %c0_11 = arith.constant 0 : index
      %14 = vector.load %arg7[%c0_10, %c0_11] : memref<2x256xf32, #tpu.memory_space<vmem>>, vector<2x256xf32>
      tpu.vector_store %arg7[%c0_10, %c0_11], %13 {strides = array<i32>} : memref<2x256xf32, #tpu.memory_space<vmem>>, vector<2x256xf32>,
    } else {
    }
    %c0 = arith.constant 0 : index
    %c0_1 = arith.constant 0 : index
    %3 = vector.load %arg7[%c0, %c0_1] : memref<2x256xf32, #tpu.memory_space<vmem>>, vector<2x256xf32>
    %c0_2 = arith.constant 0 : index
    %c0_3 = arith.constant 0 : index
    %4 = vector.load %arg1[%c0_2, %c0_3] : memref<2x2048xf32, #tpu.memory_space<vmem>>, vector<2x2048xf32>
    %c0_4 = arith.constant 0 : index
    %c0_5 = arith.constant 0 : index
    %5 = vector.load %arg2[%c0_4, %c0_5] : memref<2048x256xbf16, #tpu.memory_space<vmem>>, vector<2048x256xbf16>
    %6 = arith.extf %5 : vector<2048x256xbf16> to vector<2048x256xf32>
    %cst = arith.constant dense<0.000000e+00> : vector<2x256xf32>
    %7 = tpu.matmul %4, %6, %cst {dimension_numbers = #tpu.dot_dimension_numbers<[1], [0], [0], [1], [0, 0, 1, 1], [], []>} : vector<2x2048xf32>, vector<2048x256xf32>, vector<2x256xf32> -> vector<2x256xf32>
    %8 = arith.addf %3, %7 : vector<2x256xf32>
    %c0_6 = arith.constant 0 : index
    %c0_7 = arith.constant 0 : index
    %9 = vector.load %arg7[%c0_6, %c0_7] : memref<2x256xf32, #tpu.memory_space<vmem>>, vector<2x256xf32>
    tpu.vector_store %arg7[%c0_6, %c0_7], %8 {strides = array<i32>} : memref<2x256xf32, #tpu.memory_space<vmem>>, vector<2x256xf32>,
    %c3_i32 = arith.constant 3 : i32
    %10 = arith.cmpi eq, %arg0, %c3_i32 : i32
    %11 = arith.extui %10 : i1 to i32
    %c0_i32_8 = arith.constant 0 : i32
    %12 = arith.cmpi ne, %11, %c0_i32_8 : i32
    scf.if %12 {
      %c0_9 = arith.constant 0 : index
      %c0_10 = arith.constant 0 : index
      %13 = vector.load %arg7[%c0_9, %c0_10] : memref<2x256xf32, #tpu.memory_space<vmem>>, vector<2x256xf32>
      %c0_11 = arith.constant 0 : index
      %c0_12 = arith.constant 0 : index
      %14 = vector.load %arg3[%c0_11, %c0_12] : memref<1x256xf32, #tpu.memory_space<vmem>>, vector<1x256xf32>
      %15 = vector.broadcast %14 : vector<1x256xf32> to vector<2x256xf32>
      %16 = arith.addf %13, %15 : vector<2x256xf32>
      %cst_13 = arith.constant 0.000000e+00 : f32
      %17 = vector.broadcast %cst_13 : f32 to vector<2x256xf32>
      %18 = arith.maximumf %16, %17 : vector<2x256xf32>
      %c0_14 = arith.constant 0 : index
      %c0_15 = arith.constant 0 : index
      %19 = vector.load %arg4[%c0_14, %c0_15] : memref<256x9xf32, #tpu.memory_space<vmem>>, vector<256x9xf32>
      %cst_16 = arith.constant dense<0.000000e+00> : vector<2x9xf32>
      %20 = tpu.matmul %18, %19, %cst_16 {dimension_numbers = #tpu.dot_dimension_numbers<[1], [0], [0], [1], [0, 0, 1, 1], [], []>} : vector<2x256xf32>, vector<256x9xf32>, vector<2x9xf32> -> vector<2x9xf32>
      %c0_17 = arith.constant 0 : index
      %c0_18 = arith.constant 0 : index
      %21 = vector.load %arg5[%c0_17, %c0_18] : memref<1x9xf32, #tpu.memory_space<vmem>>, vector<1x9xf32>
      %22 = vector.broadcast %21 : vector<1x9xf32> to vector<2x9xf32>
      %23 = arith.addf %20, %22 : vector<2x9xf32>
      %c0_19 = arith.constant 0 : index
      %c0_20 = arith.constant 0 : index
      %24 = vector.load %arg6[%c0_19, %c0_20] : memref<2x9xf32, #tpu.memory_space<vmem>>, vector<2x9xf32>
      tpu.vector_store %arg6[%c0_19, %c0_20], %23 {strides = array<i32>} : memref<2x9xf32, #tpu.memory_space<vmem>>, vector<2x9xf32>,
    } else {
    }
    return
  }
  func.func @transform_0(%arg0: i32) -> (i32, i32) {
    %c0_i32 = arith.constant 0 : i32
    %c0_i32_0 = arith.constant 0 : i32
    return %c0_i32, %arg0 : i32, i32
  }
  func.func @transform_1(%arg0: i32) -> (i32, i32) {
    %c0_i32 = arith.constant 0 : i32
    %c0_i32_0 = arith.constant 0 : i32
    return %arg0, %c0_i32 : i32, i32
  }
  func.func @transform_2(%arg0: i32) -> (i32, i32) {
    %c0_i32 = arith.constant 0 : i32
    %c0_i32_0 = arith.constant 0 : i32
    %c0_i32_1 = arith.constant 0 : i32
    return %c0_i32, %c0_i32_0 : i32, i32
  }
  func.func @transform_3(%arg0: i32) -> (i32, i32) {
    %c0_i32 = arith.constant 0 : i32
    %c0_i32_0 = arith.constant 0 : i32
    %c0_i32_1 = arith.constant 0 : i32
    return %c0_i32, %c0_i32_0 : i32, i32
  }
  func.func @transform_4(%arg0: i32) -> (i32, i32) {
    %c0_i32 = arith.constant 0 : i32
    %c0_i32_0 = arith.constant 0 : i32
    %c0_i32_1 = arith.constant 0 : i32
    return %c0_i32, %c0_i32_0 : i32, i32
  }
  func.func @transform_5(%arg0: i32) -> (i32, i32) {
    %c0_i32 = arith.constant 0 : i32
    %c0_i32_0 = arith.constant 0 : i32
    %c0_i32_1 = arith.constant 0 : i32
    return %c0_i32, %c0_i32_0 : i32, i32
  }
}

</mosaic_0001>

<bundles_post_ra>
// kernel: dqn_forward.3
= control target key start
LH: loop header
LB: loop body
LE: loop exit
PB: predicated region body
PF: predicated region fallthrough
CT: control target
= control target key end

     0   :  { %s1071_s12 = smov 0   ;;  %s1460_s0 = inlined_call_operand.vmem [shape: f32[16,256], index: 0, kind: input, shape index: {}]   ;;  %s1461_s1 = inlined_call_operand.vmem [shape: f32[16,1], index: 1, kind: input, shape index: {}]   ;;  %s1462_s2 = inlined_call_operand.vmem [shape: f32[2,256,1120], index: 2, kind: input, shape index: {}]   ;;  %s1463_s3 = inlined_call_operand.vmem [shape: f32[2,16,1120], index: 3, kind: output, shape index: {}]  }
   0x1 LB: > { %s950_s13 = sadd.s32 4294967295, %s1048_s12   ;;  %p954_p0 = scmp.ge.s32.totalorder %s1048_s12, 1  ;;  %s1048_s12 = sphi %s1071_s12, %s13_s12  }
   0x2   : > { %p137_p1 = scmp.lt.s32.totalorder %s1048_s12, 3 }
   0x4   : > { %p138_p2 = pnand %p954_p0, %p137_p1 }
   0x5   : > { %p161_p3 = scmp.lt.s32.totalorder (!%p138_p2), %s950_s13, 1 }
   0x6   : > { %141 = sbr.rel (%p138_p2) target bundleno = 387 (0x183), region = 32 }
   0xb   : > { %v172_v0 = vld [vmem:[%s1460_s0 + $0x8] sm:$0xff]  ;;  %s1465_s13 = smov (!%p161_p3, %s950_s13), 1  ;;  %vm884_vm0 = vcmask 785408  }
   0xc   : > { %539 = vmatprep.mubr.f32.mxu0 %v172_v0  ;;  %616 = vmatprep.mubr.f32.mxu1 %v172_v0  ;;  %s1029_s16 = smul.u32 2304, %s1465_s13 }
   0xd   : > { %s1030_s5 = smul.u32 144, %s1465_s13 }
   0xe   : > { %s1088_s19 = scalar_lea.vmem %s1462_s2, %s1029_s16 }
   0xf   : > { %v311_v1 = vld [vmem:[%s1088_s19 + $0x440] sm:$0xff]  ;;  %v313_v2 = vld [vmem:[%s1088_s19 + $0x450] sm:$0xff]  ;;  %v310_v3 = vld [vmem:[%s1088_s19 + $0x438] sm:$0xff]  ;;  %s1432_s8 = scalar_lea.vmem %s1463_s3, %s1030_s5 }
  0x10   : > { %475 = vmatprep.subr.mxu0 %v311_v1  ;;  %552 = vmatprep.subr.mxu1 %v313_v2  ;;  %v312_v4 = vld [vmem:[%s1088_s19 + $0x448] sm:$0xff]  ;;  %v302_v5 = vld [vmem:[%s1088_s19 + $0x3f8] sm:$0xff]  ;;  %v301_v7 = vld [vmem:[%s1088_s19 + $0x3f0] sm:$0xff] }
  0x11   : > { %v304_v6 = vld [vmem:[%s1088_s19 + $0x408] sm:$0xff]  ;;  %476 = vmatpush1.msra.mxu0 %v310_v3  ;;  %553 = vmatpush1.msra.mxu1 %v312_v4  ;;  %v303_v8 = vld [vmem:[%s1088_s19 + $0x400] sm:$0xff]  ;;  %v293_v9 = vld [vmem:[%s1088_s19 + $0x3b0] sm:$0xff] }
  0x12   : > { %477 = vmatprep.subr.mxu0 %v302_v5  ;;  %554 = vmatprep.subr.mxu1 %v304_v6  ;;  %v295_v10 = vld [vmem:[%s1088_s19 + $0x3c0] sm:$0xff]  ;;  %v292_v11 = vld [vmem:[%s1088_s19 + $0x3a8] sm:$0xff]  ;;  %v294_v12 = vld [vmem:[%s1088_s19 + $0x3b8] sm:$0xff] }
  0x13   : > { %478 = vmatpush1.msra.mxu0 %v301_v7  ;;  %555 = vmatpush1.msra.mxu1 %v303_v8  ;;  %v284_v13 = vld [vmem:[%s1088_s19 + $0x368] sm:$0xff]  ;;  %v286_v14 = vld [vmem:[%s1088_s19 + $0x378] sm:$0xff]  ;;  %v283_v15 = vld [vmem:[%s1088_s19 + $0x360] sm:$0xff] }
  0x14   : > { %479 = vmatprep.subr.mxu0 %v293_v9  ;;  %556 = vmatprep.subr.mxu1 %v295_v10  ;;  %v285_v16 = vld [vmem:[%s1088_s19 + $0x370] sm:$0xff]  ;;  %v275_v17 = vld [vmem:[%s1088_s19 + $0x320] sm:$0xff]  ;;  %v274_v19 = vld [vmem:[%s1088_s19 + $0x318] sm:$0xff] }
  0x15   : > { %480 = vmatpush1.msra.mxu0 %v292_v11  ;;  %557 = vmatpush1.msra.mxu1 %v294_v12  ;;  %v277_v18 = vld [vmem:[%s1088_s19 + $0x330] sm:$0xff]  ;;  %v276_v20 = vld [vmem:[%s1088_s19 + $0x328] sm:$0xff]  ;;  %v266_v21 = vld [vmem:[%s1088_s19 + $0x2d8] sm:$0xff] }
  0x16   : > { %481 = vmatprep.subr.mxu0 %v284_v13  ;;  %558 = vmatprep.subr.mxu1 %v286_v14  ;;  %v268_v22 = vld [vmem:[%s1088_s19 + $0x2e8] sm:$0xff]  ;;  %v265_v23 = vld [vmem:[%s1088_s19 + $0x2d0] sm:$0xff]  ;;  %v267_v24 = vld [vmem:[%s1088_s19 + $0x2e0] sm:$0xff] }
  0x17   : > { %482 = vmatpush1.msra.mxu0 %v283_v15  ;;  %559 = vmatpush1.msra.mxu1 %v285_v16  ;;  %v257_v25 = vld [vmem:[%s1088_s19 + $0x290] sm:$0xff]  ;;  %v259_v26 = vld [vmem:[%s1088_s19 + $0x2a0] sm:$0xff]  ;;  %v256_v27 = vld [vmem:[%s1088_s19 + $0x288] sm:$0xff] }
  0x18   : > { %483 = vmatprep.subr.mxu0 %v275_v17  ;;  %560 = vmatprep.subr.mxu1 %v277_v18  ;;  %v258_v28 = vld [vmem:[%s1088_s19 + $0x298] sm:$0xff]  ;;  %v248_v29 = vld [vmem:[%s1088_s19 + $0x248] sm:$0xff]  ;;  %v247_v31 = vld [vmem:[%s1088_s19 + $0x240] sm:$0xff] }
  0x19   : > { %484 = vmatpush1.msra.mxu0 %v274_v19  ;;  %561 = vmatpush1.msra.mxu1 %v276_v20  ;;  %v250_v30 = vld [vmem:[%s1088_s19 + $0x258] sm:$0xff]  ;;  %v249_v32 = vld [vmem:[%s1088_s19 + $0x250] sm:$0xff]  ;;  %v239_v33 = vld [vmem:[%s1088_s19 + $0x200] sm:$0xff] }
  0x1a   : > { %485 = vmatprep.subr.mxu0 %v266_v21  ;;  %562 = vmatprep.subr.mxu1 %v268_v22  ;;  %v241_v34 = vld [vmem:[%s1088_s19 + $0x210] sm:$0xff]  ;;  %v238_v35 = vld [vmem:[%s1088_s19 + $0x1f8] sm:$0xff]  ;;  %v240_v36 = vld [vmem:[%s1088_s19 + $0x208] sm:$0xff] }
  0x1b   : > { %486 = vmatpush1.msra.mxu0 %v265_v23  ;;  %563 = vmatpush1.msra.mxu1 %v267_v24  ;;  %v230_v37 = vld [vmem:[%s1088_s19 + $0x1b8] sm:$0xff]  ;;  %v232_v38 = vld [vmem:[%s1088_s19 + $0x1c8] sm:$0xff]  ;;  %v229_v39 = vld [vmem:[%s1088_s19 + $0x1b0] sm:$0xff] }
  0x1c   : > { %487 = vmatprep.subr.mxu0 %v257_v25  ;;  %564 = vmatprep.subr.mxu1 %v259_v26  ;;  %v231_v40 = vld [vmem:[%s1088_s19 + $0x1c0] sm:$0xff]  ;;  %v221_v41 = vld [vmem:[%s1088_s19 + $0x170] sm:$0xff]  ;;  %v220_v43 = vld [vmem:[%s1088_s19 + $0x168] sm:$0xff] }
  0x1d   : > { %488 = vmatpush1.msra.mxu0 %v256_v27  ;;  %565 = vmatpush1.msra.mxu1 %v258_v28  ;;  %v223_v42 = vld [vmem:[%s1088_s19 + $0x180] sm:$0xff]  ;;  %v222_v44 = vld [vmem:[%s1088_s19 + $0x178] sm:$0xff]  ;;  %v212_v45 = vld [vmem:[%s1088_s19 + $0x128] sm:$0xff] }
  0x1e   : > { %489 = vmatprep.subr.mxu0 %v248_v29  ;;  %566 = vmatprep.subr.mxu1 %v250_v30  ;;  %v214_v46 = vld [vmem:[%s1088_s19 + $0x138] sm:$0xff]  ;;  %v211_v47 = vld [vmem:[%s1088_s19 + $0x120] sm:$0xff]  ;;  %v213_v48 = vld [vmem:[%s1088_s19 + $0x130] sm:$0xff] }
  0x1f   : > { %490 = vmatpush1.msra.mxu0 %v247_v31  ;;  %567 = vmatpush1.msra.mxu1 %v249_v32  ;;  %v203_v49 = vld [vmem:[%s1088_s19 + $0xe0] sm:$0xff]  ;;  %v205_v50 = vld [vmem:[%s1088_s19 + $0xf0] sm:$0xff]  ;;  %v202_v51 = vld [vmem:[%s1088_s19 + $0xd8] sm:$0xff] }
  0x20   : > { %491 = vmatprep.subr.mxu0 %v239_v33  ;;  %568 = vmatprep.subr.mxu1 %v241_v34  ;;  %v204_v52 = vld [vmem:[%s1088_s19 + $0xe8] sm:$0xff]  ;;  %v194_v53 = vld [vmem:[%s1088_s19 + $0x98] sm:$0xff]  ;;  %v193_v55 = vld [vmem:[%s1088_s19 + $0x90] sm:$0xff] }
  0x21   : > { %492 = vmatpush1.msra.mxu0 %v238_v35  ;;  %569 = vmatpush1.msra.mxu1 %v240_v36  ;;  %v196_v54 = vld [vmem:[%s1088_s19 + $0xa8] sm:$0xff]  ;;  %v195_v56 = vld [vmem:[%s1088_s19 + $0xa0] sm:$0xff]  ;;  %v185_v57 = vld [vmem:[%s1088_s19 + $0x50] sm:$0xff] }
  0x22   : > { %493 = vmatprep.subr.mxu0 %v230_v37  ;;  %570 = vmatprep.subr.mxu1 %v232_v38  ;;  %v187_v58 = vld [vmem:[%s1088_s19 + $0x60] sm:$0xff]  ;;  %v184_v59 = vld [vmem:[%s1088_s19 + $0x48] sm:$0xff]  ;;  %v186_v60 = vld [vmem:[%s1088_s19 + $0x58] sm:$0xff] }
  0x23   : > { %494 = vmatpush1.msra.mxu0 %v229_v39  ;;  %571 = vmatpush1.msra.mxu1 %v231_v40  ;;  %v176_v61 = vld [vmem:[%s1088_s19 + $0x8] sm:$0xff]  ;;  %v178_v62 = vld [vmem:[%s1088_s19 + $0x18] sm:$0xff]  ;;  %v175_v63 = vld [vmem:[%s1088_s19] sm:$0xff] }
  0x24   : > { %495 = vmatprep.subr.mxu0 %v221_v41  ;;  %572 = vmatprep.subr.mxu1 %v223_v42  ;;  %v177_v0 = vld [vmem:[%s1088_s19 + $0x10] sm:$0xff]  ;;  %v455_v1 = vld [vmem:[%s1088_s19 + $0x8c0] sm:$0xff]  ;;  %v454_v3 = vld [vmem:[%s1088_s19 + $0x8b8] sm:$0xff] }
  0x25   : > { %496 = vmatpush1.msra.mxu0 %v220_v43  ;;  %573 = vmatpush1.msra.mxu1 %v222_v44  ;;  %v457_v2 = vld [vmem:[%s1088_s19 + $0x8d0] sm:$0xff]  ;;  %v456_v4 = vld [vmem:[%s1088_s19 + $0x8c8] sm:$0xff]  ;;  %v446_v5 = vld [vmem:[%s1088_s19 + $0x878] sm:$0xff] }
  0x26   : > { %497 = vmatprep.subr.mxu0 %v212_v45  ;;  %574 = vmatprep.subr.mxu1 %v214_v46  ;;  %v448_v6 = vld [vmem:[%s1088_s19 + $0x888] sm:$0xff]  ;;  %v445_v7 = vld [vmem:[%s1088_s19 + $0x870] sm:$0xff]  ;;  %v447_v8 = vld [vmem:[%s1088_s19 + $0x880] sm:$0xff] }
  0x27   : > { %498 = vmatpush1.msra.mxu0 %v211_v47  ;;  %575 = vmatpush1.msra.mxu1 %v213_v48  ;;  %v437_v9 = vld [vmem:[%s1088_s19 + $0x830] sm:$0xff]  ;;  %v439_v10 = vld [vmem:[%s1088_s19 + $0x840] sm:$0xff]  ;;  %v436_v11 = vld [vmem:[%s1088_s19 + $0x828] sm:$0xff] }
  0x28   : > { %499 = vmatprep.subr.mxu0 %v203_v49  ;;  %576 = vmatprep.subr.mxu1 %v205_v50  ;;  %v438_v12 = vld [vmem:[%s1088_s19 + $0x838] sm:$0xff]  ;;  %v428_v13 = vld [vmem:[%s1088_s19 + $0x7e8] sm:$0xff]  ;;  %v427_v15 = vld [vmem:[%s1088_s19 + $0x7e0] sm:$0xff] }
  0x29   : > { %500 = vmatpush1.msra.mxu0 %v202_v51  ;;  %577 = vmatpush1.msra.mxu1 %v204_v52  ;;  %v430_v14 = vld [vmem:[%s1088_s19 + $0x7f8] sm:$0xff]  ;;  %v429_v16 = vld [vmem:[%s1088_s19 + $0x7f0] sm:$0xff]  ;;  %v419_v17 = vld [vmem:[%s1088_s19 + $0x7a0] sm:$0xff] }
  0x2a   : > { %501 = vmatprep.subr.mxu0 %v194_v53  ;;  %578 = vmatprep.subr.mxu1 %v196_v54  ;;  %v421_v18 = vld [vmem:[%s1088_s19 + $0x7b0] sm:$0xff]  ;;  %v418_v19 = vld [vmem:[%s1088_s19 + $0x798] sm:$0xff]  ;;  %v420_v20 = vld [vmem:[%s1088_s19 + $0x7a8] sm:$0xff] }
  0x2b   : > { %502 = vmatpush1.msra.mxu0 %v193_v55  ;;  %579 = vmatpush1.msra.mxu1 %v195_v56  ;;  %v410_v21 = vld [vmem:[%s1088_s19 + $0x758] sm:$0xff]  ;;  %v412_v22 = vld [vmem:[%s1088_s19 + $0x768] sm:$0xff]  ;;  %v409_v23 = vld [vmem:[%s1088_s19 + $0x750] sm:$0xff] }
  0x2c   : > { %503 = vmatprep.subr.mxu0 %v185_v57  ;;  %580 = vmatprep.subr.mxu1 %v187_v58  ;;  %v411_v24 = vld [vmem:[%s1088_s19 + $0x760] sm:$0xff]  ;;  %v401_v25 = vld [vmem:[%s1088_s19 + $0x710] sm:$0xff]  ;;  %v400_v27 = vld [vmem:[%s1088_s19 + $0x708] sm:$0xff] }
  0x2d   : > { %504 = vmatpush1.msra.mxu0 %v184_v59  ;;  %581 = vmatpush1.msra.mxu1 %v186_v60  ;;  %v403_v26 = vld [vmem:[%s1088_s19 + $0x720] sm:$0xff]  ;;  %v402_v28 = vld [vmem:[%s1088_s19 + $0x718] sm:$0xff]  ;;  %v392_v29 = vld [vmem:[%s1088_s19 + $0x6c8] sm:$0xff] }
  0x2e   : > { %505 = vmatprep.subr.mxu0 %v176_v61  ;;  %582 = vmatprep.subr.mxu1 %v178_v62  ;;  %v394_v30 = vld [vmem:[%s1088_s19 + $0x6d8] sm:$0xff]  ;;  %v391_v31 = vld [vmem:[%s1088_s19 + $0x6c0] sm:$0xff]  ;;  %v393_v32 = vld [vmem:[%s1088_s19 + $0x6d0] sm:$0xff] }
  0x2f   : > { %506 = vmatpush1.msra.mxu0 %v175_v63  ;;  %583 = vmatpush1.msra.mxu1 %v177_v0  ;;  %v383_v33 = vld [vmem:[%s1088_s19 + $0x680] sm:$0xff]  ;;  %v385_v34 = vld [vmem:[%s1088_s19 + $0x690] sm:$0xff]  ;;  %v382_v35 = vld [vmem:[%s1088_s19 + $0x678] sm:$0xff] }
  0x30   : > { %507 = vmatprep.subr.mxu0 %v455_v1  ;;  %584 = vmatprep.subr.mxu1 %v457_v2  ;;  %v384_v36 = vld [vmem:[%s1088_s19 + $0x688] sm:$0xff]  ;;  %v374_v37 = vld [vmem:[%s1088_s19 + $0x638] sm:$0xff]  ;;  %v373_v39 = vld [vmem:[%s1088_s19 + $0x630] sm:$0xff] }
  0x31   : > { %508 = vmatpush2.msra.mxu0 %v454_v3  ;;  %585 = vmatpush2.msra.mxu1 %v456_v4  ;;  %v376_v38 = vld [vmem:[%s1088_s19 + $0x648] sm:$0xff]  ;;  %v375_v40 = vld [vmem:[%s1088_s19 + $0x640] sm:$0xff]  ;;  %v365_v41 = vld [vmem:[%s1088_s19 + $0x5f0] sm:$0xff] }
  0x32   : > { %509 = vmatprep.subr.mxu0 %v446_v5  ;;  %586 = vmatprep.subr.mxu1 %v448_v6  ;;  %v367_v42 = vld [vmem:[%s1088_s19 + $0x600] sm:$0xff]  ;;  %v364_v43 = vld [vmem:[%s1088_s19 + $0x5e8] sm:$0xff]  ;;  %v366_v44 = vld [vmem:[%s1088_s19 + $0x5f8] sm:$0xff] }
  0x33   : > { %510 = vmatpush2.msra.mxu0 %v445_v7  ;;  %587 = vmatpush2.msra.mxu1 %v447_v8  ;;  %v356_v45 = vld [vmem:[%s1088_s19 + $0x5a8] sm:$0xff]  ;;  %v358_v46 = vld [vmem:[%s1088_s19 + $0x5b8] sm:$0xff]  ;;  %v355_v47 = vld [vmem:[%s1088_s19 + $0x5a0] sm:$0xff] }
  0x34   : > { %511 = vmatprep.subr.mxu0 %v437_v9  ;;  %588 = vmatprep.subr.mxu1 %v439_v10  ;;  %v357_v48 = vld [vmem:[%s1088_s19 + $0x5b0] sm:$0xff]  ;;  %v347_v49 = vld [vmem:[%s1088_s19 + $0x560] sm:$0xff]  ;;  %v346_v51 = vld [vmem:[%s1088_s19 + $0x558] sm:$0xff] }
  0x35   : > { %512 = vmatpush2.msra.mxu0 %v436_v11  ;;  %589 = vmatpush2.msra.mxu1 %v438_v12  ;;  %v349_v50 = vld [vmem:[%s1088_s19 + $0x570] sm:$0xff]  ;;  %v348_v52 = vld [vmem:[%s1088_s19 + $0x568] sm:$0xff]  ;;  %v338_v53 = vld [vmem:[%s1088_s19 + $0x518] sm:$0xff] }
  0x36   : > { %513 = vmatprep.subr.mxu0 %v428_v13  ;;  %590 = vmatprep.subr.mxu1 %v430_v14  ;;  %v340_v54 = vld [vmem:[%s1088_s19 + $0x528] sm:$0xff]  ;;  %v337_v55 = vld [vmem:[%s1088_s19 + $0x510] sm:$0xff]  ;;  %v339_v56 = vld [vmem:[%s1088_s19 + $0x520] sm:$0xff] }
  0x37   : > { %514 = vmatpush2.msra.mxu0 %v427_v15  ;;  %591 = vmatpush2.msra.mxu1 %v429_v16  ;;  %v329_v57 = vld [vmem:[%s1088_s19 + $0x4d0] sm:$0xff]  ;;  %v331_v58 = vld [vmem:[%s1088_s19 + $0x4e0] sm:$0xff]  ;;  %v328_v59 = vld [vmem:[%s1088_s19 + $0x4c8] sm:$0xff] }
  0x38   : > { %515 = vmatprep.subr.mxu0 %v419_v17  ;;  %592 = vmatprep.subr.mxu1 %v421_v18  ;;  %v330_v60 = vld [vmem:[%s1088_s19 + $0x4d8] sm:$0xff]  ;;  %v320_v61 = vld [vmem:[%s1088_s19 + $0x488] sm:$0xff]  ;;  %v319_v63 = vld [vmem:[%s1088_s19 + $0x480] sm:$0xff] }
  0x39   : > { %516 = vmatpush2.msra.mxu0 %v418_v19  ;;  %593 = vmatpush2.msra.mxu1 %v420_v20  ;;  %v322_v62 = vld [vmem:[%s1088_s19 + $0x498] sm:$0xff]  ;;  %v321_v0 = vld [vmem:[%s1088_s19 + $0x490] sm:$0xff]  ;;  %v1221_v1 = vld [vmem:[%s1460_s0] sm:$0xff] }
  0x3a   : > { %517 = vmatprep.subr.mxu0 %v410_v21  ;;  %594 = vmatprep.subr.mxu1 %v412_v22  ;;  %v315_v2 = vld [vmem:[%s1088_s19 + $0x460] sm:$0xff]  ;;  %v317_v3 = vld [vmem:[%s1088_s19 + $0x470] sm:$0xff]  ;;  %v314_v4 = vld [vmem:[%s1088_s19 + $0x458] sm:$0xff] }
  0x3b   : > { %518 = vmatpush2.msra.mxu0 %v409_v23  ;;  %595 = vmatpush2.msra.mxu1 %v411_v24  ;;  %v316_v5 = vld [vmem:[%s1088_s19 + $0x468] sm:$0xff]  ;;  %v306_v6 = vld [vmem:[%s1088_s19 + $0x418] sm:$0xff]  ;;  %v305_v8 = vld [vmem:[%s1088_s19 + $0x410] sm:$0xff] }
  0x3c   : > { %519 = vmatprep.subr.mxu0 %v401_v25  ;;  %596 = vmatprep.subr.mxu1 %v403_v26  ;;  %v308_v7 = vld [vmem:[%s1088_s19 + $0x428] sm:$0xff]  ;;  %v307_v9 = vld [vmem:[%s1088_s19 + $0x420] sm:$0xff]  ;;  %v297_v10 = vld [vmem:[%s1088_s19 + $0x3d0] sm:$0xff] }
  0x3d   : > { %520 = vmatpush2.msra.mxu0 %v400_v27  ;;  %597 = vmatpush2.msra.mxu1 %v402_v28  ;;  %v299_v11 = vld [vmem:[%s1088_s19 + $0x3e0] sm:$0xff]  ;;  %v296_v12 = vld [vmem:[%s1088_s19 + $0x3c8] sm:$0xff]  ;;  %v298_v13 = vld [vmem:[%s1088_s19 + $0x3d8] sm:$0xff] }
  0x3e   : > { %521 = vmatprep.subr.mxu0 %v392_v29  ;;  %598 = vmatprep.subr.mxu1 %v394_v30  ;;  %v288_v14 = vld [vmem:[%s1088_s19 + $0x388] sm:$0xff]  ;;  %v290_v15 = vld [vmem:[%s1088_s19 + $0x398] sm:$0xff]  ;;  %v287_v16 = vld [vmem:[%s1088_s19 + $0x380] sm:$0xff] }
  0x3f   : > { %522 = vmatpush2.msra.mxu0 %v391_v31  ;;  %599 = vmatpush2.msra.mxu1 %v393_v32  ;;  %v289_v17 = vld [vmem:[%s1088_s19 + $0x390] sm:$0xff]  ;;  %v279_v18 = vld [vmem:[%s1088_s19 + $0x340] sm:$0xff]  ;;  %v278_v20 = vld [vmem:[%s1088_s19 + $0x338] sm:$0xff] }
  0x40   : > { %523 = vmatprep.subr.mxu0 %v383_v33  ;;  %600 = vmatprep.subr.mxu1 %v385_v34  ;;  %v281_v19 = vld [vmem:[%s1088_s19 + $0x350] sm:$0xff]  ;;  %v280_v21 = vld [vmem:[%s1088_s19 + $0x348] sm:$0xff]  ;;  %v270_v22 = vld [vmem:[%s1088_s19 + $0x2f8] sm:$0xff] }
  0x41   : > { %524 = vmatpush2.msra.mxu0 %v382_v35  ;;  %601 = vmatpush2.msra.mxu1 %v384_v36  ;;  %v272_v23 = vld [vmem:[%s1088_s19 + $0x308] sm:$0xff]  ;;  %v269_v24 = vld [vmem:[%s1088_s19 + $0x2f0] sm:$0xff]  ;;  %v271_v25 = vld [vmem:[%s1088_s19 + $0x300] sm:$0xff] }
  0x42   : > { %525 = vmatprep.subr.mxu0 %v374_v37  ;;  %602 = vmatprep.subr.mxu1 %v376_v38  ;;  %v261_v26 = vld [vmem:[%s1088_s19 + $0x2b0] sm:$0xff]  ;;  %v263_v27 = vld [vmem:[%s1088_s19 + $0x2c0] sm:$0xff]  ;;  %v260_v28 = vld [vmem:[%s1088_s19 + $0x2a8] sm:$0xff] }
  0x43   : > { %526 = vmatpush2.msra.mxu0 %v373_v39  ;;  %603 = vmatpush2.msra.mxu1 %v375_v40  ;;  %v262_v29 = vld [vmem:[%s1088_s19 + $0x2b8] sm:$0xff]  ;;  %v252_v30 = vld [vmem:[%s1088_s19 + $0x268] sm:$0xff]  ;;  %v251_v32 = vld [vmem:[%s1088_s19 + $0x260] sm:$0xff] }
  0x44   : > { %527 = vmatprep.subr.mxu0 %v365_v41  ;;  %604 = vmatprep.subr.mxu1 %v367_v42  ;;  %v254_v31 = vld [vmem:[%s1088_s19 + $0x278] sm:$0xff]  ;;  %v253_v33 = vld [vmem:[%s1088_s19 + $0x270] sm:$0xff]  ;;  %v243_v34 = vld [vmem:[%s1088_s19 + $0x220] sm:$0xff] }
  0x45   : > { %528 = vmatpush2.msra.mxu0 %v364_v43  ;;  %605 = vmatpush2.msra.mxu1 %v366_v44  ;;  %v245_v35 = vld [vmem:[%s1088_s19 + $0x230] sm:$0xff]  ;;  %v242_v36 = vld [vmem:[%s1088_s19 + $0x218] sm:$0xff]  ;;  %v244_v37 = vld [vmem:[%s1088_s19 + $0x228] sm:$0xff] }
  0x46   : > { %529 = vmatprep.subr.mxu0 %v356_v45  ;;  %606 = vmatprep.subr.mxu1 %v358_v46  ;;  %v234_v38 = vld [vmem:[%s1088_s19 + $0x1d8] sm:$0xff]  ;;  %v236_v39 = vld [vmem:[%s1088_s19 + $0x1e8] sm:$0xff]  ;;  %v233_v40 = vld [vmem:[%s1088_s19 + $0x1d0] sm:$0xff] }
  0x47   : > { %530 = vmatpush2.msra.mxu0 %v355_v47  ;;  %607 = vmatpush2.msra.mxu1 %v357_v48  ;;  %v235_v41 = vld [vmem:[%s1088_s19 + $0x1e0] sm:$0xff]  ;;  %v225_v42 = vld [vmem:[%s1088_s19 + $0x190] sm:$0xff]  ;;  %v224_v44 = vld [vmem:[%s1088_s19 + $0x188] sm:$0xff] }
  0x48   : > { %531 = vmatprep.subr.mxu0 %v347_v49  ;;  %608 = vmatprep.subr.mxu1 %v349_v50  ;;  %v227_v43 = vld [vmem:[%s1088_s19 + $0x1a0] sm:$0xff]  ;;  %v226_v45 = vld [vmem:[%s1088_s19 + $0x198] sm:$0xff]  ;;  %v216_v46 = vld [vmem:[%s1088_s19 + $0x148] sm:$0xff] }
  0x49   : > { %532 = vmatpush2.msra.mxu0 %v346_v51  ;;  %609 = vmatpush2.msra.mxu1 %v348_v52  ;;  %v218_v47 = vld [vmem:[%s1088_s19 + $0x158] sm:$0xff]  ;;  %v215_v48 = vld [vmem:[%s1088_s19 + $0x140] sm:$0xff]  ;;  %v217_v49 = vld [vmem:[%s1088_s19 + $0x150] sm:$0xff] }
  0x4a   : > { %533 = vmatprep.subr.mxu0 %v338_v53  ;;  %610 = vmatprep.subr.mxu1 %v340_v54  ;;  %v207_v50 = vld [vmem:[%s1088_s19 + $0x100] sm:$0xff]  ;;  %v209_v51 = vld [vmem:[%s1088_s19 + $0x110] sm:$0xff]  ;;  %v206_v52 = vld [vmem:[%s1088_s19 + $0xf8] sm:$0xff] }
  0x4b   : > { %534 = vmatpush2.msra.mxu0 %v337_v55  ;;  %611 = vmatpush2.msra.mxu1 %v339_v56  ;;  %v208_v53 = vld [vmem:[%s1088_s19 + $0x108] sm:$0xff]  ;;  %v198_v54 = vld [vmem:[%s1088_s19 + $0xb8] sm:$0xff]  ;;  %v197_v56 = vld [vmem:[%s1088_s19 + $0xb0] sm:$0xff] }
  0x4c   : > { %535 = vmatprep.subr.mxu0 %v329_v57  ;;  %612 = vmatprep.subr.mxu1 %v331_v58  ;;  %v200_v55 = vld [vmem:[%s1088_s19 + $0xc8] sm:$0xff]  ;;  %v199_v57 = vld [vmem:[%s1088_s19 + $0xc0] sm:$0xff]  ;;  %v189_v58 = vld [vmem:[%s1088_s19 + $0x70] sm:$0xff] }
  0x4d   : > { %536 = vmatpush2.msra.mxu0 %v328_v59  ;;  %613 = vmatpush2.msra.mxu1 %v330_v60  ;;  %v191_v59 = vld [vmem:[%s1088_s19 + $0x80] sm:$0xff]  ;;  %v188_v60 = vld [vmem:[%s1088_s19 + $0x68] sm:$0xff] }
  0x4e   : > { %537 = vmatprep.subr.mxu0 %v320_v61  ;;  %614 = vmatprep.subr.mxu1 %v322_v62  ;;  %v190_v61 = vld [vmem:[%s1088_s19 + $0x78] sm:$0xff]  ;;  %v180_v62 = vld [vmem:[%s1088_s19 + $0x28] sm:$0xff] }
  0x4f   : > { %538 = vmatpush2.msra.mxu0 %v319_v63  ;;  %615 = vmatpush2.msra.mxu1 %v321_v0  ;;  %v182_v63 = vld [vmem:[%s1088_s19 + $0x38] sm:$0xff]  ;;  %v179_v0 = vld [vmem:[%s1088_s19 + $0x20] sm:$0xff] }
  0x50   : > { %540 = vmatmul.mubr.f32.vlgmr.msra.gmra.mxu0 %v1221_v1  ;;  %617 = vmatmul.mubr.f32.vlgmr.msra.gmra.mxu1 %v1221_v1 }
  0x51   : > { %629 = vmatprep.subr.mxu0 %v315_v2  ;;  %706 = vmatprep.subr.mxu1 %v317_v3  ;;  %v181_v2 = vld [vmem:[%s1088_s19 + $0x30] sm:$0xff]  ;;  %v459_v3 = vld [vmem:[%s1088_s19 + $0x8e0] sm:$0xff] }
  0x52   : > { %630 = vmatpush1.msra.mxu0 %v314_v4  ;;  %707 = vmatpush1.msra.mxu1 %v316_v5  ;;  %v461_v4 = vld [vmem:[%s1088_s19 + $0x8f0] sm:$0xff]  ;;  %v458_v5 = vld [vmem:[%s1088_s19 + $0x8d8] sm:$0xff] }
  0x53   : > { %631 = vmatprep.subr.mxu0 %v306_v6  ;;  %708 = vmatprep.subr.mxu1 %v308_v7  ;;  %v460_v6 = vld [vmem:[%s1088_s19 + $0x8e8] sm:$0xff]  ;;  %v450_v7 = vld [vmem:[%s1088_s19 + $0x898] sm:$0xff] }
  0x54   : > { %632 = vmatpush1.msra.mxu0 %v305_v8  ;;  %709 = vmatpush1.msra.mxu1 %v307_v9  ;;  %v452_v8 = vld [vmem:[%s1088_s19 + $0x8a8] sm:$0xff]  ;;  %v449_v9 = vld [vmem:[%s1088_s19 + $0x890] sm:$0xff] }
  0x55   : > { %633 = vmatprep.subr.mxu0 %v297_v10  ;;  %710 = vmatprep.subr.mxu1 %v299_v11  ;;  %v451_v10 = vld [vmem:[%s1088_s19 + $0x8a0] sm:$0xff]  ;;  %v441_v11 = vld [vmem:[%s1088_s19 + $0x850] sm:$0xff] }
  0x56   : > { %634 = vmatpush1.msra.mxu0 %v296_v12  ;;  %711 = vmatpush1.msra.mxu1 %v298_v13  ;;  %v443_v12 = vld [vmem:[%s1088_s19 + $0x860] sm:$0xff]  ;;  %v440_v13 = vld [vmem:[%s1088_s19 + $0x848] sm:$0xff] }
  0x57   : > { %635 = vmatprep.subr.mxu0 %v288_v14  ;;  %712 = vmatprep.subr.mxu1 %v290_v15  ;;  %v442_v14 = vld [vmem:[%s1088_s19 + $0x858] sm:$0xff]  ;;  %v432_v15 = vld [vmem:[%s1088_s19 + $0x808] sm:$0xff] }
  0x58   : > { %636 = vmatpush1.msra.mxu0 %v287_v16  ;;  %713 = vmatpush1.msra.mxu1 %v289_v17  ;;  %v434_v16 = vld [vmem:[%s1088_s19 + $0x818] sm:$0xff]  ;;  %v431_v17 = vld [vmem:[%s1088_s19 + $0x800] sm:$0xff] }
  0x59   : > { %637 = vmatprep.subr.mxu0 %v279_v18  ;;  %714 = vmatprep.subr.mxu1 %v281_v19  ;;  %v433_v18 = vld [vmem:[%s1088_s19 + $0x810] sm:$0xff]  ;;  %v423_v19 = vld [vmem:[%s1088_s19 + $0x7c0] sm:$0xff] }
  0x5a   : > { %638 = vmatpush1.msra.mxu0 %v278_v20  ;;  %715 = vmatpush1.msra.mxu1 %v280_v21  ;;  %v425_v20 = vld [vmem:[%s1088_s19 + $0x7d0] sm:$0xff]  ;;  %v422_v21 = vld [vmem:[%s1088_s19 + $0x7b8] sm:$0xff] }
  0x5b   : > { %639 = vmatprep.subr.mxu0 %v270_v22  ;;  %716 = vmatprep.subr.mxu1 %v272_v23  ;;  %v424_v22 = vld [vmem:[%s1088_s19 + $0x7c8] sm:$0xff]  ;;  %v414_v23 = vld [vmem:[%s1088_s19 + $0x778] sm:$0xff] }
  0x5c   : > { %640 = vmatpush1.msra.mxu0 %v269_v24  ;;  %717 = vmatpush1.msra.mxu1 %v271_v25  ;;  %v416_v24 = vld [vmem:[%s1088_s19 + $0x788] sm:$0xff]  ;;  %v413_v25 = vld [vmem:[%s1088_s19 + $0x770] sm:$0xff] }
  0x5d   : > { %641 = vmatprep.subr.mxu0 %v261_v26  ;;  %718 = vmatprep.subr.mxu1 %v263_v27  ;;  %v415_v26 = vld [vmem:[%s1088_s19 + $0x780] sm:$0xff]  ;;  %v405_v27 = vld [vmem:[%s1088_s19 + $0x730] sm:$0xff] }
  0x5e   : > { %642 = vmatpush1.msra.mxu0 %v260_v28  ;;  %719 = vmatpush1.msra.mxu1 %v262_v29  ;;  %v407_v28 = vld [vmem:[%s1088_s19 + $0x740] sm:$0xff]  ;;  %v404_v29 = vld [vmem:[%s1088_s19 + $0x728] sm:$0xff] }
  0x5f   : > { %643 = vmatprep.subr.mxu0 %v252_v30  ;;  %720 = vmatprep.subr.mxu1 %v254_v31  ;;  %v406_v30 = vld [vmem:[%s1088_s19 + $0x738] sm:$0xff]  ;;  %v396_v31 = vld [vmem:[%s1088_s19 + $0x6e8] sm:$0xff] }
  0x60   : > { %644 = vmatpush1.msra.mxu0 %v251_v32  ;;  %721 = vmatpush1.msra.mxu1 %v253_v33  ;;  %v398_v32 = vld [vmem:[%s1088_s19 + $0x6f8] sm:$0xff]  ;;  %v395_v33 = vld [vmem:[%s1088_s19 + $0x6e0] sm:$0xff] }
  0x61   : > { %645 = vmatprep.subr.mxu0 %v243_v34  ;;  %722 = vmatprep.subr.mxu1 %v245_v35  ;;  %v397_v34 = vld [vmem:[%s1088_s19 + $0x6f0] sm:$0xff]  ;;  %v387_v35 = vld [vmem:[%s1088_s19 + $0x6a0] sm:$0xff] }
  0x62   : > { %646 = vmatpush1.msra.mxu0 %v242_v36  ;;  %723 = vmatpush1.msra.mxu1 %v244_v37  ;;  %v389_v36 = vld [vmem:[%s1088_s19 + $0x6b0] sm:$0xff]  ;;  %v386_v37 = vld [vmem:[%s1088_s19 + $0x698] sm:$0xff] }
  0x63   : > { %647 = vmatprep.subr.mxu0 %v234_v38  ;;  %724 = vmatprep.subr.mxu1 %v236_v39  ;;  %v388_v38 = vld [vmem:[%s1088_s19 + $0x6a8] sm:$0xff]  ;;  %v378_v39 = vld [vmem:[%s1088_s19 + $0x658] sm:$0xff] }
  0x64   : > { %648 = vmatpush1.msra.mxu0 %v233_v40  ;;  %725 = vmatpush1.msra.mxu1 %v235_v41  ;;  %v380_v40 = vld [vmem:[%s1088_s19 + $0x668] sm:$0xff]  ;;  %v377_v41 = vld [vmem:[%s1088_s19 + $0x650] sm:$0xff] }
  0x65   : > { %649 = vmatprep.subr.mxu0 %v225_v42  ;;  %726 = vmatprep.subr.mxu1 %v227_v43  ;;  %v379_v42 = vld [vmem:[%s1088_s19 + $0x660] sm:$0xff]  ;;  %v369_v43 = vld [vmem:[%s1088_s19 + $0x610] sm:$0xff] }
  0x66   : > { %650 = vmatpush1.msra.mxu0 %v224_v44  ;;  %727 = vmatpush1.msra.mxu1 %v226_v45  ;;  %v371_v44 = vld [vmem:[%s1088_s19 + $0x620] sm:$0xff]  ;;  %v368_v45 = vld [vmem:[%s1088_s19 + $0x608] sm:$0xff] }
  0x67   : > { %651 = vmatprep.subr.mxu0 %v216_v46  ;;  %728 = vmatprep.subr.mxu1 %v218_v47  ;;  %v370_v46 = vld [vmem:[%s1088_s19 + $0x618] sm:$0xff]  ;;  %v360_v47 = vld [vmem:[%s1088_s19 + $0x5c8] sm:$0xff] }
  0x68   : > { %652 = vmatpush1.msra.mxu0 %v215_v48  ;;  %729 = vmatpush1.msra.mxu1 %v217_v49  ;;  %v362_v48 = vld [vmem:[%s1088_s19 + $0x5d8] sm:$0xff]  ;;  %v359_v49 = vld [vmem:[%s1088_s19 + $0x5c0] sm:$0xff] }
  0x69   : > { %653 = vmatprep.subr.mxu0 %v207_v50  ;;  %730 = vmatprep.subr.mxu1 %v209_v51  ;;  %v361_v50 = vld [vmem:[%s1088_s19 + $0x5d0] sm:$0xff]  ;;  %v351_v51 = vld [vmem:[%s1088_s19 + $0x580] sm:$0xff] }
  0x6a   : > { %654 = vmatpush1.msra.mxu0 %v206_v52  ;;  %731 = vmatpush1.msra.mxu1 %v208_v53  ;;  %v353_v52 = vld [vmem:[%s1088_s19 + $0x590] sm:$0xff]  ;;  %v350_v53 = vld [vmem:[%s1088_s19 + $0x578] sm:$0xff] }
  0x6b   : > { %655 = vmatprep.subr.mxu0 %v198_v54  ;;  %732 = vmatprep.subr.mxu1 %v200_v55  ;;  %v352_v54 = vld [vmem:[%s1088_s19 + $0x588] sm:$0xff]  ;;  %v1344_v55 = vld [vmem:[%s1460_s0 + $0x18] sm:$0xff] }
  0x6c   : > { %656 = vmatpush1.msra.mxu0 %v197_v56  ;;  %733 = vmatpush1.msra.mxu1 %v199_v57  ;;  %v342_v56 = vld [vmem:[%s1088_s19 + $0x538] sm:$0xff]  ;;  %v344_v57 = vld [vmem:[%s1088_s19 + $0x548] sm:$0xff] }
  0x6d   : > { %657 = vmatprep.subr.mxu0 %v189_v58  ;;  %734 = vmatprep.subr.mxu1 %v191_v59  ;;  %v1351_v58 = vld [vmem:[%s1460_s0 + $0x10] sm:$0xff] }
  0x6e   : > { %658 = vmatpush1.msra.mxu0 %v188_v60  ;;  %735 = vmatpush1.msra.mxu1 %v190_v61  ;;  %v341_v59 = vld [vmem:[%s1088_s19 + $0x530] sm:$0xff]  ;;  %v343_v60 = vld [vmem:[%s1088_s19 + $0x540] sm:$0xff] }
  0x6f   : > { %659 = vmatprep.subr.mxu0 %v180_v62  ;;  %736 = vmatprep.subr.mxu1 %v182_v63  ;;  %v333_v61 = vld [vmem:[%s1088_s19 + $0x4f0] sm:$0xff]  ;;  %v335_v62 = vld [vmem:[%s1088_s19 + $0x500] sm:$0xff]  ;;  %v332_v63 = vld [vmem:[%s1088_s19 + $0x4e8] sm:$0xff] }
  0x70   : > { %660 = vmatpush1.msra.mxu0 %v179_v0  ;;  %737 = vmatpush1.msra.mxu1 %v181_v2  ;;  %v334_v0 = vld [vmem:[%s1088_s19 + $0x4f8] sm:$0xff]  ;;  %v324_v2 = vld [vmem:[%s1088_s19 + $0x4a8] sm:$0xff] }
  0x71   : > { %661 = vmatprep.subr.mxu0 %v459_v3  ;;  %738 = vmatprep.subr.mxu1 %v461_v4  ;;  %v326_v3 = vld [vmem:[%s1088_s19 + $0x4b8] sm:$0xff]  ;;  %v323_v4 = vld [vmem:[%s1088_s19 + $0x4a0] sm:$0xff] }
  0x72   : > { %662 = vmatpush2.msra.mxu0 %v458_v5  ;;  %739 = vmatpush2.msra.mxu1 %v460_v6  ;;  %v325_v5 = vld [vmem:[%s1088_s19 + $0x4b0] sm:$0xff]  ;;  %v1370_v6 = vld [vmem:[%s1460_s0 + $0x8] sm:$0xff] }
  0x73   : > { %663 = vmatprep.subr.mxu0 %v450_v7  ;;  %740 = vmatprep.subr.mxu1 %v452_v8  ;;  %v462_v7 = vld [vmem:[%s1088_s19 + $0x8f8] sm:$0xff] }
  0x74   : > { %664 = vmatpush2.msra.mxu0 %v449_v9  ;;  %741 = vmatpush2.msra.mxu1 %v451_v10  ;;  %v318_v8 = vld [vmem:[%s1088_s19 + $0x478] sm:$0xff]  ;;  %v453_v9 = vld [vmem:[%s1088_s19 + $0x8b0] sm:$0xff] }
  0x75   : > { %665 = vmatprep.subr.mxu0 %v441_v11  ;;  %742 = vmatprep.subr.mxu1 %v443_v12  ;;  %v309_v10 = vld [vmem:[%s1088_s19 + $0x430] sm:$0xff]  ;;  %v444_v11 = vld [vmem:[%s1088_s19 + $0x868] sm:$0xff] }
  0x76   : > { %666 = vmatpush2.msra.mxu0 %v440_v13  ;;  %743 = vmatpush2.msra.mxu1 %v442_v14  ;;  %v300_v12 = vld [vmem:[%s1088_s19 + $0x3e8] sm:$0xff]  ;;  %v463_v13 = vld [vmem:[%s1461_s1] sm:$0xff] }
  0x77   : > { %667 = vmatprep.subr.mxu0 %v432_v15  ;;  %744 = vmatprep.subr.mxu1 %v434_v16  ;;  %v435_v14 = vld [vmem:[%s1088_s19 + $0x820] sm:$0xff]  ;;  %v1050_v15 = vmov 0  }
  0x78   : > { %668 = vmatpush2.msra.mxu0 %v431_v17  ;;  %745 = vmatpush2.msra.mxu1 %v433_v18  ;;  %v291_v16 = vld [vmem:[%s1088_s19 + $0x3a0] sm:$0xff]  ;;  %v426_v17 = vld [vmem:[%s1088_s19 + $0x7d8] sm:$0xff] }
  0x79   : > { %669 = vmatprep.subr.mxu0 %v423_v19  ;;  %746 = vmatprep.subr.mxu1 %v425_v20  ;;  %v282_v18 = vld [vmem:[%s1088_s19 + $0x358] sm:$0xff]  ;;  %v417_v19 = vld [vmem:[%s1088_s19 + $0x790] sm:$0xff] }
  0x7a   : > { %670 = vmatpush2.msra.mxu0 %v422_v21  ;;  %747 = vmatpush2.msra.mxu1 %v424_v22  ;;  %v273_v20 = vld [vmem:[%s1088_s19 + $0x310] sm:$0xff]  ;;  %v408_v21 = vld [vmem:[%s1088_s19 + $0x748] sm:$0xff] }
  0x7b   : > { %671 = vmatprep.subr.mxu0 %v414_v23  ;;  %748 = vmatprep.subr.mxu1 %v416_v24  ;;  %v264_v22 = vld [vmem:[%s1088_s19 + $0x2c8] sm:$0xff]  ;;  %v399_v23 = vld [vmem:[%s1088_s19 + $0x700] sm:$0xff] }
  0x7c   : > { %672 = vmatpush2.msra.mxu0 %v413_v25  ;;  %749 = vmatpush2.msra.mxu1 %v415_v26  ;;  %v255_v24 = vld [vmem:[%s1088_s19 + $0x280] sm:$0xff]  ;;  %v390_v25 = vld [vmem:[%s1088_s19 + $0x6b8] sm:$0xff] }
  0x7d   : > { %673 = vmatprep.subr.mxu0 %v405_v27  ;;  %750 = vmatprep.subr.mxu1 %v407_v28  ;;  %v246_v26 = vld [vmem:[%s1088_s19 + $0x238] sm:$0xff]  ;;  %v381_v27 = vld [vmem:[%s1088_s19 + $0x670] sm:$0xff] }
  0x7e   : > { %674 = vmatpush2.msra.mxu0 %v404_v29  ;;  %751 = vmatpush2.msra.mxu1 %v406_v30  ;;  %v237_v28 = vld [vmem:[%s1088_s19 + $0x1f0] sm:$0xff]  ;;  %v372_v29 = vld [vmem:[%s1088_s19 + $0x628] sm:$0xff] }
  0x7f   : > { %675 = vmatprep.subr.mxu0 %v396_v31  ;;  %752 = vmatprep.subr.mxu1 %v398_v32  ;;  %v228_v30 = vld [vmem:[%s1088_s19 + $0x1a8] sm:$0xff]  ;;  %v363_v31 = vld [vmem:[%s1088_s19 + $0x5e0] sm:$0xff] }
  0x80   : > { %676 = vmatpush2.msra.mxu0 %v395_v33  ;;  %753 = vmatpush2.msra.mxu1 %v397_v34  ;;  %v219_v32 = vld [vmem:[%s1088_s19 + $0x160] sm:$0xff]  ;;  %v354_v33 = vld [vmem:[%s1088_s19 + $0x598] sm:$0xff] }
  0x81   : > { %677 = vmatprep.subr.mxu0 %v387_v35  ;;  %754 = vmatprep.subr.mxu1 %v389_v36  ;;  %v210_v34 = vld [vmem:[%s1088_s19 + $0x118] sm:$0xff]  ;;  %v345_v35 = vld [vmem:[%s1088_s19 + $0x550] sm:$0xff] }
  0x82   : > { %678 = vmatpush2.msra.mxu0 %v386_v37  ;;  %755 = vmatpush2.msra.mxu1 %v388_v38  ;;  %v201_v36 = vld [vmem:[%s1088_s19 + $0xd0] sm:$0xff]  ;;  %v336_v37 = vld [vmem:[%s1088_s19 + $0x508] sm:$0xff] }
  0x83   : > { %679 = vmatprep.subr.mxu0 %v378_v39  ;;  %756 = vmatprep.subr.mxu1 %v380_v40  ;;  %v192_v38 = vld [vmem:[%s1088_s19 + $0x88] sm:$0xff]  ;;  %v327_v39 = vld [vmem:[%s1088_s19 + $0x4c0] sm:$0xff] }
  0x84   : > { %680 = vmatpush2.msra.mxu0 %v377_v41  ;;  %757 = vmatpush2.msra.mxu1 %v379_v42  ;;  %v183_v40 = vld [vmem:[%s1088_s19 + $0x40] sm:$0xff]  ;;  %v464_v41 = vld [vmem:[%s1461_s1 + $0x8] sm:$0xff] }
  0x85   : > { %681 = vmatprep.subr.mxu0 %v369_v43  ;;  %758 = vmatprep.subr.mxu1 %v371_v44 }
  0x86   : > { %682 = vmatpush2.msra.mxu0 %v368_v45  ;;  %759 = vmatpush2.msra.mxu1 %v370_v46 }
  0x87   : > { %683 = vmatprep.subr.mxu0 %v360_v47  ;;  %760 = vmatprep.subr.mxu1 %v362_v48 }
  0x88   : > { %684 = vmatpush2.msra.mxu0 %v359_v49  ;;  %761 = vmatpush2.msra.mxu1 %v361_v50 }
  0x89   : > { %685 = vmatprep.subr.mxu0 %v351_v51  ;;  %762 = vmatprep.subr.mxu1 %v353_v52 }
  0x8a   : > { %686 = vmatpush2.msra.mxu0 %v350_v53  ;;  %763 = vmatpush2.msra.mxu1 %v352_v54 }
  0x8b   : > { %545 = vmatprep.mubr.f32.mxu0 %v1344_v55  ;;  %622 = vmatprep.mubr.f32.mxu1 %v1344_v55 }
  0x8c   : > { %687 = vmatprep.subr.mxu0 %v342_v56  ;;  %764 = vmatprep.subr.mxu1 %v344_v57 }
  0x8d   : > { %546 = vmatmul.mubr.f32.gmra.mxu0 %v1351_v58  ;;  %623 = vmatmul.mubr.f32.gmra.mxu1 %v1351_v58 }
  0x8e   : > { %688 = vmatpush2.msra.mxu0 %v341_v59  ;;  %765 = vmatpush2.msra.mxu1 %v343_v60 }
  0x8f   : > { %689 = vmatprep.subr.mxu0 %v333_v61  ;;  %766 = vmatprep.subr.mxu1 %v335_v62 }
  0x90   : > { %690 = vmatpush2.msra.mxu0 %v332_v63  ;;  %767 = vmatpush2.msra.mxu1 %v334_v0 }
  0x91   : > { %691 = vmatprep.subr.mxu0 %v324_v2  ;;  %768 = vmatprep.subr.mxu1 %v326_v3 }
  0x92   : > { %692 = vmatpush2.msra.mxu0 %v323_v4  ;;  %693 = vmatprep.mubr.f32.mxu0 %v1370_v6 }
  0x93   : > { %769 = vmatpush2.msra.mxu1 %v325_v5  ;;  %770 = vmatprep.mubr.f32.mxu1 %v1370_v6 }
  0x94   : > { %694 = vmatmul.mubr.f32.vlgmr.msra.gmra.mxu0 %v1221_v1  ;;  %771 = vmatmul.mubr.f32.vlgmr.msra.gmra.mxu1 %v1221_v1 }
  0x95   : > { %959 = vmatprep.subr.mxu0 %v462_v7  ;;  %997 = vmatprep.subr.mxu1 %v462_v7 }
  0x96   : > { %960 = vmatpush3.msra.mxu0 %v318_v8  ;;  %1013 = vmatpush3.msra.mxu1 %v318_v8 }
  0x97   : > { %961 = vmatprep.subr.mxu0 %v453_v9  ;;  %998 = vmatprep.subr.mxu1 %v453_v9 }
  0x98   : > { %962 = vmatpush3.msra.mxu0 %v309_v10  ;;  %1014 = vmatpush3.msra.mxu1 %v309_v10 }
  0x99   : > { %963 = vmatprep.subr.mxu0 %v444_v11  ;;  %999 = vmatprep.subr.mxu1 %v444_v11 }
  0x9a   : > { %1040 = vset.pattern.permute.xlu0 %v1050_v15  ;;  %964 = vmatpush3.msra.mxu0 %v300_v12 }
  0x9b   : > { %1015 = vmatpush3.msra.mxu1 %v300_v12  ;;  %467 = vperm.xlu0 %1040, %v463_v13  }
  0x9c   : > { %965 = vmatprep.subr.mxu0 %v435_v14  ;;  %1000 = vmatprep.subr.mxu1 %v435_v14 }
  0x9d   : > { %966 = vmatpush3.msra.mxu0 %v291_v16  ;;  %1016 = vmatpush3.msra.mxu1 %v291_v16 }
  0x9e   : > { %967 = vmatprep.subr.mxu0 %v426_v17  ;;  %1001 = vmatprep.subr.mxu1 %v426_v17 }
  0x9f   : > { %968 = vmatpush3.msra.mxu0 %v282_v18  ;;  %1017 = vmatpush3.msra.mxu1 %v282_v18 }
  0xa0   : > { %969 = vmatprep.subr.mxu0 %v417_v19  ;;  %1002 = vmatprep.subr.mxu1 %v417_v19 }
  0xa1   : > { %970 = vmatpush3.msra.mxu0 %v273_v20  ;;  %1018 = vmatpush3.msra.mxu1 %v273_v20 }
  0xa2   : > { %971 = vmatprep.subr.mxu0 %v408_v21  ;;  %1003 = vmatprep.subr.mxu1 %v408_v21 }
  0xa3   : > { %972 = vmatpush3.msra.mxu0 %v264_v22  ;;  %1019 = vmatpush3.msra.mxu1 %v264_v22 }
  0xa4   : > { %973 = vmatprep.subr.mxu0 %v399_v23  ;;  %1004 = vmatprep.subr.mxu1 %v399_v23 }
  0xa5   : > { %974 = vmatpush3.msra.mxu0 %v255_v24  ;;  %1020 = vmatpush3.msra.mxu1 %v255_v24 }
  0xa6   : > { %975 = vmatprep.subr.mxu0 %v390_v25  ;;  %1005 = vmatprep.subr.mxu1 %v390_v25 }
  0xa7   : > { %976 = vmatpush3.msra.mxu0 %v246_v26  ;;  %1021 = vmatpush3.msra.mxu1 %v246_v26 }
  0xa8   : > { %977 = vmatprep.subr.mxu0 %v381_v27  ;;  %1006 = vmatprep.subr.mxu1 %v381_v27 }
  0xa9   : > { %978 = vmatpush3.msra.mxu0 %v237_v28  ;;  %1022 = vmatpush3.msra.mxu1 %v237_v28 }
  0xaa   : > { %979 = vmatprep.subr.mxu0 %v372_v29  ;;  %1007 = vmatprep.subr.mxu1 %v372_v29 }
  0xab   : > { %980 = vmatpush3.msra.mxu0 %v228_v30  ;;  %1023 = vmatpush3.msra.mxu1 %v228_v30 }
  0xac   : > { %981 = vmatprep.subr.mxu0 %v363_v31  ;;  %1008 = vmatprep.subr.mxu1 %v363_v31 }
  0xad   : > { %982 = vmatpush3.msra.mxu0 %v219_v32  ;;  %1024 = vmatpush3.msra.mxu1 %v219_v32 }
  0xae   : > { %983 = vmatprep.subr.mxu0 %v354_v33  ;;  %1009 = vmatprep.subr.mxu1 %v354_v33 }
  0xaf   : > { %699 = vmatprep.mubr.f32.mxu0 %v1344_v55  ;;  %776 = vmatprep.mubr.f32.mxu1 %v1344_v55 }
  0xb0   : > { %984 = vmatpush3.msra.mxu0 %v210_v34  ;;  %1025 = vmatpush3.msra.mxu1 %v210_v34 }
  0xb1   : > { %700 = vmatmul.mubr.f32.gmra.mxu0 %v1351_v58  ;;  %777 = vmatmul.mubr.f32.gmra.mxu1 %v1351_v58 }
  0xb2   : > { %985 = vmatprep.subr.mxu0 %v345_v35  ;;  %1010 = vmatprep.subr.mxu1 %v345_v35 }
  0xb3   : > { %986 = vmatpush3.msra.mxu0 %v201_v36  ;;  %1026 = vmatpush3.msra.mxu1 %v201_v36 }
  0xb4   : > { %987 = vmatprep.subr.mxu0 %v336_v37  ;;  %1011 = vmatprep.subr.mxu1 %v336_v37 }
  0xb5   : > { %988 = vmatpush3.msra.mxu0 %v192_v38  ;;  %1027 = vmatpush3.msra.mxu1 %v192_v38 }
  0xb6   : > { %989 = vmatprep.subr.mxu0 %v327_v39  ;;  %1012 = vmatprep.subr.mxu1 %v327_v39 }
  0xb7   : > { %990 = vmatpush3.msra.mxu0 %v183_v40  ;;  %1028 = vmatpush3.msra.mxu1 %v183_v40 }
  0xb8   : > { %847 = vmatprep.mubr.f32.mxu0 %v1370_v6  ;;  %852 = vmatprep.mubr.f32.mxu1 %v1344_v55 }
  0xb9   : > { %848 = vmatmul.mubr.f32.vlgmr.msra.gmra.mxu0 %v1221_v1  ;;  %853 = vmatmul.mubr.f32.vlgmr.msra.gmra.mxu1 %v1351_v58 }
  0xba   : > { %472 = vperm.xlu0 %1040, %v464_v41  }
 0x110   : > { %v541_v42 = vpop.f32.mrf.mxu0  ;;  %v618_v43 = vpop.f32.mrf.mxu1 }
 0x112   : > { %v543_v44 = vpop.f32.mrf.mxu0  ;;  %v620_v45 = vpop.f32.mrf.mxu1 }
 0x116   : > { %v1423_v46 = vpop.permute.xlu0 %467 }
 0x117   : > { %v542_v47 = vadd.f32 %v541_v42, %v1423_v46  ;;  %v619_v48 = vadd.f32 %v618_v43, %v1423_v46  ;;  %v544_v49 = vadd.f32 %v543_v44, %v1423_v46  ;;  %v621_v50 = vadd.f32 %v620_v45, %v1423_v46 }
 0x119   : > { %v858_v1 = vmax.f32 %v542_v47, 0.0  ;;  %v860_v51 = vmax.f32 %v619_v48, 0.0  ;;  %v859_v52 = vmax.f32 %v544_v49, 0.0  ;;  %v861_v53 = vmax.f32 %v621_v50, 0.0 }
 0x11b   : > { %876 = vst [vmem:[%s1432_s8] sm:$0xff] %v858_v1  ;;  %878 = vst [vmem:[%s1432_s8 + $0x10] sm:$0xff] %v860_v51 }
 0x11c   : > { %877 = vst [vmem:[%s1432_s8 + $0x8] sm:$0xff] %v859_v52  ;;  %879 = vst [vmem:[%s1432_s8 + $0x18] sm:$0xff] %v861_v53 }
 0x135   : > { %v473_v54 = vpop.permute.xlu0 %472 }
 0x14d   : > { %v547_v55 = vpop.f32.mrf.mxu0  ;;  %v624_v56 = vpop.f32.mrf.mxu1 }
 0x14e   : > { %v548_v57 = vadd.f32 %v547_v55, %v473_v54  ;;  %v625_v58 = vadd.f32 %v624_v56, %v473_v54 }
 0x14f   : > { %v549_v59 = vpop.f32.mrf.mxu0  ;;  %v626_v60 = vpop.f32.mrf.mxu1 }
 0x150   : > { %v867_v61 = vmax.f32 %v548_v57, 0.0  ;;  %v869_v62 = vmax.f32 %v625_v58, 0.0  ;;  %v550_v63 = vadd.f32 %v549_v59, %v473_v54  ;;  %v627_v0 = vadd.f32 %v626_v60, %v473_v54 }
 0x152   : > { %886 = vst [vmem:[%s1432_s8 + $0x48] sm:$0xff] %v867_v61  ;;  %888 = vst [vmem:[%s1432_s8 + $0x58] sm:$0xff] %v869_v62  ;;  %v868_v2 = vmax.f32 %v550_v63, 0.0  ;;  %v870_v3 = vmax.f32 %v627_v0, 0.0 }
 0x154   : > { %887 = vst [vmem:[%s1432_s8 + $0x50] sm:$0xff] %v868_v2  ;;  %889 = vst [vmem:[%s1432_s8 + $0x60] sm:$0xff] %v870_v3  ;;  %v695_v4 = vpop.f32.mrf.mxu0  ;;  %v772_v5 = vpop.f32.mrf.mxu1 }
 0x155   : > { %v696_v6 = vadd.f32 %v695_v4, %v1423_v46  ;;  %v773_v7 = vadd.f32 %v772_v5, %v1423_v46 }
 0x156   : > { %v697_v8 = vpop.f32.mrf.mxu0  ;;  %v774_v9 = vpop.f32.mrf.mxu1 }
 0x157   : > { %v862_v10 = vmax.f32 %v696_v6, 0.0  ;;  %v864_v11 = vmax.f32 %v773_v7, 0.0  ;;  %v698_v12 = vadd.f32 %v697_v8, %v1423_v46  ;;  %v775_v13 = vadd.f32 %v774_v9, %v1423_v46 }
 0x159   : > { %880 = vst [vmem:[%s1432_s8 + $0x20] sm:$0xff] %v862_v10  ;;  %882 = vst [vmem:[%s1432_s8 + $0x30] sm:$0xff] %v864_v11  ;;  %v863_v14 = vmax.f32 %v698_v12, 0.0  ;;  %v865_v15 = vmax.f32 %v775_v13, 0.0 }
 0x15b   : > { %881 = vst [vmem:[%s1432_s8 + $0x28] sm:$0xff] %v863_v14  ;;  %883 = vst [vmem:[%s1432_s8 + $0x38] sm:$0xff] %v865_v15 }
 0x171   : > { %v701_v16 = vpop.f32.mrf.mxu0  ;;  %v778_v17 = vpop.f32.mrf.mxu1 }
 0x172   : > { %v702_v18 = vadd.f32 %v701_v16, %v473_v54  ;;  %v779_v19 = vadd.f32 %v778_v17, %v473_v54 }
 0x173   : > { %v703_v20 = vpop.f32.mrf.mxu0  ;;  %v780_v21 = vpop.f32.mrf.mxu1 }
 0x174   : > { %v871_v22 = vmax.f32 %v702_v18, 0.0  ;;  %v873_v23 = vmax.f32 %v779_v19, 0.0  ;;  %v704_v24 = vadd.f32 %v703_v20, %v473_v54  ;;  %v781_v25 = vadd.f32 %v780_v21, %v473_v54 }
 0x176   : > { %890 = vst [vmem:[%s1432_s8 + $0x68] sm:$0xff] %v871_v22  ;;  %892 = vst [vmem:[%s1432_s8 + $0x78] sm:$0xff] %v873_v23  ;;  %v872_v26 = vmax.f32 %v704_v24, 0.0  ;;  %v874_v27 = vmax.f32 %v781_v25, 0.0 }
 0x178   : > { %891 = vst [vmem:[%s1432_s8 + $0x70] sm:$0xff] %v872_v26  ;;  %893 = vst [vmem:[%s1432_s8 + $0x80] sm:$0xff] %v874_v27 }
 0x179   : > { %v991_v28 = vpop.f32.mrf.mxu0  ;;  %v994_v29 = vpop.f32.mrf.mxu1 }
 0x17b   : > { %v992_v30 = vpop.f32.mrf.mxu0  ;;  %v995_v31 = vpop.f32.mrf.mxu1 }
 0x17c   : > { %v993_v32 = vadd.f32 %v992_v30, %v991_v28  ;;  %v996_v33 = vadd.f32 %v995_v31, %v994_v29 }
 0x17e   : > { %v850_v34 = vadd.f32 %v993_v32, %v1423_v46  ;;  %v855_v35 = vadd.f32 %v996_v33, %v473_v54 }
 0x180   : > { %v866_v36 = vmax.f32 %v850_v34, 0.0  ;;  %v875_v37 = vmax.f32 %v855_v35, 0.0 }
 0x182   : > { %885 = vst.msk [vmem:[%s1432_s8 + $0x40] sm:$0xff] %vm884_vm0, %v866_v36  ;;  %894 = vst.msk [vmem:[%s1432_s8 + $0x88] sm:$0xff] %vm884_vm0, %v875_v37 }
 0x183 PF: > { %s13_s12 = sadd.s32 1, %s1048_s12  }
 0x184   : > { %p10_p4 = scmp.ge.s32.totalorder %s13_s12, 4  }
 0x186   :  { %12 = sbr.rel (!%p10_p4) target bundleno = 1 (0x1), region = 62 }

// kernel: dqn_forward.4
= control target key start
LH: loop header
LB: loop body
LE: loop exit
PB: predicated region body
PF: predicated region fallthrough
CT: control target
= control target key end

     0   :  { %s544_s12 = smov 0   ;;  %s667_s0 = inlined_call_operand.vmem [shape: f32[32,256], index: 0, kind: input, shape index: {}]   ;;  %s668_s1 = inlined_call_operand.vmem [shape: f32[32,1], index: 1, kind: input, shape index: {}]   ;;  %s669_s2 = inlined_call_operand.vmem [shape: f32[2,256,256], index: 2, kind: input, shape index: {}]   ;;  %s670_s3 = inlined_call_operand.vmem [shape: f32[2,32,256], index: 3, kind: output, shape index: {}]  }
   0x1 LB: > { %s427_s13 = sadd.s32 4294967295, %s521_s12   ;;  %p431_p0 = scmp.ge.s32.totalorder %s521_s12, 1  ;;  %s521_s12 = sphi %s544_s12, %s13_s12  }
   0x2   : > { %p137_p1 = scmp.lt.s32.totalorder %s521_s12, 3 }
   0x4   : > { %p138_p2 = pnand %p431_p0, %p137_p1 }
   0x5   : > { %p161_p3 = scmp.lt.s32.totalorder (!%p138_p2), %s427_s13, 1 }
   0x6   : > { %141 = sbr.rel (%p138_p2) target bundleno = 283 (0x11b), region = 32 }
   0xb   : > { %v172_v0 = vld [vmem:[%s667_s0 + $0x8] sm:$0xff]  ;;  %s672_s13 = smov (!%p161_p3, %s427_s13), 1  ;;  %v523_v2 = vmov 0   ;;  %v245_v3 = vld [vmem:[%s668_s1 + $0x10] sm:$0xff]  ;;  %v243_v4 = vld [vmem:[%s668_s1] sm:$0xff] }
   0xc   : > { %v176_v1 = vld [vmem:[%s667_s0 + $0x28] sm:$0xff]  ;;  %331 = vmatprep.mubr.f32.mxu0 %v172_v0  ;;  %514 = vset.pattern.permute.xlu1 %v523_v2  ;;  %s438_s22 = sshll.u32 %s672_s13, 9  ;;  %s439_s17 = sshll.u32 %s672_s13, 6 }
   0xd   : > { %343 = vmatprep.mubr.f32.mxu1 %v176_v1  ;;  %513 = vset.pattern.permute.xlu0 %v523_v2  ;;  %s570_s25 = scalar_lea.vmem %s669_s2, %s438_s22  ;;  %s170_s20 = scalar_lea.vmem %s670_s3, %s439_s17 }
   0xe   : > { %259 = vperm.xlu1 %514, %v245_v3   ;;  %249 = vperm.xlu0 %513, %v243_v4   ;;  %v210_v5 = vld [vmem:[%s570_s25 + $0xf8] sm:$0xff]  ;;  %v209_v6 = vld [vmem:[%s570_s25 + $0xf0] sm:$0xff]  ;;  %v208_v7 = vld [vmem:[%s570_s25 + $0xe8] sm:$0xff] }
   0xf   : > { %267 = vmatprep.subr.mxu0 %v210_v5  ;;  %440 = vmatprep.subr.mxu1 %v210_v5  ;;  %v207_v8 = vld [vmem:[%s570_s25 + $0xe0] sm:$0xff]  ;;  %v206_v9 = vld [vmem:[%s570_s25 + $0xd8] sm:$0xff]  ;;  %v205_v10 = vld [vmem:[%s570_s25 + $0xd0] sm:$0xff] }
  0x10   : > { %268 = vmatpush1.msra.mxu0 %v209_v6  ;;  %472 = vmatpush1.msra.mxu1 %v209_v6  ;;  %v204_v11 = vld [vmem:[%s570_s25 + $0xc8] sm:$0xff]  ;;  %v203_v12 = vld [vmem:[%s570_s25 + $0xc0] sm:$0xff]  ;;  %v202_v13 = vld [vmem:[%s570_s25 + $0xb8] sm:$0xff] }
  0x11   : > { %269 = vmatprep.subr.mxu0 %v208_v7  ;;  %441 = vmatprep.subr.mxu1 %v208_v7  ;;  %v201_v14 = vld [vmem:[%s570_s25 + $0xb0] sm:$0xff]  ;;  %v200_v15 = vld [vmem:[%s570_s25 + $0xa8] sm:$0xff]  ;;  %v199_v16 = vld [vmem:[%s570_s25 + $0xa0] sm:$0xff] }
  0x12   : > { %270 = vmatpush1.msra.mxu0 %v207_v8  ;;  %473 = vmatpush1.msra.mxu1 %v207_v8  ;;  %v198_v17 = vld [vmem:[%s570_s25 + $0x98] sm:$0xff]  ;;  %v197_v18 = vld [vmem:[%s570_s25 + $0x90] sm:$0xff]  ;;  %v196_v19 = vld [vmem:[%s570_s25 + $0x88] sm:$0xff] }
  0x13   : > { %271 = vmatprep.subr.mxu0 %v206_v9  ;;  %442 = vmatprep.subr.mxu1 %v206_v9  ;;  %v195_v20 = vld [vmem:[%s570_s25 + $0x80] sm:$0xff]  ;;  %v194_v21 = vld [vmem:[%s570_s25 + $0x78] sm:$0xff]  ;;  %v193_v22 = vld [vmem:[%s570_s25 + $0x70] sm:$0xff] }
  0x14   : > { %272 = vmatpush1.msra.mxu0 %v205_v10  ;;  %474 = vmatpush1.msra.mxu1 %v205_v10  ;;  %v192_v23 = vld [vmem:[%s570_s25 + $0x68] sm:$0xff]  ;;  %v191_v24 = vld [vmem:[%s570_s25 + $0x60] sm:$0xff]  ;;  %v190_v25 = vld [vmem:[%s570_s25 + $0x58] sm:$0xff] }
  0x15   : > { %273 = vmatprep.subr.mxu0 %v204_v11  ;;  %443 = vmatprep.subr.mxu1 %v204_v11  ;;  %v189_v26 = vld [vmem:[%s570_s25 + $0x50] sm:$0xff]  ;;  %v188_v27 = vld [vmem:[%s570_s25 + $0x48] sm:$0xff]  ;;  %v187_v28 = vld [vmem:[%s570_s25 + $0x40] sm:$0xff] }
  0x16   : > { %274 = vmatpush1.msra.mxu0 %v203_v12  ;;  %475 = vmatpush1.msra.mxu1 %v203_v12  ;;  %v186_v29 = vld [vmem:[%s570_s25 + $0x38] sm:$0xff]  ;;  %v185_v30 = vld [vmem:[%s570_s25 + $0x30] sm:$0xff]  ;;  %v184_v31 = vld [vmem:[%s570_s25 + $0x28] sm:$0xff] }
  0x17   : > { %275 = vmatprep.subr.mxu0 %v202_v13  ;;  %444 = vmatprep.subr.mxu1 %v202_v13  ;;  %v183_v32 = vld [vmem:[%s570_s25 + $0x20] sm:$0xff]  ;;  %v182_v33 = vld [vmem:[%s570_s25 + $0x18] sm:$0xff]  ;;  %v181_v34 = vld [vmem:[%s570_s25 + $0x10] sm:$0xff] }
  0x18   : > { %276 = vmatpush1.msra.mxu0 %v201_v14  ;;  %476 = vmatpush1.msra.mxu1 %v201_v14  ;;  %v180_v35 = vld [vmem:[%s570_s25 + $0x8] sm:$0xff]  ;;  %v179_v36 = vld [vmem:[%s570_s25] sm:$0xff]  ;;  %v242_v37 = vld [vmem:[%s570_s25 + $0x1f8] sm:$0xff] }
  0x19   : > { %277 = vmatprep.subr.mxu0 %v200_v15  ;;  %445 = vmatprep.subr.mxu1 %v200_v15  ;;  %v241_v38 = vld [vmem:[%s570_s25 + $0x1f0] sm:$0xff]  ;;  %v240_v39 = vld [vmem:[%s570_s25 + $0x1e8] sm:$0xff]  ;;  %v239_v40 = vld [vmem:[%s570_s25 + $0x1e0] sm:$0xff] }
  0x1a   : > { %278 = vmatpush1.msra.mxu0 %v199_v16  ;;  %477 = vmatpush1.msra.mxu1 %v199_v16  ;;  %v238_v41 = vld [vmem:[%s570_s25 + $0x1d8] sm:$0xff]  ;;  %v237_v42 = vld [vmem:[%s570_s25 + $0x1d0] sm:$0xff]  ;;  %v236_v43 = vld [vmem:[%s570_s25 + $0x1c8] sm:$0xff] }
  0x1b   : > { %279 = vmatprep.subr.mxu0 %v198_v17  ;;  %446 = vmatprep.subr.mxu1 %v198_v17  ;;  %v235_v44 = vld [vmem:[%s570_s25 + $0x1c0] sm:$0xff]  ;;  %v234_v45 = vld [vmem:[%s570_s25 + $0x1b8] sm:$0xff]  ;;  %v233_v46 = vld [vmem:[%s570_s25 + $0x1b0] sm:$0xff] }
  0x1c   : > { %280 = vmatpush1.msra.mxu0 %v197_v18  ;;  %478 = vmatpush1.msra.mxu1 %v197_v18  ;;  %v232_v47 = vld [vmem:[%s570_s25 + $0x1a8] sm:$0xff]  ;;  %v231_v48 = vld [vmem:[%s570_s25 + $0x1a0] sm:$0xff]  ;;  %v230_v49 = vld [vmem:[%s570_s25 + $0x198] sm:$0xff] }
  0x1d   : > { %281 = vmatprep.subr.mxu0 %v196_v19  ;;  %447 = vmatprep.subr.mxu1 %v196_v19  ;;  %v229_v50 = vld [vmem:[%s570_s25 + $0x190] sm:$0xff]  ;;  %v228_v51 = vld [vmem:[%s570_s25 + $0x188] sm:$0xff]  ;;  %v227_v52 = vld [vmem:[%s570_s25 + $0x180] sm:$0xff] }
  0x1e   : > { %282 = vmatpush1.msra.mxu0 %v195_v20  ;;  %479 = vmatpush1.msra.mxu1 %v195_v20  ;;  %v226_v53 = vld [vmem:[%s570_s25 + $0x178] sm:$0xff]  ;;  %v225_v54 = vld [vmem:[%s570_s25 + $0x170] sm:$0xff]  ;;  %v224_v55 = vld [vmem:[%s570_s25 + $0x168] sm:$0xff] }
  0x1f   : > { %283 = vmatprep.subr.mxu0 %v194_v21  ;;  %448 = vmatprep.subr.mxu1 %v194_v21  ;;  %v223_v56 = vld [vmem:[%s570_s25 + $0x160] sm:$0xff]  ;;  %v222_v57 = vld [vmem:[%s570_s25 + $0x158] sm:$0xff]  ;;  %v221_v58 = vld [vmem:[%s570_s25 + $0x150] sm:$0xff] }
  0x20   : > { %284 = vmatpush1.msra.mxu0 %v193_v22  ;;  %480 = vmatpush1.msra.mxu1 %v193_v22  ;;  %v220_v59 = vld [vmem:[%s570_s25 + $0x148] sm:$0xff]  ;;  %v219_v60 = vld [vmem:[%s570_s25 + $0x140] sm:$0xff]  ;;  %v218_v61 = vld [vmem:[%s570_s25 + $0x138] sm:$0xff] }
  0x21   : > { %285 = vmatprep.subr.mxu0 %v192_v23  ;;  %449 = vmatprep.subr.mxu1 %v192_v23  ;;  %v217_v62 = vld [vmem:[%s570_s25 + $0x130] sm:$0xff]  ;;  %v216_v63 = vld [vmem:[%s570_s25 + $0x128] sm:$0xff]  ;;  %v215_v0 = vld [vmem:[%s570_s25 + $0x120] sm:$0xff] }
  0x22   : > { %286 = vmatpush1.msra.mxu0 %v191_v24  ;;  %481 = vmatpush1.msra.mxu1 %v191_v24  ;;  %v214_v1 = vld [vmem:[%s570_s25 + $0x118] sm:$0xff]  ;;  %v213_v2 = vld [vmem:[%s570_s25 + $0x110] sm:$0xff]  ;;  %v212_v3 = vld [vmem:[%s570_s25 + $0x108] sm:$0xff] }
  0x23   : > { %287 = vmatprep.subr.mxu0 %v190_v25  ;;  %450 = vmatprep.subr.mxu1 %v190_v25  ;;  %v211_v4 = vld [vmem:[%s570_s25 + $0x100] sm:$0xff]  ;;  %v174_v7 = vld [vmem:[%s667_s0 + $0x18] sm:$0xff]  ;;  %v244_v10 = vld [vmem:[%s668_s1 + $0x8] sm:$0xff] }
  0x24   : > { %288 = vmatpush1.msra.mxu0 %v189_v26  ;;  %482 = vmatpush1.msra.mxu1 %v189_v26  ;;  %v171_v5 = vld [vmem:[%s667_s0] sm:$0xff]  ;;  %v178_v8 = vld [vmem:[%s667_s0 + $0x38] sm:$0xff]  ;;  %v173_v11 = vld [vmem:[%s667_s0 + $0x10] sm:$0xff] }
  0x25   : > { %289 = vmatprep.subr.mxu0 %v188_v27  ;;  %451 = vmatprep.subr.mxu1 %v188_v27  ;;  %v175_v6 = vld [vmem:[%s667_s0 + $0x20] sm:$0xff]  ;;  %v246_v9 = vld [vmem:[%s668_s1 + $0x18] sm:$0xff]  ;;  %v177_v12 = vld [vmem:[%s667_s0 + $0x30] sm:$0xff] }
  0x26   : > { %290 = vmatpush1.msra.mxu0 %v187_v28  ;;  %483 = vmatpush1.msra.mxu1 %v187_v28 }
  0x27   : > { %291 = vmatprep.subr.mxu0 %v186_v29  ;;  %452 = vmatprep.subr.mxu1 %v186_v29 }
  0x28   : > { %292 = vmatpush1.msra.mxu0 %v185_v30  ;;  %484 = vmatpush1.msra.mxu1 %v185_v30 }
  0x29   : > { %293 = vmatprep.subr.mxu0 %v184_v31  ;;  %453 = vmatprep.subr.mxu1 %v184_v31 }
  0x2a   : > { %294 = vmatpush1.msra.mxu0 %v183_v32  ;;  %485 = vmatpush1.msra.mxu1 %v183_v32 }
  0x2b   : > { %295 = vmatprep.subr.mxu0 %v182_v33  ;;  %454 = vmatprep.subr.mxu1 %v182_v33 }
  0x2c   : > { %296 = vmatpush1.msra.mxu0 %v181_v34  ;;  %486 = vmatpush1.msra.mxu1 %v181_v34 }
  0x2d   : > { %297 = vmatprep.subr.mxu0 %v180_v35  ;;  %455 = vmatprep.subr.mxu1 %v180_v35 }
  0x2e   : > { %298 = vmatpush1.msra.mxu0 %v179_v36  ;;  %487 = vmatpush1.msra.mxu1 %v179_v36 }
  0x2f   : > { %299 = vmatprep.subr.mxu0 %v242_v37  ;;  %456 = vmatprep.subr.mxu1 %v242_v37 }
  0x30   : > { %300 = vmatpush2.msra.mxu0 %v241_v38  ;;  %488 = vmatpush2.msra.mxu1 %v241_v38 }
  0x31   : > { %301 = vmatprep.subr.mxu0 %v240_v39  ;;  %457 = vmatprep.subr.mxu1 %v240_v39 }
  0x32   : > { %302 = vmatpush2.msra.mxu0 %v239_v40  ;;  %489 = vmatpush2.msra.mxu1 %v239_v40 }
  0x33   : > { %303 = vmatprep.subr.mxu0 %v238_v41  ;;  %458 = vmatprep.subr.mxu1 %v238_v41 }
  0x34   : > { %304 = vmatpush2.msra.mxu0 %v237_v42  ;;  %490 = vmatpush2.msra.mxu1 %v237_v42 }
  0x35   : > { %305 = vmatprep.subr.mxu0 %v236_v43  ;;  %459 = vmatprep.subr.mxu1 %v236_v43 }
  0x36   : > { %306 = vmatpush2.msra.mxu0 %v235_v44  ;;  %491 = vmatpush2.msra.mxu1 %v235_v44 }
  0x37   : > { %307 = vmatprep.subr.mxu0 %v234_v45  ;;  %460 = vmatprep.subr.mxu1 %v234_v45 }
  0x38   : > { %308 = vmatpush2.msra.mxu0 %v233_v46  ;;  %492 = vmatpush2.msra.mxu1 %v233_v46 }
  0x39   : > { %309 = vmatprep.subr.mxu0 %v232_v47  ;;  %461 = vmatprep.subr.mxu1 %v232_v47 }
  0x3a   : > { %310 = vmatpush2.msra.mxu0 %v231_v48  ;;  %493 = vmatpush2.msra.mxu1 %v231_v48 }
  0x3b   : > { %311 = vmatprep.subr.mxu0 %v230_v49  ;;  %462 = vmatprep.subr.mxu1 %v230_v49 }
  0x3c   : > { %312 = vmatpush2.msra.mxu0 %v229_v50  ;;  %494 = vmatpush2.msra.mxu1 %v229_v50 }
  0x3d   : > { %313 = vmatprep.subr.mxu0 %v228_v51  ;;  %463 = vmatprep.subr.mxu1 %v228_v51 }
  0x3e   : > { %314 = vmatpush2.msra.mxu0 %v227_v52  ;;  %495 = vmatpush2.msra.mxu1 %v227_v52 }
  0x3f   : > { %315 = vmatprep.subr.mxu0 %v226_v53  ;;  %464 = vmatprep.subr.mxu1 %v226_v53 }
  0x40   : > { %316 = vmatpush2.msra.mxu0 %v225_v54  ;;  %496 = vmatpush2.msra.mxu1 %v225_v54 }
  0x41   : > { %317 = vmatprep.subr.mxu0 %v224_v55  ;;  %465 = vmatprep.subr.mxu1 %v224_v55 }
  0x42   : > { %318 = vmatpush2.msra.mxu0 %v223_v56  ;;  %497 = vmatpush2.msra.mxu1 %v223_v56 }
  0x43   : > { %319 = vmatprep.subr.mxu0 %v222_v57  ;;  %466 = vmatprep.subr.mxu1 %v222_v57 }
  0x44   : > { %320 = vmatpush2.msra.mxu0 %v221_v58  ;;  %498 = vmatpush2.msra.mxu1 %v221_v58 }
  0x45   : > { %321 = vmatprep.subr.mxu0 %v220_v59  ;;  %467 = vmatprep.subr.mxu1 %v220_v59 }
  0x46   : > { %322 = vmatpush2.msra.mxu0 %v219_v60  ;;  %499 = vmatpush2.msra.mxu1 %v219_v60 }
  0x47   : > { %323 = vmatprep.subr.mxu0 %v218_v61  ;;  %468 = vmatprep.subr.mxu1 %v218_v61 }
  0x48   : > { %324 = vmatpush2.msra.mxu0 %v217_v62  ;;  %500 = vmatpush2.msra.mxu1 %v217_v62 }
  0x49   : > { %325 = vmatprep.subr.mxu0 %v216_v63  ;;  %469 = vmatprep.subr.mxu1 %v216_v63 }
  0x4a   : > { %326 = vmatpush2.msra.mxu0 %v215_v0  ;;  %501 = vmatpush2.msra.mxu1 %v215_v0 }
  0x4b   : > { %327 = vmatprep.subr.mxu0 %v214_v1  ;;  %470 = vmatprep.subr.mxu1 %v214_v1 }
  0x4c   : > { %328 = vmatpush2.msra.mxu0 %v213_v2  ;;  %502 = vmatpush2.msra.mxu1 %v213_v2 }
  0x4d   : > { %329 = vmatprep.subr.mxu0 %v212_v3  ;;  %471 = vmatprep.subr.mxu1 %v212_v3 }
  0x4e   : > { %330 = vmatpush2.msra.mxu0 %v211_v4  ;;  %503 = vmatpush2.msra.mxu1 %v211_v4 }
  0x4f   : > { %332 = vmatmul.mubr.f32.vlgmr.msra.gmra.mxu0 %v171_v5  ;;  %344 = vmatmul.mubr.f32.vlgmr.msra.gmra.mxu1 %v175_v6 }
  0x50   : > { %337 = vmatprep.mubr.f32.mxu0 %v174_v7  ;;  %349 = vmatprep.mubr.f32.mxu1 %v178_v8 }
  0x51   : > { %264 = vperm.xlu1 %514, %v246_v9   ;;  %254 = vperm.xlu0 %513, %v244_v10  }
  0x53   : > { %338 = vmatmul.mubr.f32.gmra.mxu0 %v173_v11  ;;  %350 = vmatmul.mubr.f32.gmra.mxu1 %v177_v12 }
  0x89   : > { %v260_v13 = vpop.permute.xlu1 %259  ;;  %v250_v14 = vpop.permute.xlu0 %249 }
  0xcc   : > { %v265_v23 = vpop.permute.xlu1 %264  ;;  %v255_v24 = vpop.permute.xlu0 %254 }
 0x10f   : > { %v333_v15 = vpop.f32.mrf.mxu0  ;;  %v345_v16 = vpop.f32.mrf.mxu1 }
 0x110   : > { %v334_v17 = vadd.f32 %v333_v15, %v250_v14  ;;  %v346_v18 = vadd.f32 %v345_v16, %v260_v13 }
 0x111   : > { %v335_v19 = vpop.f32.mrf.mxu0  ;;  %v347_v20 = vpop.f32.mrf.mxu1 }
 0x112   : > { %v356_v21 = vmax.f32 %v334_v17, 0.0  ;;  %v360_v22 = vmax.f32 %v346_v18, 0.0  ;;  %v336_v25 = vadd.f32 %v335_v19, %v250_v14  ;;  %v348_v26 = vadd.f32 %v347_v20, %v260_v13 }
 0x113   : > { %v339_v27 = vpop.f32.mrf.mxu0  ;;  %v351_v28 = vpop.f32.mrf.mxu1 }
 0x114   : > { %364 = vst [vmem:[%s170_s20] sm:$0xff] %v356_v21  ;;  %368 = vst [vmem:[%s170_s20 + $0x20] sm:$0xff] %v360_v22  ;;  %v357_v29 = vmax.f32 %v336_v25, 0.0  ;;  %v361_v30 = vmax.f32 %v348_v26, 0.0  ;;  %v340_v31 = vadd.f32 %v339_v27, %v255_v24  ;;  %v352_v32 = vadd.f32 %v351_v28, %v265_v23 }
 0x115   : > { %v341_v33 = vpop.f32.mrf.mxu0  ;;  %v353_v34 = vpop.f32.mrf.mxu1 }
 0x116   : > { %365 = vst [vmem:[%s170_s20 + $0x8] sm:$0xff] %v357_v29  ;;  %369 = vst [vmem:[%s170_s20 + $0x28] sm:$0xff] %v361_v30  ;;  %v358_v35 = vmax.f32 %v340_v31, 0.0  ;;  %v362_v36 = vmax.f32 %v352_v32, 0.0  ;;  %v342_v37 = vadd.f32 %v341_v33, %v255_v24  ;;  %v354_v38 = vadd.f32 %v353_v34, %v265_v23 }
 0x118   : > { %366 = vst [vmem:[%s170_s20 + $0x10] sm:$0xff] %v358_v35  ;;  %370 = vst [vmem:[%s170_s20 + $0x30] sm:$0xff] %v362_v36  ;;  %v359_v39 = vmax.f32 %v342_v37, 0.0  ;;  %v363_v40 = vmax.f32 %v354_v38, 0.0 }
 0x11a   : > { %367 = vst [vmem:[%s170_s20 + $0x18] sm:$0xff] %v359_v39  ;;  %371 = vst [vmem:[%s170_s20 + $0x38] sm:$0xff] %v363_v40 }
 0x11b PF: > { %s13_s12 = sadd.s32 1, %s521_s12  }
 0x11c   : > { %p10_p4 = scmp.ge.s32.totalorder %s13_s12, 4  }
 0x11e   :  { %12 = sbr.rel (!%p10_p4) target bundleno = 1 (0x1), region = 62 }

// kernel: dqn_forward.5
= control target key start
LH: loop header
LB: loop body
LE: loop exit
PB: predicated region body
PF: predicated region fallthrough
CT: control target
= control target key end

     0   :  { %10 = vsyncpa [#allocation4], 0  ;;  %s2033_s18 = smov 0   ;;  %s2452_s0 = inlined_call_operand.vmem [shape: f32[2,8192], index: 0, kind: input, shape index: {}]   ;;  %s2453_s1 = inlined_call_operand.vmem [shape: bf16[8192,256], index: 1, kind: input, shape index: {}]   ;;  %s2454_s2 = inlined_call_operand.vmem [shape: f32[1,256], index: 2, kind: input, shape index: {}]   ;;  %s2455_s3 = inlined_call_operand.vmem [shape: f32[256,9], index: 3, kind: input, shape index: {}]   ;;  %s2456_s4 = inlined_call_operand.vmem [shape: f32[1,9], index: 4, kind: input, shape index: {}]   ;;  %s2457_s5 = inlined_call_operand.hbm [shape: f32[2,9], index: 5, kind: output, shape index: {}]  }
   0x1 LB: > { %s2039_s19 = sadd.s32 4294967295, %s1998_s18   ;;  %p1894_p0 = scmp.ge.s32.totalorder %s1998_s18, 1  ;;  %s1998_s18 = sphi %s2033_s18, %s16_s18  }
   0x2   : > { %p196_p1 = scmp.lt.s32.totalorder %s1998_s18, 5 }
   0x4   : > { %p197_p2 = pnand %p1894_p0, %p196_p1 }
   0x5   : > { %s1895_s20 = sshll.u32 (!%p197_p2), %s2039_s19, 4  ;;  %s1897_s21 = sshll.u32 (!%p197_p2), %s2039_s19, 8 }
   0x6   : > { %200 = sbr.rel (%p197_p2) target bundleno = 741 (0x2e5), region = 40  ;;  %p226_p3 = scmp.lt.s32.totalorder (!%p197_p2), %s1895_s20, 63 }
   0x7   : > { %p232_p4 = scmp.lt.s32.totalorder (!%p197_p2), %s1897_s21, 1023  ;;  %p1900_p5 = scmp.ne.s32.totalorder (!%p197_p2), %s2039_s19, 0 }
   0xb   : > { %s2459_s20 = smov (!%p226_p3, %s1895_s20), 63  ;;  %s2461_s21 = smov (!%p232_p4, %s1897_s21), 1023 }
   0xc   : > { %s1896_s22 = sshll.u32 %s2459_s20, 1  ;;  %s1907_s26 = sshll.u32 %s2461_s21, 3 }
   0xd   : > { %s2048_s25 = scalar_lea.vmem %s2452_s0, %s1896_s22  ;;  %s2053_s29 = scalar_lea.vmem %s2453_s1, %s1907_s26 }
   0xe   : > { %241 = sbr.rel (%p1900_p5) target bundleno = 21 (0x15), region = 44 }
  0x13   : > { %v2000_v0 = vmov 0.0  }
  0x14   : > { %242 = vst [vmem:[#allocation2] sm:$0xf] %v2000_v0 }
  0x15 PF: > { %v263_v1 = vld [vmem:[%s2053_s29 + $0x78] sm:$0xff]  ;;  %v262_v3 = vld [vmem:[%s2053_s29 + $0x70] sm:$0xff]  ;;  %v261_v9 = vld [vmem:[%s2053_s29 + $0x68] sm:$0xff]  ;;  %p1901_p6 = scmp.ne.s32.totalorder %s2039_s19, 3 }
  0x16   : > { %v295_v2 = vld [vmem:[%s2053_s29 + $0x178] sm:$0xff]  ;;  %v535_v4 = vunpack.c.h.bf16 %v263_v1  ;;  %v534_v6 = vunpack.c.l.bf16 %v263_v1  ;;  %v294_v8 = vld [vmem:[%s2053_s29 + $0x170] sm:$0xff]  ;;  %v293_v10 = vld [vmem:[%s2053_s29 + $0x168] sm:$0xff]  ;;  %v533_v11 = vunpack.c.h.bf16 %v262_v3  ;;  %v532_v13 = vunpack.c.l.bf16 %v262_v3 }
  0x17   : > { %v599_v5 = vunpack.c.h.bf16 %v295_v2  ;;  %v598_v7 = vunpack.c.l.bf16 %v295_v2  ;;  %v597_v12 = vunpack.c.h.bf16 %v294_v8  ;;  %v596_v14 = vunpack.c.l.bf16 %v294_v8  ;;  %v260_v15 = vld [vmem:[%s2053_s29 + $0x60] sm:$0xff]  ;;  %v259_v21 = vld [vmem:[%s2053_s29 + $0x58] sm:$0xff]  ;;  %v258_v27 = vld [vmem:[%s2053_s29 + $0x50] sm:$0xff] }
  0x18   : > { %v292_v16 = vld [vmem:[%s2053_s29 + $0x160] sm:$0xff]  ;;  %1104 = vmatprep.subr.mxu0 %v535_v4  ;;  %v531_v17 = vunpack.c.h.bf16 %v261_v9  ;;  %v595_v18 = vunpack.c.h.bf16 %v293_v10  ;;  %v530_v19 = vunpack.c.l.bf16 %v261_v9  ;;  %v594_v20 = vunpack.c.l.bf16 %v293_v10  ;;  %v291_v22 = vld [vmem:[%s2053_s29 + $0x158] sm:$0xff]  ;;  %v290_v28 = vld [vmem:[%s2053_s29 + $0x150] sm:$0xff] }
  0x19   : > { %1175 = vmatprep.subr.mxu1 %v599_v5  ;;  %1105 = vmatpush1.msra.mxu0 %v534_v6  ;;  %v529_v23 = vunpack.c.h.bf16 %v260_v15  ;;  %v593_v24 = vunpack.c.h.bf16 %v292_v16  ;;  %v528_v25 = vunpack.c.l.bf16 %v260_v15  ;;  %v592_v26 = vunpack.c.l.bf16 %v292_v16  ;;  %v257_v33 = vld [vmem:[%s2053_s29 + $0x48] sm:$0xff]  ;;  %v256_v39 = vld [vmem:[%s2053_s29 + $0x40] sm:$0xff]  ;;  %v255_v45 = vld [vmem:[%s2053_s29 + $0x38] sm:$0xff] }
  0x1a   : > { %1176 = vmatpush1.msra.mxu1 %v598_v7  ;;  %1106 = vmatprep.subr.mxu0 %v533_v11  ;;  %v527_v29 = vunpack.c.h.bf16 %v259_v21  ;;  %v591_v30 = vunpack.c.h.bf16 %v291_v22  ;;  %v526_v31 = vunpack.c.l.bf16 %v259_v21  ;;  %v590_v32 = vunpack.c.l.bf16 %v291_v22  ;;  %v289_v34 = vld [vmem:[%s2053_s29 + $0x148] sm:$0xff]  ;;  %v288_v40 = vld [vmem:[%s2053_s29 + $0x140] sm:$0xff]  ;;  %v287_v46 = vld [vmem:[%s2053_s29 + $0x138] sm:$0xff] }
  0x1b   : > { %1177 = vmatprep.subr.mxu1 %v597_v12  ;;  %1107 = vmatpush1.msra.mxu0 %v532_v13  ;;  %v525_v35 = vunpack.c.h.bf16 %v258_v27  ;;  %v589_v36 = vunpack.c.h.bf16 %v290_v28  ;;  %v524_v37 = vunpack.c.l.bf16 %v258_v27  ;;  %v588_v38 = vunpack.c.l.bf16 %v290_v28  ;;  %v254_v51 = vld [vmem:[%s2053_s29 + $0x30] sm:$0xff]  ;;  %v253_v57 = vld [vmem:[%s2053_s29 + $0x28] sm:$0xff]  ;;  %v252_v63 = vld [vmem:[%s2053_s29 + $0x20] sm:$0xff] }
  0x1c   : > { %1178 = vmatpush1.msra.mxu1 %v596_v14  ;;  %1108 = vmatprep.subr.mxu0 %v531_v17  ;;  %v523_v41 = vunpack.c.h.bf16 %v257_v33  ;;  %v587_v42 = vunpack.c.h.bf16 %v289_v34  ;;  %v522_v43 = vunpack.c.l.bf16 %v257_v33  ;;  %v586_v44 = vunpack.c.l.bf16 %v289_v34  ;;  %v286_v52 = vld [vmem:[%s2053_s29 + $0x130] sm:$0xff]  ;;  %v285_v58 = vld [vmem:[%s2053_s29 + $0x128] sm:$0xff]  ;;  %v284_v0 = vld [vmem:[%s2053_s29 + $0x120] sm:$0xff] }
  0x1d   : > { %1179 = vmatprep.subr.mxu1 %v595_v18  ;;  %1109 = vmatpush1.msra.mxu0 %v530_v19  ;;  %v521_v47 = vunpack.c.h.bf16 %v256_v39  ;;  %v585_v48 = vunpack.c.h.bf16 %v288_v40  ;;  %v520_v49 = vunpack.c.l.bf16 %v256_v39  ;;  %v584_v50 = vunpack.c.l.bf16 %v288_v40  ;;  %v251_v5 = vld [vmem:[%s2053_s29 + $0x18] sm:$0xff]  ;;  %v250_v11 = vld [vmem:[%s2053_s29 + $0x10] sm:$0xff]  ;;  %v249_v17 = vld [vmem:[%s2053_s29 + $0x8] sm:$0xff] }
  0x1e   : > { %1180 = vmatpush1.msra.mxu1 %v594_v20  ;;  %1110 = vmatprep.subr.mxu0 %v529_v23  ;;  %v519_v53 = vunpack.c.h.bf16 %v255_v45  ;;  %v583_v54 = vunpack.c.h.bf16 %v287_v46  ;;  %v518_v55 = vunpack.c.l.bf16 %v255_v45  ;;  %v582_v56 = vunpack.c.l.bf16 %v287_v46  ;;  %v283_v6 = vld [vmem:[%s2053_s29 + $0x118] sm:$0xff]  ;;  %v282_v12 = vld [vmem:[%s2053_s29 + $0x110] sm:$0xff]  ;;  %v281_v18 = vld [vmem:[%s2053_s29 + $0x108] sm:$0xff] }
  0x1f   : > { %1181 = vmatprep.subr.mxu1 %v593_v24  ;;  %1111 = vmatpush1.msra.mxu0 %v528_v25  ;;  %v517_v59 = vunpack.c.h.bf16 %v254_v51  ;;  %v581_v60 = vunpack.c.h.bf16 %v286_v52  ;;  %v516_v61 = vunpack.c.l.bf16 %v254_v51  ;;  %v580_v62 = vunpack.c.l.bf16 %v286_v52  ;;  %v248_v23 = vld [vmem:[%s2053_s29] sm:$0xff] }
  0x20   : > { %1182 = vmatpush1.msra.mxu1 %v592_v26  ;;  %1112 = vmatprep.subr.mxu0 %v527_v29  ;;  %v515_v1 = vunpack.c.h.bf16 %v253_v57  ;;  %v579_v2 = vunpack.c.h.bf16 %v285_v58  ;;  %v514_v3 = vunpack.c.l.bf16 %v253_v57  ;;  %v578_v4 = vunpack.c.l.bf16 %v285_v58  ;;  %v280_v24 = vld [vmem:[%s2053_s29 + $0x100] sm:$0xff]  ;;  %v279_v29 = vld [vmem:[%s2053_s29 + $0xf8] sm:$0xff] }
  0x21   : > { %1183 = vmatprep.subr.mxu1 %v591_v30  ;;  %1113 = vmatpush1.msra.mxu0 %v526_v31  ;;  %v513_v7 = vunpack.c.h.bf16 %v252_v63  ;;  %v577_v8 = vunpack.c.h.bf16 %v284_v0  ;;  %v512_v9 = vunpack.c.l.bf16 %v252_v63  ;;  %v576_v10 = vunpack.c.l.bf16 %v284_v0  ;;  %v311_v30 = vld [vmem:[%s2053_s29 + $0x1f8] sm:$0xff] }
  0x22   : > { %1184 = vmatpush1.msra.mxu1 %v590_v32  ;;  %1114 = vmatprep.subr.mxu0 %v525_v35  ;;  %v511_v13 = vunpack.c.h.bf16 %v251_v5  ;;  %v575_v14 = vunpack.c.h.bf16 %v283_v6  ;;  %v510_v15 = vunpack.c.l.bf16 %v251_v5  ;;  %v574_v16 = vunpack.c.l.bf16 %v283_v6  ;;  %v278_v35 = vld [vmem:[%s2053_s29 + $0xf0] sm:$0xff] }
  0x23   : > { %1185 = vmatprep.subr.mxu1 %v589_v36  ;;  %1115 = vmatpush1.msra.mxu0 %v524_v37  ;;  %v509_v19 = vunpack.c.h.bf16 %v250_v11  ;;  %v573_v20 = vunpack.c.h.bf16 %v282_v12  ;;  %v508_v21 = vunpack.c.l.bf16 %v250_v11  ;;  %v572_v22 = vunpack.c.l.bf16 %v282_v12  ;;  %v310_v36 = vld [vmem:[%s2053_s29 + $0x1f0] sm:$0xff] }
  0x24   : > { %1186 = vmatpush1.msra.mxu1 %v588_v38  ;;  %1116 = vmatprep.subr.mxu0 %v523_v41  ;;  %v507_v25 = vunpack.c.h.bf16 %v249_v17  ;;  %v571_v26 = vunpack.c.h.bf16 %v281_v18  ;;  %v506_v27 = vunpack.c.l.bf16 %v249_v17  ;;  %v570_v28 = vunpack.c.l.bf16 %v281_v18  ;;  %v277_v41 = vld [vmem:[%s2053_s29 + $0xe8] sm:$0xff] }
  0x25   : > { %1187 = vmatprep.subr.mxu1 %v587_v42  ;;  %1117 = vmatpush1.msra.mxu0 %v522_v43  ;;  %v505_v31 = vunpack.c.h.bf16 %v248_v23  ;;  %v569_v32 = vunpack.c.h.bf16 %v280_v24  ;;  %v504_v33 = vunpack.c.l.bf16 %v248_v23  ;;  %v568_v34 = vunpack.c.l.bf16 %v280_v24  ;;  %v309_v42 = vld [vmem:[%s2053_s29 + $0x1e8] sm:$0xff] }
  0x26   : > { %1188 = vmatpush1.msra.mxu1 %v586_v44  ;;  %1118 = vmatprep.subr.mxu0 %v521_v47  ;;  %v567_v37 = vunpack.c.h.bf16 %v279_v29  ;;  %v631_v38 = vunpack.c.h.bf16 %v311_v30  ;;  %v566_v39 = vunpack.c.l.bf16 %v279_v29  ;;  %v630_v40 = vunpack.c.l.bf16 %v311_v30  ;;  %v276_v47 = vld [vmem:[%s2053_s29 + $0xe0] sm:$0xff]  ;;  %v301_v29 = vld [vmem:[%s2053_s29 + $0x1a8] sm:$0xff] }
  0x27   : > { %1189 = vmatprep.subr.mxu1 %v585_v48  ;;  %1119 = vmatpush1.msra.mxu0 %v520_v49  ;;  %v565_v43 = vunpack.c.h.bf16 %v278_v35  ;;  %v629_v44 = vunpack.c.h.bf16 %v310_v36  ;;  %v564_v45 = vunpack.c.l.bf16 %v278_v35  ;;  %v628_v46 = vunpack.c.l.bf16 %v310_v36  ;;  %v308_v48 = vld [vmem:[%s2053_s29 + $0x1e0] sm:$0xff] }
  0x28   : > { %1190 = vmatpush1.msra.mxu1 %v584_v50  ;;  %1120 = vmatprep.subr.mxu0 %v519_v53  ;;  %v563_v49 = vunpack.c.h.bf16 %v277_v41  ;;  %v627_v50 = vunpack.c.h.bf16 %v309_v42  ;;  %v562_v51 = vunpack.c.l.bf16 %v277_v41  ;;  %v626_v52 = vunpack.c.l.bf16 %v309_v42  ;;  %v275_v53 = vld [vmem:[%s2053_s29 + $0xd8] sm:$0xff]  ;;  %v300_v35 = vld [vmem:[%s2053_s29 + $0x1a0] sm:$0xff] }
  0x29   : > { %1191 = vmatprep.subr.mxu1 %v583_v54  ;;  %1121 = vmatpush1.msra.mxu0 %v518_v55  ;;  %v307_v54 = vld [vmem:[%s2053_s29 + $0x1d8] sm:$0xff]  ;;  %v561_v55 = vunpack.c.h.bf16 %v276_v47  ;;  %v560_v57 = vunpack.c.l.bf16 %v276_v47  ;;  %v624_v58 = vunpack.c.l.bf16 %v308_v48  ;;  %v558_v63 = vunpack.c.l.bf16 %v275_v53 }
  0x2a   : > { %1192 = vmatpush1.msra.mxu1 %v582_v56  ;;  %1122 = vmatprep.subr.mxu0 %v517_v59  ;;  %v625_v56 = vunpack.c.h.bf16 %v308_v48  ;;  %v274_v59 = vld [vmem:[%s2053_s29 + $0xd0] sm:$0xff]  ;;  %v622_v0 = vunpack.c.l.bf16 %v307_v54  ;;  %v1024_v23 = vlaneseq  ;;  %v610_v41 = vunpack.c.l.bf16 %v301_v29  ;;  %v267_v42 = vld [vmem:[%s2053_s29 + $0x98] sm:$0xff] }
  0x2b   : > { %1193 = vmatprep.subr.mxu1 %v581_v60  ;;  %1123 = vmatpush1.msra.mxu0 %v516_v61  ;;  %v306_v60 = vld [vmem:[%s2053_s29 + $0x1d0] sm:$0xff]  ;;  %v559_v61 = vunpack.c.h.bf16 %v275_v53  ;;  %v556_v5 = vunpack.c.l.bf16 %v274_v59  ;;  %v608_v48 = vunpack.c.l.bf16 %v300_v35 }
  0x2c   : > { %1194 = vmatpush1.msra.mxu1 %v580_v62  ;;  %1124 = vmatprep.subr.mxu0 %v515_v1  ;;  %v623_v62 = vunpack.c.h.bf16 %v307_v54  ;;  %v273_v1 = vld [vmem:[%s2053_s29 + $0xc8] sm:$0xff]  ;;  %v620_v6 = vunpack.c.l.bf16 %v306_v60 }
  0x2d   : > { %1195 = vmatprep.subr.mxu1 %v579_v2  ;;  %1125 = vmatpush1.msra.mxu0 %v514_v3  ;;  %v305_v2 = vld [vmem:[%s2053_s29 + $0x1c8] sm:$0xff]  ;;  %v557_v3 = vunpack.c.h.bf16 %v274_v59  ;;  %v554_v11 = vunpack.c.l.bf16 %v273_v1 }
  0x2e   : > { %1196 = vmatpush1.msra.mxu1 %v578_v4  ;;  %1126 = vmatprep.subr.mxu0 %v513_v7  ;;  %v621_v4 = vunpack.c.h.bf16 %v306_v60  ;;  %v272_v7 = vld [vmem:[%s2053_s29 + $0xc0] sm:$0xff]  ;;  %v618_v12 = vunpack.c.l.bf16 %v305_v2 }
  0x2f   : > { %1197 = vmatprep.subr.mxu1 %v577_v8  ;;  %1127 = vmatpush1.msra.mxu0 %v512_v9  ;;  %v304_v8 = vld [vmem:[%s2053_s29 + $0x1c0] sm:$0xff]  ;;  %v555_v9 = vunpack.c.h.bf16 %v273_v1  ;;  %v552_v17 = vunpack.c.l.bf16 %v272_v7 }
  0x30   : > { %1198 = vmatpush1.msra.mxu1 %v576_v10  ;;  %1128 = vmatprep.subr.mxu0 %v511_v13  ;;  %v619_v10 = vunpack.c.h.bf16 %v305_v2  ;;  %v271_v13 = vld [vmem:[%s2053_s29 + $0xb8] sm:$0xff]  ;;  %v616_v18 = vunpack.c.l.bf16 %v304_v8 }
  0x31   : > { %1199 = vmatprep.subr.mxu1 %v575_v14  ;;  %1129 = vmatpush1.msra.mxu0 %v510_v15  ;;  %v303_v14 = vld [vmem:[%s2053_s29 + $0x1b8] sm:$0xff]  ;;  %v553_v15 = vunpack.c.h.bf16 %v272_v7  ;;  %v551_v24 = vunpack.c.h.bf16 %v271_v13 }
  0x32   : > { %1200 = vmatpush1.msra.mxu1 %v574_v16  ;;  %1130 = vmatprep.subr.mxu0 %v509_v19  ;;  %v617_v16 = vunpack.c.h.bf16 %v304_v8  ;;  %v270_v19 = vld [vmem:[%s2053_s29 + $0xb0] sm:$0xff] }
  0x33   : > { %1201 = vmatprep.subr.mxu1 %v573_v20  ;;  %1131 = vmatpush1.msra.mxu0 %v508_v21  ;;  %v302_v20 = vld [vmem:[%s2053_s29 + $0x1b0] sm:$0xff]  ;;  %v2001_v21 = vmov 1983009808   ;;  %v549_v30 = vunpack.c.h.bf16 %v270_v19 }
  0x34   : > { %1202 = vmatpush1.msra.mxu1 %v572_v22  ;;  %1132 = vmatprep.subr.mxu0 %v507_v25  ;;  %v1022_v22 = vunpack.c.l.s4 %v2001_v21  ;;  %v615_v25 = vunpack.c.h.bf16 %v303_v14  ;;  %v325_v21 = vld [vmem:[%s2053_s29 + $0x268] sm:$0xff] }
  0x35   : > { %1203 = vmatprep.subr.mxu1 %v571_v26  ;;  %1133 = vmatpush1.msra.mxu0 %v506_v27  ;;  %v550_v26 = vunpack.c.l.bf16 %v271_v13  ;;  %v614_v27 = vunpack.c.l.bf16 %v303_v14 }
  0x36   : > { %1204 = vmatpush1.msra.mxu1 %v570_v28  ;;  %1134 = vmatprep.subr.mxu0 %v505_v31  ;;  %v269_v28 = vld [vmem:[%s2053_s29 + $0xa8] sm:$0xff]  ;;  %v613_v31 = vunpack.c.h.bf16 %v302_v20  ;;  %v1023_v36 = vunpack.c.0.s8 %v1022_v22 }
  0x37   : > { %1205 = vmatprep.subr.mxu1 %v569_v32  ;;  %1135 = vmatpush1.msra.mxu0 %v504_v33  ;;  %v548_v32 = vunpack.c.l.bf16 %v270_v19  ;;  %v612_v33 = vunpack.c.l.bf16 %v302_v20  ;;  %v357_v22 = vld [vmem:[%s2053_s29 + $0x368] sm:$0xff] }
  0x38   : > { %1206 = vmatpush1.msra.mxu1 %v568_v34  ;;  %1136 = vmatprep.subr.mxu0 %v567_v37  ;;  %v268_v34 = vld [vmem:[%s2053_s29 + $0xa0] sm:$0xff]  ;;  %v2112_v37 = vshrl.u32 %v1024_v23, 7 }
  0x39   : > { %1207 = vmatprep.subr.mxu1 %v631_v38  ;;  %1137 = vmatpush2.msra.mxu0 %v566_v39  ;;  %v547_v38 = vunpack.c.h.bf16 %v269_v28  ;;  %v611_v39 = vunpack.c.h.bf16 %v301_v29  ;;  %v544_v47 = vunpack.c.l.bf16 %v268_v34  ;;  %v659_v29 = vunpack.c.h.bf16 %v325_v21 }
  0x3a   : > { %1208 = vmatpush2.msra.mxu1 %v630_v40  ;;  %1138 = vmatprep.subr.mxu0 %v565_v43  ;;  %v546_v40 = vunpack.c.l.bf16 %v269_v28  ;;  %v299_v43 = vld [vmem:[%s2053_s29 + $0x198] sm:$0xff]  ;;  %v356_v28 = vld [vmem:[%s2053_s29 + $0x360] sm:$0xff] }
  0x3b   : > { %1209 = vmatprep.subr.mxu1 %v629_v44  ;;  %1139 = vmatpush2.msra.mxu0 %v564_v45  ;;  %v244_v44 = vld [vmem:[%s2048_s25] sm:$0xff]  ;;  %v545_v45 = vunpack.c.h.bf16 %v268_v34  ;;  %v607_v53 = vunpack.c.h.bf16 %v299_v43  ;;  %v355_v34 = vld [vmem:[%s2053_s29 + $0x358] sm:$0xff] }
  0x3c   : > { %1210 = vmatpush2.msra.mxu1 %v628_v46  ;;  %1140 = vmatprep.subr.mxu0 %v563_v49  ;;  %v609_v46 = vunpack.c.h.bf16 %v300_v35  ;;  %v266_v49 = vld [vmem:[%s2053_s29 + $0x90] sm:$0xff]  ;;  %v1020_v54 = vcombine.high %v244_v44, %v244_v44 }
  0x3d   : > { %1211 = vmatprep.subr.mxu1 %v627_v50  ;;  %1141 = vmatpush2.msra.mxu0 %v562_v51  ;;  %v298_v50 = vld [vmem:[%s2053_s29 + $0x190] sm:$0xff]  ;;  %v2120_v51 = vsub.s32 %v1023_v36, %v2112_v37  ;;  %v541_v59 = vunpack.c.h.bf16 %v266_v49  ;;  %v721_v36 = vunpack.c.h.bf16 %v356_v28 }
  0x3e   : > { %1212 = vmatpush2.msra.mxu1 %v626_v52  ;;  %1142 = vmatprep.subr.mxu0 %v561_v55  ;;  %v543_v52 = vunpack.c.h.bf16 %v267_v42  ;;  %v542_v55 = vunpack.c.l.bf16 %v267_v42  ;;  %v605_v60 = vunpack.c.h.bf16 %v298_v50 }
  0x3f   : > { %1213 = vmatprep.subr.mxu1 %v625_v56  ;;  %1143 = vmatpush2.msra.mxu0 %v560_v57  ;;  %v606_v56 = vunpack.c.l.bf16 %v299_v43  ;;  %v265_v57 = vld [vmem:[%s2053_s29 + $0x88] sm:$0xff]  ;;  %v1027_v1 = vrot.slane %v244_v44, %v2120_v51  ;;  %v719_v43 = vunpack.c.h.bf16 %v355_v34 }
  0x40   : > { %1214 = vmatpush2.msra.mxu1 %v624_v58  ;;  %1144 = vmatprep.subr.mxu0 %v559_v61  ;;  %v297_v58 = vld [vmem:[%s2053_s29 + $0x188] sm:$0xff]  ;;  %v540_v61 = vunpack.c.l.bf16 %v266_v49  ;;  %v539_v2 = vunpack.c.h.bf16 %v265_v57 }
  0x41   : > { %1215 = vmatprep.subr.mxu1 %v623_v62  ;;  %1145 = vmatpush2.msra.mxu0 %v558_v63  ;;  %v604_v62 = vunpack.c.l.bf16 %v298_v50  ;;  %v264_v63 = vld [vmem:[%s2053_s29 + $0x80] sm:$0xff] }
  0x42   : > { %1216 = vmatpush2.msra.mxu1 %v622_v0  ;;  %1146 = vmatprep.subr.mxu0 %v557_v3  ;;  %v296_v0 = vld [vmem:[%s2053_s29 + $0x180] sm:$0xff]  ;;  %v603_v3 = vunpack.c.h.bf16 %v297_v58  ;;  %v537_v7 = vunpack.c.h.bf16 %v264_v63 }
  0x43   : > { %1217 = vmatprep.subr.mxu1 %v621_v4  ;;  %1147 = vmatpush2.msra.mxu0 %v556_v5  ;;  %v1034_v4 = vrot.slane %v1020_v54, %v2120_v51  ;;  %v538_v5 = vunpack.c.l.bf16 %v265_v57  ;;  %v601_v8 = vunpack.c.h.bf16 %v296_v0  ;;  %v600_v13 = vunpack.c.l.bf16 %v296_v0  ;;  %v352_v54 = vld [vmem:[%s2053_s29 + $0x340] sm:$0xff] }
  0x44   : > { %1218 = vmatpush2.msra.mxu1 %v620_v6  ;;  %1148 = vmatprep.subr.mxu0 %v555_v9  ;;  %v602_v6 = vunpack.c.l.bf16 %v297_v58  ;;  %v536_v9 = vunpack.c.l.bf16 %v264_v63  ;;  %v712_v0 = vunpack.c.l.bf16 %v352_v54 }
  0x45   : > { %1219 = vmatprep.subr.mxu1 %v619_v10  ;;  %1149 = vmatpush2.msra.mxu0 %v554_v11  ;;  %v1035_v10 = vcombine.high %v1027_v1, %v1027_v1  ;;  %v327_v11 = vld [vmem:[%s2053_s29 + $0x278] sm:$0xff]  ;;  %v1036_v14 = vcombine.high %v1034_v4, %v1034_v4 }
  0x46   : > { %1220 = vmatpush2.msra.mxu1 %v618_v12  ;;  %1150 = vmatprep.subr.mxu0 %v553_v15  ;;  %v359_v12 = vld [vmem:[%s2053_s29 + $0x378] sm:$0xff]  ;;  %v326_v15 = vld [vmem:[%s2053_s29 + $0x270] sm:$0xff]  ;;  %v662_v19 = vunpack.c.l.bf16 %v327_v11 }
  0x47   : > { %1221 = vmatprep.subr.mxu1 %v617_v16  ;;  %1151 = vmatpush2.msra.mxu0 %v552_v17  ;;  %v358_v16 = vld [vmem:[%s2053_s29 + $0x370] sm:$0xff]  ;;  %v663_v17 = vunpack.c.h.bf16 %v327_v11  ;;  %v726_v20 = vunpack.c.l.bf16 %v359_v12  ;;  %v661_v23 = vunpack.c.h.bf16 %v326_v15 }
  0x48   : > { %1222 = vmatpush2.msra.mxu1 %v616_v18  ;;  %1152 = vmatprep.subr.mxu0 %v551_v24  ;;  %v727_v18 = vunpack.c.h.bf16 %v359_v12  ;;  %v725_v24 = vunpack.c.h.bf16 %v358_v16 }
  0x49   : > { %1223 = vmatprep.subr.mxu1 %v615_v25  ;;  %1153 = vmatpush2.msra.mxu0 %v550_v26  ;;  %v660_v25 = vunpack.c.l.bf16 %v326_v15  ;;  %v724_v26 = vunpack.c.l.bf16 %v358_v16 }
  0x4a   : > { %1224 = vmatpush2.msra.mxu1 %v614_v27  ;;  %1154 = vmatprep.subr.mxu0 %v549_v30  ;;  %v324_v27 = vld [vmem:[%s2053_s29 + $0x260] sm:$0xff]  ;;  %v723_v30 = vunpack.c.h.bf16 %v357_v22 }
  0x4b   : > { %1225 = vmatprep.subr.mxu1 %v613_v31  ;;  %1155 = vmatpush2.msra.mxu0 %v548_v32  ;;  %v658_v31 = vunpack.c.l.bf16 %v325_v21  ;;  %v722_v32 = vunpack.c.l.bf16 %v357_v22  ;;  %v657_v35 = vunpack.c.h.bf16 %v324_v27 }
  0x4c   : > { %1226 = vmatpush2.msra.mxu1 %v612_v33  ;;  %1156 = vmatprep.subr.mxu0 %v547_v38  ;;  %v323_v33 = vld [vmem:[%s2053_s29 + $0x258] sm:$0xff]  ;;  %v656_v38 = vunpack.c.l.bf16 %v324_v27 }
  0x4d   : > { %1227 = vmatprep.subr.mxu1 %v611_v39  ;;  %1157 = vmatpush2.msra.mxu0 %v546_v40  ;;  %v720_v39 = vunpack.c.l.bf16 %v356_v28  ;;  %v322_v40 = vld [vmem:[%s2053_s29 + $0x250] sm:$0xff]  ;;  %v655_v42 = vunpack.c.h.bf16 %v323_v33  ;;  %v654_v44 = vunpack.c.l.bf16 %v323_v33 }
  0x4e   : > { %1228 = vmatpush2.msra.mxu1 %v610_v41  ;;  %1158 = vmatprep.subr.mxu0 %v545_v45  ;;  %v354_v41 = vld [vmem:[%s2053_s29 + $0x350] sm:$0xff]  ;;  %v718_v45 = vunpack.c.l.bf16 %v355_v34  ;;  %v652_v50 = vunpack.c.l.bf16 %v322_v40 }
  0x4f   : > { %1229 = vmatprep.subr.mxu1 %v609_v46  ;;  %1159 = vmatpush2.msra.mxu0 %v544_v47  ;;  %v321_v46 = vld [vmem:[%s2053_s29 + $0x248] sm:$0xff]  ;;  %v717_v49 = vunpack.c.h.bf16 %v354_v41 }
  0x50   : > { %1230 = vmatpush2.msra.mxu1 %v608_v48  ;;  %1160 = vmatprep.subr.mxu0 %v543_v52  ;;  %v353_v47 = vld [vmem:[%s2053_s29 + $0x348] sm:$0xff]  ;;  %v653_v48 = vunpack.c.h.bf16 %v322_v40  ;;  %v716_v52 = vunpack.c.l.bf16 %v354_v41  ;;  %v650_v57 = vunpack.c.l.bf16 %v321_v46 }
  0x51   : > { %1231 = vmatprep.subr.mxu1 %v607_v53  ;;  %1161 = vmatpush2.msra.mxu0 %v542_v55  ;;  %v320_v53 = vld [vmem:[%s2053_s29 + $0x240] sm:$0xff]  ;;  %v651_v55 = vunpack.c.h.bf16 %v321_v46  ;;  %v714_v58 = vunpack.c.l.bf16 %v353_v47 }
  0x52   : > { %1232 = vmatpush2.msra.mxu1 %v606_v56  ;;  %1162 = vmatprep.subr.mxu0 %v541_v59  ;;  %v715_v56 = vunpack.c.h.bf16 %v353_v47  ;;  %v319_v59 = vld [vmem:[%s2053_s29 + $0x238] sm:$0xff]  ;;  %v648_v63 = vunpack.c.l.bf16 %v320_v53 }
  0x53   : > { %1233 = vmatprep.subr.mxu1 %v605_v60  ;;  %1163 = vmatpush2.msra.mxu0 %v540_v61  ;;  %v351_v60 = vld [vmem:[%s2053_s29 + $0x338] sm:$0xff]  ;;  %v649_v61 = vunpack.c.h.bf16 %v320_v53 }
  0x54   : > { %1234 = vmatpush2.msra.mxu1 %v604_v62  ;;  %1164 = vmatprep.subr.mxu0 %v539_v2  ;;  %v713_v62 = vunpack.c.h.bf16 %v352_v54  ;;  %v350_v2 = vld [vmem:[%s2053_s29 + $0x330] sm:$0xff] }
  0x55   : > { %1235 = vmatprep.subr.mxu1 %v603_v3  ;;  %1165 = vmatpush2.msra.mxu0 %v538_v5  ;;  %v647_v3 = vunpack.c.h.bf16 %v319_v59  ;;  %v646_v5 = vunpack.c.l.bf16 %v319_v59  ;;  %v708_v12 = vunpack.c.l.bf16 %v350_v2 }
  0x56   : > { %1236 = vmatpush2.msra.mxu1 %v602_v6  ;;  %1166 = vmatprep.subr.mxu0 %v537_v7  ;;  %v710_v6 = vunpack.c.l.bf16 %v351_v60  ;;  %v317_v7 = vld [vmem:[%s2053_s29 + $0x228] sm:$0xff] }
  0x57   : > { %1237 = vmatprep.subr.mxu1 %v601_v8  ;;  %1167 = vmatpush2.msra.mxu0 %v536_v9  ;;  %v349_v8 = vld [vmem:[%s2053_s29 + $0x328] sm:$0xff]  ;;  %v643_v15 = vunpack.c.h.bf16 %v317_v7 }
  0x58   : > { %1168 = vmatprep.mubr.f32.mxu0 %v1035_v10  ;;  %1238 = vmatpush2.msra.mxu1 %v600_v13  ;;  %v709_v10 = vunpack.c.h.bf16 %v350_v2  ;;  %v316_v13 = vld [vmem:[%s2053_s29 + $0x220] sm:$0xff]  ;;  %v707_v16 = vunpack.c.h.bf16 %v349_v8 }
  0x59   : > { %1239 = vmatprep.mubr.f32.mxu1 %v1036_v14  ;;  %1169 = vmatmul.mubr.f32.vlgmr.msra.gmra.mxu0 %v1027_v1  ;;  %v318_v1 = vld [vmem:[%s2053_s29 + $0x230] sm:$0xff]  ;;  %v348_v14 = vld [vmem:[%s2053_s29 + $0x320] sm:$0xff]  ;;  %v641_v21 = vunpack.c.h.bf16 %v316_v13 }
  0x5a   : > { %1240 = vmatmul.mubr.f32.vlgmr.msra.gmra.mxu1 %v1034_v4  ;;  %1246 = vmatprep.subr.mxu0 %v663_v17  ;;  %v711_v4 = vunpack.c.h.bf16 %v351_v60  ;;  %v645_v9 = vunpack.c.h.bf16 %v318_v1  ;;  %v644_v11 = vunpack.c.l.bf16 %v318_v1  ;;  %v642_v17 = vunpack.c.l.bf16 %v317_v7 }
  0x5b   : > { %1317 = vmatprep.subr.mxu1 %v727_v18  ;;  %1247 = vmatpush1.msra.mxu0 %v662_v19  ;;  %v706_v18 = vunpack.c.l.bf16 %v349_v8  ;;  %v315_v19 = vld [vmem:[%s2053_s29 + $0x218] sm:$0xff]  ;;  %v705_v22 = vunpack.c.h.bf16 %v348_v14 }
  0x5c   : > { %1318 = vmatpush1.msra.mxu1 %v726_v20  ;;  %1248 = vmatprep.subr.mxu0 %v661_v23  ;;  %v347_v20 = vld [vmem:[%s2053_s29 + $0x318] sm:$0xff]  ;;  %v640_v23 = vunpack.c.l.bf16 %v316_v13  ;;  %v639_v27 = vunpack.c.h.bf16 %v315_v19 }
  0x5d   : > { %1319 = vmatprep.subr.mxu1 %v725_v24  ;;  %1249 = vmatpush1.msra.mxu0 %v660_v25  ;;  %v704_v24 = vunpack.c.l.bf16 %v348_v14  ;;  %v314_v25 = vld [vmem:[%s2053_s29 + $0x210] sm:$0xff]  ;;  %v703_v28 = vunpack.c.h.bf16 %v347_v20 }
  0x5e   : > { %1320 = vmatpush1.msra.mxu1 %v724_v26  ;;  %1250 = vmatprep.subr.mxu0 %v659_v29  ;;  %v346_v26 = vld [vmem:[%s2053_s29 + $0x310] sm:$0xff]  ;;  %v638_v29 = vunpack.c.l.bf16 %v315_v19  ;;  %v637_v33 = vunpack.c.h.bf16 %v314_v25 }
  0x5f   : > { %1321 = vmatprep.subr.mxu1 %v723_v30  ;;  %1251 = vmatpush1.msra.mxu0 %v658_v31  ;;  %v702_v30 = vunpack.c.l.bf16 %v347_v20  ;;  %v313_v31 = vld [vmem:[%s2053_s29 + $0x208] sm:$0xff]  ;;  %v701_v34 = vunpack.c.h.bf16 %v346_v26 }
  0x60   : > { %1322 = vmatpush1.msra.mxu1 %v722_v32  ;;  %1252 = vmatprep.subr.mxu0 %v657_v35  ;;  %v345_v32 = vld [vmem:[%s2053_s29 + $0x308] sm:$0xff]  ;;  %v636_v35 = vunpack.c.l.bf16 %v314_v25  ;;  %v635_v40 = vunpack.c.h.bf16 %v313_v31 }
  0x61   : > { %1323 = vmatprep.subr.mxu1 %v721_v36  ;;  %1253 = vmatpush1.msra.mxu0 %v656_v38  ;;  %v700_v36 = vunpack.c.l.bf16 %v346_v26  ;;  %v312_v38 = vld [vmem:[%s2053_s29 + $0x200] sm:$0xff]  ;;  %v699_v41 = vunpack.c.h.bf16 %v345_v32 }
  0x62   : > { %1324 = vmatpush1.msra.mxu1 %v720_v39  ;;  %1254 = vmatprep.subr.mxu0 %v655_v42  ;;  %v344_v39 = vld [vmem:[%s2053_s29 + $0x300] sm:$0xff]  ;;  %v634_v42 = vunpack.c.l.bf16 %v313_v31  ;;  %v633_v46 = vunpack.c.h.bf16 %v312_v38 }
  0x63   : > { %1325 = vmatprep.subr.mxu1 %v719_v43  ;;  %1255 = vmatpush1.msra.mxu0 %v654_v44  ;;  %v698_v43 = vunpack.c.l.bf16 %v345_v32  ;;  %v343_v44 = vld [vmem:[%s2053_s29 + $0x2f8] sm:$0xff]  ;;  %v697_v47 = vunpack.c.h.bf16 %v344_v39 }
  0x64   : > { %1326 = vmatpush1.msra.mxu1 %v718_v45  ;;  %1256 = vmatprep.subr.mxu0 %v653_v48  ;;  %v375_v45 = vld [vmem:[%s2053_s29 + $0x3f8] sm:$0xff]  ;;  %v632_v48 = vunpack.c.l.bf16 %v312_v38  ;;  %v695_v53 = vunpack.c.h.bf16 %v343_v44 }
  0x65   : > { %1327 = vmatprep.subr.mxu1 %v717_v49  ;;  %1257 = vmatpush1.msra.mxu0 %v652_v50  ;;  %v696_v49 = vunpack.c.l.bf16 %v344_v39  ;;  %v342_v50 = vld [vmem:[%s2053_s29 + $0x2f0] sm:$0xff]  ;;  %v759_v54 = vunpack.c.h.bf16 %v375_v45 }
  0x66   : > { %1328 = vmatpush1.msra.mxu1 %v716_v52  ;;  %1258 = vmatprep.subr.mxu0 %v651_v55  ;;  %v374_v52 = vld [vmem:[%s2053_s29 + $0x3f0] sm:$0xff]  ;;  %v694_v55 = vunpack.c.l.bf16 %v343_v44  ;;  %v693_v59 = vunpack.c.h.bf16 %v342_v50 }
  0x67   : > { %1329 = vmatprep.subr.mxu1 %v715_v56  ;;  %1259 = vmatpush1.msra.mxu0 %v650_v57  ;;  %v758_v56 = vunpack.c.l.bf16 %v375_v45  ;;  %v341_v57 = vld [vmem:[%s2053_s29 + $0x2e8] sm:$0xff]  ;;  %v757_v60 = vunpack.c.h.bf16 %v374_v52 }
  0x68   : > { %1330 = vmatpush1.msra.mxu1 %v714_v58  ;;  %1260 = vmatprep.subr.mxu0 %v649_v61  ;;  %v373_v58 = vld [vmem:[%s2053_s29 + $0x3e8] sm:$0xff]  ;;  %v692_v61 = vunpack.c.l.bf16 %v342_v50  ;;  %v691_v1 = vunpack.c.h.bf16 %v341_v57 }
  0x69   : > { %1331 = vmatprep.subr.mxu1 %v713_v62  ;;  %1261 = vmatpush1.msra.mxu0 %v648_v63  ;;  %v756_v62 = vunpack.c.l.bf16 %v374_v52  ;;  %v340_v63 = vld [vmem:[%s2053_s29 + $0x2e0] sm:$0xff]  ;;  %v755_v2 = vunpack.c.h.bf16 %v373_v58 }
  0x6a   : > { %1332 = vmatpush1.msra.mxu1 %v712_v0  ;;  %1262 = vmatprep.subr.mxu0 %v647_v3  ;;  %v372_v0 = vld [vmem:[%s2053_s29 + $0x3e0] sm:$0xff]  ;;  %v690_v3 = vunpack.c.l.bf16 %v341_v57  ;;  %v689_v7 = vunpack.c.h.bf16 %v340_v63 }
  0x6b   : > { %1333 = vmatprep.subr.mxu1 %v711_v4  ;;  %1263 = vmatpush1.msra.mxu0 %v646_v5  ;;  %v754_v4 = vunpack.c.l.bf16 %v373_v58  ;;  %v339_v5 = vld [vmem:[%s2053_s29 + $0x2d8] sm:$0xff]  ;;  %v753_v8 = vunpack.c.h.bf16 %v372_v0 }
  0x6c   : > { %1334 = vmatpush1.msra.mxu1 %v710_v6  ;;  %1264 = vmatprep.subr.mxu0 %v645_v9  ;;  %v371_v6 = vld [vmem:[%s2053_s29 + $0x3d8] sm:$0xff]  ;;  %v688_v9 = vunpack.c.l.bf16 %v340_v63  ;;  %v687_v13 = vunpack.c.h.bf16 %v339_v5  ;;  %v362_v63 = vld [vmem:[%s2053_s29 + $0x390] sm:$0xff] }
  0x6d   : > { %1335 = vmatprep.subr.mxu1 %v709_v10  ;;  %1265 = vmatpush1.msra.mxu0 %v644_v11  ;;  %v752_v10 = vunpack.c.l.bf16 %v372_v0  ;;  %v338_v11 = vld [vmem:[%s2053_s29 + $0x2d0] sm:$0xff]  ;;  %v751_v14 = vunpack.c.h.bf16 %v371_v6 }
  0x6e   : > { %1336 = vmatpush1.msra.mxu1 %v708_v12  ;;  %1266 = vmatprep.subr.mxu0 %v643_v15  ;;  %v370_v12 = vld [vmem:[%s2053_s29 + $0x3d0] sm:$0xff]  ;;  %v686_v15 = vunpack.c.l.bf16 %v339_v5  ;;  %v685_v19 = vunpack.c.h.bf16 %v338_v11  ;;  %v361_v5 = vld [vmem:[%s2053_s29 + $0x388] sm:$0xff] }
  0x6f   : > { %1337 = vmatprep.subr.mxu1 %v707_v16  ;;  %1267 = vmatpush1.msra.mxu0 %v642_v17  ;;  %v750_v16 = vunpack.c.l.bf16 %v371_v6  ;;  %v337_v17 = vld [vmem:[%s2053_s29 + $0x2c8] sm:$0xff]  ;;  %v749_v20 = vunpack.c.h.bf16 %v370_v12 }
  0x70   : > { %1338 = vmatpush1.msra.mxu1 %v706_v18  ;;  %1268 = vmatprep.subr.mxu0 %v641_v21  ;;  %v369_v18 = vld [vmem:[%s2053_s29 + $0x3c8] sm:$0xff]  ;;  %v684_v21 = vunpack.c.l.bf16 %v338_v11  ;;  %v683_v25 = vunpack.c.h.bf16 %v337_v17  ;;  %v328_v11 = vld [vmem:[%s2053_s29 + $0x280] sm:$0xff] }
  0x71   : > { %1339 = vmatprep.subr.mxu1 %v705_v22  ;;  %1269 = vmatpush1.msra.mxu0 %v640_v23  ;;  %v748_v22 = vunpack.c.l.bf16 %v370_v12  ;;  %v336_v23 = vld [vmem:[%s2053_s29 + $0x2c0] sm:$0xff]  ;;  %v747_v26 = vunpack.c.h.bf16 %v369_v18 }
  0x72   : > { %1340 = vmatpush1.msra.mxu1 %v704_v24  ;;  %1270 = vmatprep.subr.mxu0 %v639_v27  ;;  %v368_v24 = vld [vmem:[%s2053_s29 + $0x3c0] sm:$0xff]  ;;  %v682_v27 = vunpack.c.l.bf16 %v337_v17  ;;  %v681_v31 = vunpack.c.h.bf16 %v336_v23  ;;  %v730_v17 = vunpack.c.l.bf16 %v361_v5 }
  0x73   : > { %1341 = vmatprep.subr.mxu1 %v703_v28  ;;  %1271 = vmatpush1.msra.mxu0 %v638_v29  ;;  %v746_v28 = vunpack.c.l.bf16 %v369_v18  ;;  %v335_v29 = vld [vmem:[%s2053_s29 + $0x2b8] sm:$0xff]  ;;  %v745_v32 = vunpack.c.h.bf16 %v368_v24  ;;  %v360_v12 = vld [vmem:[%s2053_s29 + $0x380] sm:$0xff] }
  0x74   : > { %1342 = vmatpush1.msra.mxu1 %v702_v30  ;;  %1272 = vmatprep.subr.mxu0 %v637_v33  ;;  %v367_v30 = vld [vmem:[%s2053_s29 + $0x3b8] sm:$0xff]  ;;  %v680_v33 = vunpack.c.l.bf16 %v336_v23  ;;  %v679_v38 = vunpack.c.h.bf16 %v335_v29 }
  0x75   : > { %1343 = vmatprep.subr.mxu1 %v701_v34  ;;  %1273 = vmatpush1.msra.mxu0 %v636_v35  ;;  %v744_v34 = vunpack.c.l.bf16 %v368_v24  ;;  %v334_v35 = vld [vmem:[%s2053_s29 + $0x2b0] sm:$0xff]  ;;  %v743_v39 = vunpack.c.h.bf16 %v367_v30  ;;  %v423_v24 = vld [vmem:[%s2053_s29 + $0x578] sm:$0xff] }
  0x76   : > { %1344 = vmatpush1.msra.mxu1 %v700_v36  ;;  %1274 = vmatprep.subr.mxu0 %v635_v40  ;;  %v366_v36 = vld [vmem:[%s2053_s29 + $0x3b0] sm:$0xff]  ;;  %v678_v40 = vunpack.c.l.bf16 %v335_v29  ;;  %v677_v44 = vunpack.c.h.bf16 %v334_v35 }
  0x77   : > { %1345 = vmatprep.subr.mxu1 %v699_v41  ;;  %1275 = vmatpush1.msra.mxu0 %v634_v42  ;;  %v742_v41 = vunpack.c.l.bf16 %v367_v30  ;;  %v333_v42 = vld [vmem:[%s2053_s29 + $0x2a8] sm:$0xff]  ;;  %v741_v45 = vunpack.c.h.bf16 %v366_v36  ;;  %v422_v29 = vld [vmem:[%s2053_s29 + $0x570] sm:$0xff]  ;;  %v855_v30 = vunpack.c.h.bf16 %v423_v24 }
  0x78   : > { %1346 = vmatpush1.msra.mxu1 %v698_v43  ;;  %1276 = vmatprep.subr.mxu0 %v633_v46  ;;  %v365_v43 = vld [vmem:[%s2053_s29 + $0x3a8] sm:$0xff]  ;;  %v676_v46 = vunpack.c.l.bf16 %v334_v35  ;;  %v675_v50 = vunpack.c.h.bf16 %v333_v42 }
  0x79   : > { %1347 = vmatprep.subr.mxu1 %v697_v47  ;;  %1277 = vmatpush1.msra.mxu0 %v632_v48  ;;  %v740_v47 = vunpack.c.l.bf16 %v366_v36  ;;  %v332_v48 = vld [vmem:[%s2053_s29 + $0x2a0] sm:$0xff]  ;;  %v739_v52 = vunpack.c.h.bf16 %v365_v43  ;;  %v853_v36 = vunpack.c.h.bf16 %v422_v29 }
  0x7a   : > { %1348 = vmatpush1.msra.mxu1 %v696_v49  ;;  %1278 = vmatprep.subr.mxu0 %v695_v53  ;;  %v364_v49 = vld [vmem:[%s2053_s29 + $0x3a0] sm:$0xff]  ;;  %v674_v53 = vunpack.c.l.bf16 %v333_v42  ;;  %v673_v57 = vunpack.c.h.bf16 %v332_v48 }
  0x7b   : > { %1349 = vmatprep.subr.mxu1 %v759_v54  ;;  %1279 = vmatpush2.msra.mxu0 %v694_v55  ;;  %v738_v54 = vunpack.c.l.bf16 %v365_v43  ;;  %v331_v55 = vld [vmem:[%s2053_s29 + $0x298] sm:$0xff]  ;;  %v737_v58 = vunpack.c.h.bf16 %v364_v49 }
  0x7c   : > { %1350 = vmatpush2.msra.mxu1 %v758_v56  ;;  %1280 = vmatprep.subr.mxu0 %v693_v59  ;;  %v363_v56 = vld [vmem:[%s2053_s29 + $0x398] sm:$0xff]  ;;  %v245_v59 = vld [vmem:[%s2048_s25 + $0x8] sm:$0xff]  ;;  %v671_v0 = vunpack.c.h.bf16 %v331_v55 }
  0x7d   : > { %1351 = vmatprep.subr.mxu1 %v757_v60  ;;  %1281 = vmatpush2.msra.mxu0 %v692_v61  ;;  %v672_v60 = vunpack.c.l.bf16 %v332_v48  ;;  %v736_v61 = vunpack.c.l.bf16 %v364_v49  ;;  %v1037_v6 = vcombine.high %v245_v59, %v245_v59 }
  0x7e   : > { %1352 = vmatpush2.msra.mxu1 %v756_v62  ;;  %1282 = vmatprep.subr.mxu0 %v691_v1  ;;  %v330_v62 = vld [vmem:[%s2053_s29 + $0x290] sm:$0xff]  ;;  %v735_v1 = vunpack.c.h.bf16 %v363_v56 }
  0x7f   : > { %1353 = vmatprep.subr.mxu1 %v755_v2  ;;  %1283 = vmatpush2.msra.mxu0 %v690_v3  ;;  %v670_v2 = vunpack.c.l.bf16 %v331_v55  ;;  %v734_v3 = vunpack.c.l.bf16 %v363_v56  ;;  %v1051_v18 = vrot.slane %v1037_v6, %v2120_v51 }
  0x80   : > { %1354 = vmatpush2.msra.mxu1 %v754_v4  ;;  %1284 = vmatprep.subr.mxu0 %v689_v7  ;;  %v329_v4 = vld [vmem:[%s2053_s29 + $0x288] sm:$0xff]  ;;  %v669_v7 = vunpack.c.h.bf16 %v330_v62 }
  0x81   : > { %1355 = vmatprep.subr.mxu1 %v753_v8  ;;  %1285 = vmatpush2.msra.mxu0 %v688_v9  ;;  %v733_v8 = vunpack.c.h.bf16 %v362_v63  ;;  %v668_v9 = vunpack.c.l.bf16 %v330_v62 }
  0x82   : > { %1356 = vmatpush2.msra.mxu1 %v752_v10  ;;  %1286 = vmatprep.subr.mxu0 %v687_v13  ;;  %v732_v10 = vunpack.c.l.bf16 %v362_v63  ;;  %v1044_v13 = vrot.slane %v245_v59, %v2120_v51  ;;  %v385_v59 = vld [vmem:[%s2053_s29 + $0x448] sm:$0xff] }
  0x83   : > { %1357 = vmatprep.subr.mxu1 %v751_v14  ;;  %1287 = vmatpush2.msra.mxu0 %v686_v15  ;;  %v667_v14 = vunpack.c.h.bf16 %v329_v4  ;;  %v731_v15 = vunpack.c.h.bf16 %v361_v5  ;;  %v778_v5 = vunpack.c.l.bf16 %v385_v59 }
  0x84   : > { %1358 = vmatpush2.msra.mxu1 %v750_v16  ;;  %1288 = vmatprep.subr.mxu0 %v685_v19  ;;  %v666_v16 = vunpack.c.l.bf16 %v329_v4  ;;  %v665_v19 = vunpack.c.h.bf16 %v328_v11  ;;  %v1052_v23 = vcombine.high %v1044_v13, %v1044_v13 }
  0x85   : > { %1359 = vmatprep.subr.mxu1 %v749_v20  ;;  %1289 = vmatpush2.msra.mxu0 %v684_v21  ;;  %v729_v20 = vunpack.c.h.bf16 %v360_v12  ;;  %v391_v21 = vld [vmem:[%s2053_s29 + $0x478] sm:$0xff] }
  0x86   : > { %1360 = vmatpush2.msra.mxu1 %v748_v22  ;;  %1290 = vmatprep.subr.mxu0 %v683_v25  ;;  %v664_v22 = vunpack.c.l.bf16 %v328_v11  ;;  %v728_v25 = vunpack.c.l.bf16 %v360_v12 }
  0x87   : > { %1361 = vmatprep.subr.mxu1 %v747_v26  ;;  %1291 = vmatpush2.msra.mxu0 %v682_v27  ;;  %v1053_v26 = vcombine.high %v1051_v18, %v1051_v18  ;;  %v791_v27 = vunpack.c.h.bf16 %v391_v21 }
  0x88   : > { %1362 = vmatpush2.msra.mxu1 %v746_v28  ;;  %1292 = vmatprep.subr.mxu0 %v681_v31  ;;  %v390_v28 = vld [vmem:[%s2053_s29 + $0x470] sm:$0xff]  ;;  %v790_v31 = vunpack.c.l.bf16 %v391_v21 }
  0x89   : > { %1363 = vmatprep.subr.mxu1 %v745_v32  ;;  %1293 = vmatpush2.msra.mxu0 %v680_v33  ;;  %v854_v32 = vunpack.c.l.bf16 %v423_v24  ;;  %v389_v33 = vld [vmem:[%s2053_s29 + $0x468] sm:$0xff]  ;;  %v789_v35 = vunpack.c.h.bf16 %v390_v28 }
  0x8a   : > { %1364 = vmatpush2.msra.mxu1 %v744_v34  ;;  %1294 = vmatprep.subr.mxu0 %v679_v38  ;;  %v421_v34 = vld [vmem:[%s2053_s29 + $0x568] sm:$0xff]  ;;  %v788_v38 = vunpack.c.l.bf16 %v390_v28  ;;  %v787_v42 = vunpack.c.h.bf16 %v389_v33 }
  0x8b   : > { %1365 = vmatprep.subr.mxu1 %v743_v39  ;;  %1295 = vmatpush2.msra.mxu0 %v678_v40  ;;  %v852_v39 = vunpack.c.l.bf16 %v422_v29  ;;  %v388_v40 = vld [vmem:[%s2053_s29 + $0x460] sm:$0xff]  ;;  %v851_v43 = vunpack.c.h.bf16 %v421_v34 }
  0x8c   : > { %1366 = vmatpush2.msra.mxu1 %v742_v41  ;;  %1296 = vmatprep.subr.mxu0 %v677_v44  ;;  %v420_v41 = vld [vmem:[%s2053_s29 + $0x560] sm:$0xff]  ;;  %v786_v44 = vunpack.c.l.bf16 %v389_v33  ;;  %v785_v48 = vunpack.c.h.bf16 %v388_v40 }
  0x8d   : > { %1367 = vmatprep.subr.mxu1 %v741_v45  ;;  %1297 = vmatpush2.msra.mxu0 %v676_v46  ;;  %v850_v45 = vunpack.c.l.bf16 %v421_v34  ;;  %v387_v46 = vld [vmem:[%s2053_s29 + $0x458] sm:$0xff]  ;;  %v849_v49 = vunpack.c.h.bf16 %v420_v41 }
  0x8e   : > { %1368 = vmatpush2.msra.mxu1 %v740_v47  ;;  %1298 = vmatprep.subr.mxu0 %v675_v50  ;;  %v419_v47 = vld [vmem:[%s2053_s29 + $0x558] sm:$0xff]  ;;  %v784_v50 = vunpack.c.l.bf16 %v388_v40  ;;  %v783_v55 = vunpack.c.h.bf16 %v387_v46 }
  0x8f   : > { %1369 = vmatprep.subr.mxu1 %v739_v52  ;;  %1299 = vmatpush2.msra.mxu0 %v674_v53  ;;  %v848_v52 = vunpack.c.l.bf16 %v420_v41  ;;  %v386_v53 = vld [vmem:[%s2053_s29 + $0x450] sm:$0xff]  ;;  %v847_v56 = vunpack.c.h.bf16 %v419_v47 }
  0x90   : > { %1370 = vmatpush2.msra.mxu1 %v738_v54  ;;  %1300 = vmatprep.subr.mxu0 %v673_v57  ;;  %v418_v54 = vld [vmem:[%s2053_s29 + $0x550] sm:$0xff]  ;;  %v782_v57 = vunpack.c.l.bf16 %v387_v46  ;;  %v780_v63 = vunpack.c.l.bf16 %v386_v53 }
  0x91   : > { %1371 = vmatprep.subr.mxu1 %v737_v58  ;;  %1301 = vmatpush2.msra.mxu0 %v672_v60  ;;  %v846_v58 = vunpack.c.l.bf16 %v419_v47  ;;  %v417_v60 = vld [vmem:[%s2053_s29 + $0x548] sm:$0xff]  ;;  %v845_v62 = vunpack.c.h.bf16 %v418_v54 }
  0x92   : > { %1372 = vmatpush2.msra.mxu1 %v736_v61  ;;  %1302 = vmatprep.subr.mxu0 %v671_v0  ;;  %v781_v61 = vunpack.c.h.bf16 %v386_v53  ;;  %v844_v0 = vunpack.c.l.bf16 %v418_v54  ;;  %v843_v4 = vunpack.c.h.bf16 %v417_v60  ;;  %v842_v6 = vunpack.c.l.bf16 %v417_v60 }
  0x93   : > { %1373 = vmatprep.subr.mxu1 %v735_v1  ;;  %1303 = vmatpush2.msra.mxu0 %v670_v2  ;;  %v384_v1 = vld [vmem:[%s2053_s29 + $0x440] sm:$0xff] }
  0x94   : > { %1374 = vmatpush2.msra.mxu1 %v734_v3  ;;  %1304 = vmatprep.subr.mxu0 %v669_v7  ;;  %v416_v2 = vld [vmem:[%s2053_s29 + $0x540] sm:$0xff]  ;;  %v779_v3 = vunpack.c.h.bf16 %v385_v59  ;;  %v383_v7 = vld [vmem:[%s2053_s29 + $0x438] sm:$0xff]  ;;  %v776_v11 = vunpack.c.l.bf16 %v384_v1 }
  0x95   : > { %1375 = vmatprep.subr.mxu1 %v733_v8  ;;  %1305 = vmatpush2.msra.mxu0 %v668_v9  ;;  %v415_v8 = vld [vmem:[%s2053_s29 + $0x538] sm:$0xff]  ;;  %v777_v9 = vunpack.c.h.bf16 %v384_v1  ;;  %v840_v12 = vunpack.c.l.bf16 %v416_v2 }
  0x96   : > { %1376 = vmatpush2.msra.mxu1 %v732_v10  ;;  %1306 = vmatprep.subr.mxu0 %v667_v14  ;;  %v841_v10 = vunpack.c.h.bf16 %v416_v2  ;;  %v414_v14 = vld [vmem:[%s2053_s29 + $0x530] sm:$0xff] }
  0x97   : > { %1377 = vmatprep.subr.mxu1 %v731_v15  ;;  %1307 = vmatpush2.msra.mxu0 %v666_v16  ;;  %v775_v15 = vunpack.c.h.bf16 %v383_v7  ;;  %v839_v16 = vunpack.c.h.bf16 %v415_v8  ;;  %v836_v24 = vunpack.c.l.bf16 %v414_v14 }
  0x98   : > { %1378 = vmatpush2.msra.mxu1 %v730_v17  ;;  %1308 = vmatprep.subr.mxu0 %v665_v19  ;;  %v774_v17 = vunpack.c.l.bf16 %v383_v7  ;;  %v381_v19 = vld [vmem:[%s2053_s29 + $0x428] sm:$0xff] }
  0x99   : > { %1379 = vmatprep.subr.mxu1 %v729_v20  ;;  %1309 = vmatpush2.msra.mxu0 %v664_v22  ;;  %v413_v20 = vld [vmem:[%s2053_s29 + $0x528] sm:$0xff]  ;;  %v837_v22 = vunpack.c.h.bf16 %v414_v14  ;;  %v770_v29 = vunpack.c.l.bf16 %v381_v19 }
  0x9a   : > { %1310 = vmatprep.mubr.f32.mxu0 %v1052_v23  ;;  %1380 = vmatpush2.msra.mxu1 %v728_v25  ;;  %v380_v25 = vld [vmem:[%s2053_s29 + $0x420] sm:$0xff]  ;;  %v835_v28 = vunpack.c.h.bf16 %v413_v20 }
  0x9b   : > { %1311 = vmatmul.mubr.f32.vlgmr.msra.gmra.mxu0 %v1044_v13  ;;  %1381 = vmatprep.mubr.f32.mxu1 %v1053_v26  ;;  %v382_v13 = vld [vmem:[%s2053_s29 + $0x430] sm:$0xff]  ;;  %v412_v26 = vld [vmem:[%s2053_s29 + $0x520] sm:$0xff]  ;;  %v769_v33 = vunpack.c.h.bf16 %v380_v25 }
  0x9c   : > { %1388 = vmatprep.subr.mxu0 %v791_v27  ;;  %1459 = vmatprep.subr.mxu1 %v855_v30  ;;  %v773_v21 = vunpack.c.h.bf16 %v382_v13  ;;  %v772_v23 = vunpack.c.l.bf16 %v382_v13  ;;  %v771_v27 = vunpack.c.h.bf16 %v381_v19  ;;  %v834_v30 = vunpack.c.l.bf16 %v413_v20 }
  0x9d   : > { %1382 = vmatmul.mubr.f32.vlgmr.msra.gmra.mxu1 %v1051_v18  ;;  %1389 = vmatpush1.msra.mxu0 %v790_v31  ;;  %v838_v18 = vunpack.c.l.bf16 %v415_v8  ;;  %v379_v31 = vld [vmem:[%s2053_s29 + $0x418] sm:$0xff]  ;;  %v833_v34 = vunpack.c.h.bf16 %v412_v26 }
  0x9e   : > { %1460 = vmatpush1.msra.mxu1 %v854_v32  ;;  %1390 = vmatprep.subr.mxu0 %v789_v35  ;;  %v411_v32 = vld [vmem:[%s2053_s29 + $0x518] sm:$0xff]  ;;  %v768_v35 = vunpack.c.l.bf16 %v380_v25  ;;  %v767_v40 = vunpack.c.h.bf16 %v379_v31 }
  0x9f   : > { %1461 = vmatprep.subr.mxu1 %v853_v36  ;;  %1391 = vmatpush1.msra.mxu0 %v788_v38  ;;  %v832_v36 = vunpack.c.l.bf16 %v412_v26  ;;  %v378_v38 = vld [vmem:[%s2053_s29 + $0x410] sm:$0xff]  ;;  %v831_v41 = vunpack.c.h.bf16 %v411_v32 }
  0xa0   : > { %1462 = vmatpush1.msra.mxu1 %v852_v39  ;;  %1392 = vmatprep.subr.mxu0 %v787_v42  ;;  %v410_v39 = vld [vmem:[%s2053_s29 + $0x510] sm:$0xff]  ;;  %v766_v42 = vunpack.c.l.bf16 %v379_v31  ;;  %v765_v46 = vunpack.c.h.bf16 %v378_v38 }
  0xa1   : > { %1463 = vmatprep.subr.mxu1 %v851_v43  ;;  %1393 = vmatpush1.msra.mxu0 %v786_v44  ;;  %v830_v43 = vunpack.c.l.bf16 %v411_v32  ;;  %v377_v44 = vld [vmem:[%s2053_s29 + $0x408] sm:$0xff]  ;;  %v829_v47 = vunpack.c.h.bf16 %v410_v39 }
  0xa2   : > { %1464 = vmatpush1.msra.mxu1 %v850_v45  ;;  %1394 = vmatprep.subr.mxu0 %v785_v48  ;;  %v409_v45 = vld [vmem:[%s2053_s29 + $0x508] sm:$0xff]  ;;  %v764_v48 = vunpack.c.l.bf16 %v378_v38  ;;  %v763_v53 = vunpack.c.h.bf16 %v377_v44 }
  0xa3   : > { %1465 = vmatprep.subr.mxu1 %v849_v49  ;;  %1395 = vmatpush1.msra.mxu0 %v784_v50  ;;  %v828_v49 = vunpack.c.l.bf16 %v410_v39  ;;  %v376_v50 = vld [vmem:[%s2053_s29 + $0x400] sm:$0xff]  ;;  %v827_v54 = vunpack.c.h.bf16 %v409_v45 }
  0xa4   : > { %1466 = vmatpush1.msra.mxu1 %v848_v52  ;;  %1396 = vmatprep.subr.mxu0 %v783_v55  ;;  %v408_v52 = vld [vmem:[%s2053_s29 + $0x500] sm:$0xff]  ;;  %v762_v55 = vunpack.c.l.bf16 %v377_v44  ;;  %v761_v59 = vunpack.c.h.bf16 %v376_v50 }
  0xa5   : > { %1467 = vmatprep.subr.mxu1 %v847_v56  ;;  %1397 = vmatpush1.msra.mxu0 %v782_v57  ;;  %v826_v56 = vunpack.c.l.bf16 %v409_v45  ;;  %v407_v57 = vld [vmem:[%s2053_s29 + $0x4f8] sm:$0xff]  ;;  %v825_v60 = vunpack.c.h.bf16 %v408_v52 }
  0xa6   : > { %1468 = vmatpush1.msra.mxu1 %v846_v58  ;;  %1398 = vmatprep.subr.mxu0 %v781_v61  ;;  %v439_v58 = vld [vmem:[%s2053_s29 + $0x5f8] sm:$0xff]  ;;  %v760_v61 = vunpack.c.l.bf16 %v376_v50  ;;  %v823_v1 = vunpack.c.h.bf16 %v407_v57 }
  0xa7   : > { %1469 = vmatprep.subr.mxu1 %v845_v62  ;;  %1399 = vmatpush1.msra.mxu0 %v780_v63  ;;  %v824_v62 = vunpack.c.l.bf16 %v408_v52  ;;  %v406_v63 = vld [vmem:[%s2053_s29 + $0x4f0] sm:$0xff]  ;;  %v887_v2 = vunpack.c.h.bf16 %v439_v58 }
  0xa8   : > { %1470 = vmatpush1.msra.mxu1 %v844_v0  ;;  %1400 = vmatprep.subr.mxu0 %v779_v3  ;;  %v438_v0 = vld [vmem:[%s2053_s29 + $0x5f0] sm:$0xff]  ;;  %v822_v3 = vunpack.c.l.bf16 %v407_v57  ;;  %v821_v7 = vunpack.c.h.bf16 %v406_v63 }
  0xa9   : > { %1471 = vmatprep.subr.mxu1 %v843_v4  ;;  %1401 = vmatpush1.msra.mxu0 %v778_v5  ;;  %v886_v4 = vunpack.c.l.bf16 %v439_v58  ;;  %v405_v5 = vld [vmem:[%s2053_s29 + $0x4e8] sm:$0xff]  ;;  %v885_v8 = vunpack.c.h.bf16 %v438_v0 }
  0xaa   : > { %1472 = vmatpush1.msra.mxu1 %v842_v6  ;;  %1402 = vmatprep.subr.mxu0 %v777_v9  ;;  %v437_v6 = vld [vmem:[%s2053_s29 + $0x5e8] sm:$0xff]  ;;  %v820_v9 = vunpack.c.l.bf16 %v406_v63  ;;  %v819_v13 = vunpack.c.h.bf16 %v405_v5 }
  0xab   : > { %1473 = vmatprep.subr.mxu1 %v841_v10  ;;  %1403 = vmatpush1.msra.mxu0 %v776_v11  ;;  %v884_v10 = vunpack.c.l.bf16 %v438_v0  ;;  %v404_v11 = vld [vmem:[%s2053_s29 + $0x4e0] sm:$0xff]  ;;  %v883_v14 = vunpack.c.h.bf16 %v437_v6 }
  0xac   : > { %1474 = vmatpush1.msra.mxu1 %v840_v12  ;;  %1404 = vmatprep.subr.mxu0 %v775_v15  ;;  %v436_v12 = vld [vmem:[%s2053_s29 + $0x5e0] sm:$0xff]  ;;  %v818_v15 = vunpack.c.l.bf16 %v405_v5  ;;  %v817_v19 = vunpack.c.h.bf16 %v404_v11 }
  0xad   : > { %1475 = vmatprep.subr.mxu1 %v839_v16  ;;  %1405 = vmatpush1.msra.mxu0 %v774_v17  ;;  %v882_v16 = vunpack.c.l.bf16 %v437_v6  ;;  %v403_v17 = vld [vmem:[%s2053_s29 + $0x4d8] sm:$0xff]  ;;  %v881_v20 = vunpack.c.h.bf16 %v436_v12 }
  0xae   : > { %1476 = vmatpush1.msra.mxu1 %v838_v18  ;;  %1406 = vmatprep.subr.mxu0 %v773_v21  ;;  %v435_v18 = vld [vmem:[%s2053_s29 + $0x5d8] sm:$0xff]  ;;  %v816_v21 = vunpack.c.l.bf16 %v404_v11  ;;  %v815_v25 = vunpack.c.h.bf16 %v403_v17  ;;  %v426_v11 = vld [vmem:[%s2053_s29 + $0x590] sm:$0xff] }
  0xaf   : > { %1477 = vmatprep.subr.mxu1 %v837_v22  ;;  %1407 = vmatpush1.msra.mxu0 %v772_v23  ;;  %v880_v22 = vunpack.c.l.bf16 %v436_v12  ;;  %v402_v23 = vld [vmem:[%s2053_s29 + $0x4d0] sm:$0xff]  ;;  %v879_v26 = vunpack.c.h.bf16 %v435_v18 }
  0xb0   : > { %1478 = vmatpush1.msra.mxu1 %v836_v24  ;;  %1408 = vmatprep.subr.mxu0 %v771_v27  ;;  %v434_v24 = vld [vmem:[%s2053_s29 + $0x5d0] sm:$0xff]  ;;  %v814_v27 = vunpack.c.l.bf16 %v403_v17  ;;  %v813_v31 = vunpack.c.h.bf16 %v402_v23  ;;  %v425_v17 = vld [vmem:[%s2053_s29 + $0x588] sm:$0xff] }
  0xb1   : > { %1479 = vmatprep.subr.mxu1 %v835_v28  ;;  %1409 = vmatpush1.msra.mxu0 %v770_v29  ;;  %v878_v28 = vunpack.c.l.bf16 %v435_v18  ;;  %v401_v29 = vld [vmem:[%s2053_s29 + $0x4c8] sm:$0xff]  ;;  %v877_v32 = vunpack.c.h.bf16 %v434_v24 }
  0xb2   : > { %1480 = vmatpush1.msra.mxu1 %v834_v30  ;;  %1410 = vmatprep.subr.mxu0 %v769_v33  ;;  %v433_v30 = vld [vmem:[%s2053_s29 + $0x5c8] sm:$0xff]  ;;  %v812_v33 = vunpack.c.l.bf16 %v402_v23  ;;  %v811_v38 = vunpack.c.h.bf16 %v401_v29  ;;  %v392_v23 = vld [vmem:[%s2053_s29 + $0x480] sm:$0xff] }
  0xb3   : > { %1481 = vmatprep.subr.mxu1 %v833_v34  ;;  %1411 = vmatpush1.msra.mxu0 %v768_v35  ;;  %v876_v34 = vunpack.c.l.bf16 %v434_v24  ;;  %v400_v35 = vld [vmem:[%s2053_s29 + $0x4c0] sm:$0xff]  ;;  %v875_v39 = vunpack.c.h.bf16 %v433_v30 }
  0xb4   : > { %1482 = vmatpush1.msra.mxu1 %v832_v36  ;;  %1412 = vmatprep.subr.mxu0 %v767_v40  ;;  %v432_v36 = vld [vmem:[%s2053_s29 + $0x5c0] sm:$0xff]  ;;  %v810_v40 = vunpack.c.l.bf16 %v401_v29  ;;  %v809_v44 = vunpack.c.h.bf16 %v400_v35  ;;  %v858_v29 = vunpack.c.l.bf16 %v425_v17 }
  0xb5   : > { %1483 = vmatprep.subr.mxu1 %v831_v41  ;;  %1413 = vmatpush1.msra.mxu0 %v766_v42  ;;  %v874_v41 = vunpack.c.l.bf16 %v433_v30  ;;  %v399_v42 = vld [vmem:[%s2053_s29 + $0x4b8] sm:$0xff]  ;;  %v873_v45 = vunpack.c.h.bf16 %v432_v36  ;;  %v424_v24 = vld [vmem:[%s2053_s29 + $0x580] sm:$0xff] }
  0xb6   : > { %1484 = vmatpush1.msra.mxu1 %v830_v43  ;;  %1414 = vmatprep.subr.mxu0 %v765_v46  ;;  %v431_v43 = vld [vmem:[%s2053_s29 + $0x5b8] sm:$0xff]  ;;  %v808_v46 = vunpack.c.l.bf16 %v400_v35  ;;  %v807_v50 = vunpack.c.h.bf16 %v399_v42 }
  0xb7   : > { %1485 = vmatprep.subr.mxu1 %v829_v47  ;;  %1415 = vmatpush1.msra.mxu0 %v764_v48  ;;  %v872_v47 = vunpack.c.l.bf16 %v432_v36  ;;  %v398_v48 = vld [vmem:[%s2053_s29 + $0x4b0] sm:$0xff]  ;;  %v871_v52 = vunpack.c.h.bf16 %v431_v43  ;;  %v487_v36 = vld [vmem:[%s2053_s29 + $0x778] sm:$0xff] }
  0xb8   : > { %1486 = vmatpush1.msra.mxu1 %v828_v49  ;;  %1416 = vmatprep.subr.mxu0 %v763_v53  ;;  %v430_v49 = vld [vmem:[%s2053_s29 + $0x5b0] sm:$0xff]  ;;  %v806_v53 = vunpack.c.l.bf16 %v399_v42  ;;  %v805_v57 = vunpack.c.h.bf16 %v398_v48 }
  0xb9   : > { %1487 = vmatprep.subr.mxu1 %v827_v54  ;;  %1417 = vmatpush1.msra.mxu0 %v762_v55  ;;  %v870_v54 = vunpack.c.l.bf16 %v431_v43  ;;  %v397_v55 = vld [vmem:[%s2053_s29 + $0x4a8] sm:$0xff]  ;;  %v869_v58 = vunpack.c.h.bf16 %v430_v49  ;;  %v486_v42 = vld [vmem:[%s2053_s29 + $0x770] sm:$0xff]  ;;  %v983_v43 = vunpack.c.h.bf16 %v487_v36 }
  0xba   : > { %1488 = vmatpush1.msra.mxu1 %v826_v56  ;;  %1418 = vmatprep.subr.mxu0 %v761_v59  ;;  %v429_v56 = vld [vmem:[%s2053_s29 + $0x5a8] sm:$0xff]  ;;  %v804_v59 = vunpack.c.l.bf16 %v398_v48  ;;  %v803_v63 = vunpack.c.h.bf16 %v397_v55 }
  0xbb   : > { %1489 = vmatprep.subr.mxu1 %v825_v60  ;;  %1419 = vmatpush1.msra.mxu0 %v760_v61  ;;  %v868_v60 = vunpack.c.l.bf16 %v430_v49  ;;  %v396_v61 = vld [vmem:[%s2053_s29 + $0x4a0] sm:$0xff]  ;;  %v867_v0 = vunpack.c.h.bf16 %v429_v56  ;;  %v981_v49 = vunpack.c.h.bf16 %v486_v42 }
  0xbc   : > { %1490 = vmatpush1.msra.mxu1 %v824_v62  ;;  %1420 = vmatprep.subr.mxu0 %v823_v1  ;;  %v428_v62 = vld [vmem:[%s2053_s29 + $0x5a0] sm:$0xff]  ;;  %v802_v1 = vunpack.c.l.bf16 %v397_v55  ;;  %v801_v5 = vunpack.c.h.bf16 %v396_v61 }
  0xbd   : > { %1491 = vmatprep.subr.mxu1 %v887_v2  ;;  %1421 = vmatpush2.msra.mxu0 %v822_v3  ;;  %v866_v2 = vunpack.c.l.bf16 %v429_v56  ;;  %v395_v3 = vld [vmem:[%s2053_s29 + $0x498] sm:$0xff]  ;;  %v865_v6 = vunpack.c.h.bf16 %v428_v62 }
  0xbe   : > { %1492 = vmatpush2.msra.mxu1 %v886_v4  ;;  %1422 = vmatprep.subr.mxu0 %v821_v7  ;;  %v427_v4 = vld [vmem:[%s2053_s29 + $0x598] sm:$0xff]  ;;  %v246_v7 = vld [vmem:[%s2048_s25 + $0x10] sm:$0xff]  ;;  %v799_v12 = vunpack.c.h.bf16 %v395_v3 }
  0xbf   : > { %1493 = vmatprep.subr.mxu1 %v885_v8  ;;  %1423 = vmatpush2.msra.mxu0 %v820_v9  ;;  %v800_v8 = vunpack.c.l.bf16 %v396_v61  ;;  %v864_v9 = vunpack.c.l.bf16 %v428_v62  ;;  %v1054_v18 = vcombine.high %v246_v7, %v246_v7 }
  0xc0   : > { %1494 = vmatpush2.msra.mxu1 %v884_v10  ;;  %1424 = vmatprep.subr.mxu0 %v819_v13  ;;  %v394_v10 = vld [vmem:[%s2053_s29 + $0x490] sm:$0xff]  ;;  %v863_v13 = vunpack.c.h.bf16 %v427_v4 }
  0xc1   : > { %1495 = vmatprep.subr.mxu1 %v883_v14  ;;  %1425 = vmatpush2.msra.mxu0 %v818_v15  ;;  %v798_v14 = vunpack.c.l.bf16 %v395_v3  ;;  %v862_v15 = vunpack.c.l.bf16 %v427_v4  ;;  %v1068_v30 = vrot.slane %v1054_v18, %v2120_v51 }
  0xc2   : > { %1496 = vmatpush2.msra.mxu1 %v882_v16  ;;  %1426 = vmatprep.subr.mxu0 %v817_v19  ;;  %v393_v16 = vld [vmem:[%s2053_s29 + $0x488] sm:$0xff]  ;;  %v797_v19 = vunpack.c.h.bf16 %v394_v10 }
  0xc3   : > { %1497 = vmatprep.subr.mxu1 %v881_v20  ;;  %1427 = vmatpush2.msra.mxu0 %v816_v21  ;;  %v861_v20 = vunpack.c.h.bf16 %v426_v11  ;;  %v796_v21 = vunpack.c.l.bf16 %v394_v10 }
  0xc4   : > { %1498 = vmatpush2.msra.mxu1 %v880_v22  ;;  %1428 = vmatprep.subr.mxu0 %v815_v25  ;;  %v860_v22 = vunpack.c.l.bf16 %v426_v11  ;;  %v1061_v25 = vrot.slane %v246_v7, %v2120_v51  ;;  %v449_v7 = vld [vmem:[%s2053_s29 + $0x648] sm:$0xff] }
  0xc5   : > { %1499 = vmatprep.subr.mxu1 %v879_v26  ;;  %1429 = vmatpush2.msra.mxu0 %v814_v27  ;;  %v795_v26 = vunpack.c.h.bf16 %v393_v16  ;;  %v859_v27 = vunpack.c.h.bf16 %v425_v17  ;;  %v906_v17 = vunpack.c.l.bf16 %v449_v7 }
  0xc6   : > { %1500 = vmatpush2.msra.mxu1 %v878_v28  ;;  %1430 = vmatprep.subr.mxu0 %v813_v31  ;;  %v794_v28 = vunpack.c.l.bf16 %v393_v16  ;;  %v793_v31 = vunpack.c.h.bf16 %v392_v23  ;;  %v1069_v35 = vcombine.high %v1061_v25, %v1061_v25 }
  0xc7   : > { %1501 = vmatprep.subr.mxu1 %v877_v32  ;;  %1431 = vmatpush2.msra.mxu0 %v812_v33  ;;  %v857_v32 = vunpack.c.h.bf16 %v424_v24  ;;  %v455_v33 = vld [vmem:[%s2053_s29 + $0x678] sm:$0xff] }
  0xc8   : > { %1502 = vmatpush2.msra.mxu1 %v876_v34  ;;  %1432 = vmatprep.subr.mxu0 %v811_v38  ;;  %v792_v34 = vunpack.c.l.bf16 %v392_v23  ;;  %v856_v38 = vunpack.c.l.bf16 %v424_v24 }
  0xc9   : > { %1503 = vmatprep.subr.mxu1 %v875_v39  ;;  %1433 = vmatpush2.msra.mxu0 %v810_v40  ;;  %v1070_v39 = vcombine.high %v1068_v30, %v1068_v30  ;;  %v919_v40 = vunpack.c.h.bf16 %v455_v33 }
  0xca   : > { %1504 = vmatpush2.msra.mxu1 %v874_v41  ;;  %1434 = vmatprep.subr.mxu0 %v809_v44  ;;  %v454_v41 = vld [vmem:[%s2053_s29 + $0x670] sm:$0xff]  ;;  %v918_v44 = vunpack.c.l.bf16 %v455_v33 }
  0xcb   : > { %1505 = vmatprep.subr.mxu1 %v873_v45  ;;  %1435 = vmatpush2.msra.mxu0 %v808_v46  ;;  %v982_v45 = vunpack.c.l.bf16 %v487_v36  ;;  %v453_v46 = vld [vmem:[%s2053_s29 + $0x668] sm:$0xff]  ;;  %v917_v48 = vunpack.c.h.bf16 %v454_v41 }
  0xcc   : > { %1506 = vmatpush2.msra.mxu1 %v872_v47  ;;  %1436 = vmatprep.subr.mxu0 %v807_v50  ;;  %v485_v47 = vld [vmem:[%s2053_s29 + $0x768] sm:$0xff]  ;;  %v916_v50 = vunpack.c.l.bf16 %v454_v41  ;;  %v915_v55 = vunpack.c.h.bf16 %v453_v46 }
  0xcd   : > { %1507 = vmatprep.subr.mxu1 %v871_v52  ;;  %1437 = vmatpush2.msra.mxu0 %v806_v53  ;;  %v980_v52 = vunpack.c.l.bf16 %v486_v42  ;;  %v452_v53 = vld [vmem:[%s2053_s29 + $0x660] sm:$0xff]  ;;  %v979_v56 = vunpack.c.h.bf16 %v485_v47 }
  0xce   : > { %1508 = vmatpush2.msra.mxu1 %v870_v54  ;;  %1438 = vmatprep.subr.mxu0 %v805_v57  ;;  %v484_v54 = vld [vmem:[%s2053_s29 + $0x760] sm:$0xff]  ;;  %v914_v57 = vunpack.c.l.bf16 %v453_v46  ;;  %v913_v61 = vunpack.c.h.bf16 %v452_v53 }
  0xcf   : > { %1509 = vmatprep.subr.mxu1 %v869_v58  ;;  %1439 = vmatpush2.msra.mxu0 %v804_v59  ;;  %v978_v58 = vunpack.c.l.bf16 %v485_v47  ;;  %v451_v59 = vld [vmem:[%s2053_s29 + $0x658] sm:$0xff]  ;;  %v977_v62 = vunpack.c.h.bf16 %v484_v54 }
  0xd0   : > { %1510 = vmatpush2.msra.mxu1 %v868_v60  ;;  %1440 = vmatprep.subr.mxu0 %v803_v63  ;;  %v483_v60 = vld [vmem:[%s2053_s29 + $0x758] sm:$0xff]  ;;  %v912_v63 = vunpack.c.l.bf16 %v452_v53  ;;  %v911_v3 = vunpack.c.h.bf16 %v451_v59 }
  0xd1   : > { %1511 = vmatprep.subr.mxu1 %v867_v0  ;;  %1441 = vmatpush2.msra.mxu0 %v802_v1  ;;  %v976_v0 = vunpack.c.l.bf16 %v484_v54  ;;  %v450_v1 = vld [vmem:[%s2053_s29 + $0x650] sm:$0xff]  ;;  %v975_v4 = vunpack.c.h.bf16 %v483_v60 }
  0xd2   : > { %1512 = vmatpush2.msra.mxu1 %v866_v2  ;;  %1442 = vmatprep.subr.mxu0 %v801_v5  ;;  %v482_v2 = vld [vmem:[%s2053_s29 + $0x750] sm:$0xff]  ;;  %v910_v5 = vunpack.c.l.bf16 %v451_v59  ;;  %v908_v11 = vunpack.c.l.bf16 %v450_v1 }
  0xd3   : > { %1513 = vmatprep.subr.mxu1 %v865_v6  ;;  %1443 = vmatpush2.msra.mxu0 %v800_v8  ;;  %v974_v6 = vunpack.c.l.bf16 %v483_v60  ;;  %v481_v8 = vld [vmem:[%s2053_s29 + $0x748] sm:$0xff]  ;;  %v973_v10 = vunpack.c.h.bf16 %v482_v2 }
  0xd4   : > { %1514 = vmatpush2.msra.mxu1 %v864_v9  ;;  %1444 = vmatprep.subr.mxu0 %v799_v12  ;;  %v909_v9 = vunpack.c.h.bf16 %v450_v1  ;;  %v972_v12 = vunpack.c.l.bf16 %v482_v2  ;;  %v971_v16 = vunpack.c.h.bf16 %v481_v8  ;;  %v970_v18 = vunpack.c.l.bf16 %v481_v8 }
  0xd5   : > { %1515 = vmatprep.subr.mxu1 %v863_v13  ;;  %1445 = vmatpush2.msra.mxu0 %v798_v14  ;;  %v448_v13 = vld [vmem:[%s2053_s29 + $0x640] sm:$0xff] }
  0xd6   : > { %1516 = vmatpush2.msra.mxu1 %v862_v15  ;;  %1446 = vmatprep.subr.mxu0 %v797_v19  ;;  %v480_v14 = vld [vmem:[%s2053_s29 + $0x740] sm:$0xff]  ;;  %v907_v15 = vunpack.c.h.bf16 %v449_v7  ;;  %v447_v19 = vld [vmem:[%s2053_s29 + $0x638] sm:$0xff]  ;;  %v904_v23 = vunpack.c.l.bf16 %v448_v13 }
  0xd7   : > { %1517 = vmatprep.subr.mxu1 %v861_v20  ;;  %1447 = vmatpush2.msra.mxu0 %v796_v21  ;;  %v479_v20 = vld [vmem:[%s2053_s29 + $0x738] sm:$0xff]  ;;  %v905_v21 = vunpack.c.h.bf16 %v448_v13  ;;  %v968_v24 = vunpack.c.l.bf16 %v480_v14 }
  0xd8   : > { %1518 = vmatpush2.msra.mxu1 %v860_v22  ;;  %1448 = vmatprep.subr.mxu0 %v795_v26  ;;  %v969_v22 = vunpack.c.h.bf16 %v480_v14  ;;  %v478_v26 = vld [vmem:[%s2053_s29 + $0x730] sm:$0xff] }
  0xd9   : > { %1519 = vmatprep.subr.mxu1 %v859_v27  ;;  %1449 = vmatpush2.msra.mxu0 %v794_v28  ;;  %v903_v27 = vunpack.c.h.bf16 %v447_v19  ;;  %v967_v28 = vunpack.c.h.bf16 %v479_v20  ;;  %v964_v36 = vunpack.c.l.bf16 %v478_v26 }
  0xda   : > { %1520 = vmatpush2.msra.mxu1 %v858_v29  ;;  %1450 = vmatprep.subr.mxu0 %v793_v31  ;;  %v902_v29 = vunpack.c.l.bf16 %v447_v19  ;;  %v445_v31 = vld [vmem:[%s2053_s29 + $0x628] sm:$0xff] }
  0xdb   : > { %1521 = vmatprep.subr.mxu1 %v857_v32  ;;  %1451 = vmatpush2.msra.mxu0 %v792_v34  ;;  %v477_v32 = vld [vmem:[%s2053_s29 + $0x728] sm:$0xff]  ;;  %v965_v34 = vunpack.c.h.bf16 %v478_v26  ;;  %v898_v42 = vunpack.c.l.bf16 %v445_v31 }
  0xdc   : > { %1452 = vmatprep.mubr.f32.mxu0 %v1069_v35  ;;  %1522 = vmatpush2.msra.mxu1 %v856_v38  ;;  %v444_v38 = vld [vmem:[%s2053_s29 + $0x620] sm:$0xff]  ;;  %v963_v41 = vunpack.c.h.bf16 %v477_v32 }
  0xdd   : > { %1453 = vmatmul.mubr.f32.vlgmr.msra.gmra.mxu0 %v1061_v25  ;;  %1523 = vmatprep.mubr.f32.mxu1 %v1070_v39  ;;  %v446_v25 = vld [vmem:[%s2053_s29 + $0x630] sm:$0xff]  ;;  %v476_v39 = vld [vmem:[%s2053_s29 + $0x720] sm:$0xff]  ;;  %v897_v46 = vunpack.c.h.bf16 %v444_v38 }
  0xde   : > { %1530 = vmatprep.subr.mxu0 %v919_v40  ;;  %1601 = vmatprep.subr.mxu1 %v983_v43  ;;  %v901_v33 = vunpack.c.h.bf16 %v446_v25  ;;  %v900_v35 = vunpack.c.l.bf16 %v446_v25  ;;  %v899_v40 = vunpack.c.h.bf16 %v445_v31  ;;  %v962_v43 = vunpack.c.l.bf16 %v477_v32 }
  0xdf   : > { %1524 = vmatmul.mubr.f32.vlgmr.msra.gmra.mxu1 %v1068_v30  ;;  %1531 = vmatpush1.msra.mxu0 %v918_v44  ;;  %v966_v30 = vunpack.c.l.bf16 %v479_v20  ;;  %v443_v44 = vld [vmem:[%s2053_s29 + $0x618] sm:$0xff]  ;;  %v961_v47 = vunpack.c.h.bf16 %v476_v39 }
  0xe0   : > { %1602 = vmatpush1.msra.mxu1 %v982_v45  ;;  %1532 = vmatprep.subr.mxu0 %v917_v48  ;;  %v475_v45 = vld [vmem:[%s2053_s29 + $0x718] sm:$0xff]  ;;  %v896_v48 = vunpack.c.l.bf16 %v444_v38  ;;  %v895_v53 = vunpack.c.h.bf16 %v443_v44 }
  0xe1   : > { %1603 = vmatprep.subr.mxu1 %v981_v49  ;;  %1533 = vmatpush1.msra.mxu0 %v916_v50  ;;  %v960_v49 = vunpack.c.l.bf16 %v476_v39  ;;  %v442_v50 = vld [vmem:[%s2053_s29 + $0x610] sm:$0xff]  ;;  %v959_v54 = vunpack.c.h.bf16 %v475_v45 }
  0xe2   : > { %1604 = vmatpush1.msra.mxu1 %v980_v52  ;;  %1534 = vmatprep.subr.mxu0 %v915_v55  ;;  %v474_v52 = vld [vmem:[%s2053_s29 + $0x710] sm:$0xff]  ;;  %v894_v55 = vunpack.c.l.bf16 %v443_v44  ;;  %v893_v59 = vunpack.c.h.bf16 %v442_v50 }
  0xe3   : > { %1605 = vmatprep.subr.mxu1 %v979_v56  ;;  %1535 = vmatpush1.msra.mxu0 %v914_v57  ;;  %v958_v56 = vunpack.c.l.bf16 %v475_v45  ;;  %v441_v57 = vld [vmem:[%s2053_s29 + $0x608] sm:$0xff]  ;;  %v957_v60 = vunpack.c.h.bf16 %v474_v52 }
  0xe4   : > { %1606 = vmatpush1.msra.mxu1 %v978_v58  ;;  %1536 = vmatprep.subr.mxu0 %v913_v61  ;;  %v473_v58 = vld [vmem:[%s2053_s29 + $0x708] sm:$0xff]  ;;  %v892_v61 = vunpack.c.l.bf16 %v442_v50  ;;  %v891_v1 = vunpack.c.h.bf16 %v441_v57 }
  0xe5   : > { %1607 = vmatprep.subr.mxu1 %v977_v62  ;;  %1537 = vmatpush1.msra.mxu0 %v912_v63  ;;  %v956_v62 = vunpack.c.l.bf16 %v474_v52  ;;  %v440_v63 = vld [vmem:[%s2053_s29 + $0x600] sm:$0xff]  ;;  %v955_v2 = vunpack.c.h.bf16 %v473_v58 }
  0xe6   : > { %1608 = vmatpush1.msra.mxu1 %v976_v0  ;;  %1538 = vmatprep.subr.mxu0 %v911_v3  ;;  %v472_v0 = vld [vmem:[%s2053_s29 + $0x700] sm:$0xff]  ;;  %v890_v3 = vunpack.c.l.bf16 %v441_v57  ;;  %v889_v7 = vunpack.c.h.bf16 %v440_v63 }
  0xe7   : > { %1609 = vmatprep.subr.mxu1 %v975_v4  ;;  %1539 = vmatpush1.msra.mxu0 %v910_v5  ;;  %v954_v4 = vunpack.c.l.bf16 %v473_v58  ;;  %v471_v5 = vld [vmem:[%s2053_s29 + $0x6f8] sm:$0xff]  ;;  %v953_v8 = vunpack.c.h.bf16 %v472_v0 }
  0xe8   : > { %1610 = vmatpush1.msra.mxu1 %v974_v6  ;;  %1540 = vmatprep.subr.mxu0 %v909_v9  ;;  %v503_v6 = vld [vmem:[%s2053_s29 + $0x7f8] sm:$0xff]  ;;  %v888_v9 = vunpack.c.l.bf16 %v440_v63  ;;  %v951_v13 = vunpack.c.h.bf16 %v471_v5 }
  0xe9   : > { %1611 = vmatprep.subr.mxu1 %v973_v10  ;;  %1541 = vmatpush1.msra.mxu0 %v908_v11  ;;  %v952_v10 = vunpack.c.l.bf16 %v472_v0  ;;  %v470_v11 = vld [vmem:[%s2053_s29 + $0x6f0] sm:$0xff]  ;;  %v1015_v14 = vunpack.c.h.bf16 %v503_v6 }
  0xea   : > { %1612 = vmatpush1.msra.mxu1 %v972_v12  ;;  %1542 = vmatprep.subr.mxu0 %v907_v15  ;;  %v502_v12 = vld [vmem:[%s2053_s29 + $0x7f0] sm:$0xff]  ;;  %v950_v15 = vunpack.c.l.bf16 %v471_v5  ;;  %v949_v19 = vunpack.c.h.bf16 %v470_v11 }
  0xeb   : > { %1613 = vmatprep.subr.mxu1 %v971_v16  ;;  %1543 = vmatpush1.msra.mxu0 %v906_v17  ;;  %v1014_v16 = vunpack.c.l.bf16 %v503_v6  ;;  %v469_v17 = vld [vmem:[%s2053_s29 + $0x6e8] sm:$0xff]  ;;  %v1013_v20 = vunpack.c.h.bf16 %v502_v12 }
  0xec   : > { %1614 = vmatpush1.msra.mxu1 %v970_v18  ;;  %1544 = vmatprep.subr.mxu0 %v905_v21  ;;  %v501_v18 = vld [vmem:[%s2053_s29 + $0x7e8] sm:$0xff]  ;;  %v948_v21 = vunpack.c.l.bf16 %v470_v11  ;;  %v947_v25 = vunpack.c.h.bf16 %v469_v17 }
  0xed   : > { %1615 = vmatprep.subr.mxu1 %v969_v22  ;;  %1545 = vmatpush1.msra.mxu0 %v904_v23  ;;  %v1012_v22 = vunpack.c.l.bf16 %v502_v12  ;;  %v468_v23 = vld [vmem:[%s2053_s29 + $0x6e0] sm:$0xff]  ;;  %v1011_v26 = vunpack.c.h.bf16 %v501_v18 }
  0xee   : > { %1616 = vmatpush1.msra.mxu1 %v968_v24  ;;  %1546 = vmatprep.subr.mxu0 %v903_v27  ;;  %v500_v24 = vld [vmem:[%s2053_s29 + $0x7e0] sm:$0xff]  ;;  %v946_v27 = vunpack.c.l.bf16 %v469_v17  ;;  %v945_v31 = vunpack.c.h.bf16 %v468_v23  ;;  %v247_v17 = vld [vmem:[%s2048_s25 + $0x18] sm:$0xff] }
  0xef   : > { %1617 = vmatprep.subr.mxu1 %v967_v28  ;;  %1547 = vmatpush1.msra.mxu0 %v902_v29  ;;  %v1010_v28 = vunpack.c.l.bf16 %v501_v18  ;;  %v467_v29 = vld [vmem:[%s2053_s29 + $0x6d8] sm:$0xff]  ;;  %v1009_v32 = vunpack.c.h.bf16 %v500_v24 }
  0xf0   : > { %1618 = vmatpush1.msra.mxu1 %v966_v30  ;;  %1548 = vmatprep.subr.mxu0 %v901_v33  ;;  %v499_v30 = vld [vmem:[%s2053_s29 + $0x7d8] sm:$0xff]  ;;  %v944_v33 = vunpack.c.l.bf16 %v468_v23  ;;  %v943_v38 = vunpack.c.h.bf16 %v467_v29  ;;  %v490_v23 = vld [vmem:[%s2053_s29 + $0x790] sm:$0xff] }
  0xf1   : > { %1619 = vmatprep.subr.mxu1 %v965_v34  ;;  %1549 = vmatpush1.msra.mxu0 %v900_v35  ;;  %v1008_v34 = vunpack.c.l.bf16 %v500_v24  ;;  %v466_v35 = vld [vmem:[%s2053_s29 + $0x6d0] sm:$0xff]  ;;  %v1007_v39 = vunpack.c.h.bf16 %v499_v30 }
  0xf2   : > { %1620 = vmatpush1.msra.mxu1 %v964_v36  ;;  %1550 = vmatprep.subr.mxu0 %v899_v40  ;;  %v498_v36 = vld [vmem:[%s2053_s29 + $0x7d0] sm:$0xff]  ;;  %v942_v40 = vunpack.c.l.bf16 %v467_v29  ;;  %v941_v44 = vunpack.c.h.bf16 %v466_v35  ;;  %v457_v29 = vld [vmem:[%s2053_s29 + $0x688] sm:$0xff] }
  0xf3   : > { %1621 = vmatprep.subr.mxu1 %v963_v41  ;;  %1551 = vmatpush1.msra.mxu0 %v898_v42  ;;  %v1006_v41 = vunpack.c.l.bf16 %v499_v30  ;;  %v465_v42 = vld [vmem:[%s2053_s29 + $0x6c8] sm:$0xff]  ;;  %v1005_v45 = vunpack.c.h.bf16 %v498_v36 }
  0xf4   : > { %1622 = vmatpush1.msra.mxu1 %v962_v43  ;;  %1552 = vmatprep.subr.mxu0 %v897_v46  ;;  %v497_v43 = vld [vmem:[%s2053_s29 + $0x7c8] sm:$0xff]  ;;  %v940_v46 = vunpack.c.l.bf16 %v466_v35  ;;  %v939_v50 = vunpack.c.h.bf16 %v465_v42  ;;  %v456_v35 = vld [vmem:[%s2053_s29 + $0x680] sm:$0xff] }
  0xf5   : > { %1623 = vmatprep.subr.mxu1 %v961_v47  ;;  %1553 = vmatpush1.msra.mxu0 %v896_v48  ;;  %v1004_v47 = vunpack.c.l.bf16 %v498_v36  ;;  %v464_v48 = vld [vmem:[%s2053_s29 + $0x6c0] sm:$0xff]  ;;  %v1003_v52 = vunpack.c.h.bf16 %v497_v43  ;;  %v489_v30 = vld [vmem:[%s2053_s29 + $0x788] sm:$0xff] }
  0xf6   : > { %1624 = vmatpush1.msra.mxu1 %v960_v49  ;;  %1554 = vmatprep.subr.mxu0 %v895_v53  ;;  %v496_v49 = vld [vmem:[%s2053_s29 + $0x7c0] sm:$0xff]  ;;  %v938_v53 = vunpack.c.l.bf16 %v465_v42  ;;  %v937_v57 = vunpack.c.h.bf16 %v464_v48  ;;  %v922_v42 = vunpack.c.l.bf16 %v457_v29 }
  0xf7   : > { %1625 = vmatprep.subr.mxu1 %v959_v54  ;;  %1555 = vmatpush1.msra.mxu0 %v894_v55  ;;  %v1002_v54 = vunpack.c.l.bf16 %v497_v43  ;;  %v463_v55 = vld [vmem:[%s2053_s29 + $0x6b8] sm:$0xff]  ;;  %v1001_v58 = vunpack.c.h.bf16 %v496_v49  ;;  %v488_v36 = vld [vmem:[%s2053_s29 + $0x780] sm:$0xff]  ;;  %v986_v43 = vunpack.c.l.bf16 %v489_v30 }
  0xf8   : > { %1626 = vmatpush1.msra.mxu1 %v958_v56  ;;  %1556 = vmatprep.subr.mxu0 %v893_v59  ;;  %v495_v56 = vld [vmem:[%s2053_s29 + $0x7b8] sm:$0xff]  ;;  %v936_v59 = vunpack.c.l.bf16 %v464_v48  ;;  %v935_v63 = vunpack.c.h.bf16 %v463_v55  ;;  %v984_v48 = vunpack.c.l.bf16 %v488_v36 }
  0xf9   : > { %1627 = vmatprep.subr.mxu1 %v957_v60  ;;  %1557 = vmatpush1.msra.mxu0 %v892_v61  ;;  %v1000_v60 = vunpack.c.l.bf16 %v496_v49  ;;  %v462_v61 = vld [vmem:[%s2053_s29 + $0x6b0] sm:$0xff]  ;;  %v999_v0 = vunpack.c.h.bf16 %v495_v56 }
  0xfa   : > { %1628 = vmatpush1.msra.mxu1 %v956_v62  ;;  %1558 = vmatprep.subr.mxu0 %v891_v1  ;;  %v494_v62 = vld [vmem:[%s2053_s29 + $0x7b0] sm:$0xff]  ;;  %v934_v1 = vunpack.c.l.bf16 %v463_v55  ;;  %v933_v5 = vunpack.c.h.bf16 %v462_v61 }
  0xfb   : > { %1629 = vmatprep.subr.mxu1 %v955_v2  ;;  %1559 = vmatpush1.msra.mxu0 %v890_v3  ;;  %v998_v2 = vunpack.c.l.bf16 %v495_v56  ;;  %v461_v3 = vld [vmem:[%s2053_s29 + $0x6a8] sm:$0xff]  ;;  %v997_v6 = vunpack.c.h.bf16 %v494_v62 }
  0xfc   : > { %1630 = vmatpush1.msra.mxu1 %v954_v4  ;;  %1560 = vmatprep.subr.mxu0 %v889_v7  ;;  %v493_v4 = vld [vmem:[%s2053_s29 + $0x7a8] sm:$0xff]  ;;  %v932_v7 = vunpack.c.l.bf16 %v462_v61  ;;  %v931_v11 = vunpack.c.h.bf16 %v461_v3 }
  0xfd   : > { %1631 = vmatprep.subr.mxu1 %v953_v8  ;;  %1561 = vmatpush1.msra.mxu0 %v888_v9  ;;  %v996_v8 = vunpack.c.l.bf16 %v494_v62  ;;  %v460_v9 = vld [vmem:[%s2053_s29 + $0x6a0] sm:$0xff]  ;;  %v995_v12 = vunpack.c.h.bf16 %v493_v4 }
  0xfe   : > { %1632 = vmatpush1.msra.mxu1 %v952_v10  ;;  %1562 = vmatprep.subr.mxu0 %v951_v13  ;;  %v492_v10 = vld [vmem:[%s2053_s29 + $0x7a0] sm:$0xff]  ;;  %v930_v13 = vunpack.c.l.bf16 %v461_v3  ;;  %v929_v18 = vunpack.c.h.bf16 %v460_v9 }
  0xff   : > { %1633 = vmatprep.subr.mxu1 %v1015_v14  ;;  %1563 = vmatpush2.msra.mxu0 %v950_v15  ;;  %v994_v14 = vunpack.c.l.bf16 %v493_v4  ;;  %v459_v15 = vld [vmem:[%s2053_s29 + $0x698] sm:$0xff] }
 0x100   : > { %1634 = vmatpush2.msra.mxu1 %v1014_v16  ;;  %1564 = vmatprep.subr.mxu0 %v949_v19  ;;  %v491_v16 = vld [vmem:[%s2053_s29 + $0x798] sm:$0xff]  ;;  %v993_v19 = vunpack.c.h.bf16 %v492_v10  ;;  %v927_v24 = vunpack.c.h.bf16 %v459_v15 }
 0x101   : > { %1635 = vmatprep.subr.mxu1 %v1013_v20  ;;  %1565 = vmatpush2.msra.mxu0 %v948_v21  ;;  %v928_v20 = vunpack.c.l.bf16 %v460_v9  ;;  %v992_v21 = vunpack.c.l.bf16 %v492_v10 }
 0x102   : > { %1636 = vmatpush2.msra.mxu1 %v1012_v22  ;;  %1566 = vmatprep.subr.mxu0 %v947_v25  ;;  %v458_v22 = vld [vmem:[%s2053_s29 + $0x690] sm:$0xff]  ;;  %v991_v25 = vunpack.c.h.bf16 %v491_v16 }
 0x103   : > { %1637 = vmatprep.subr.mxu1 %v1011_v26  ;;  %1567 = vmatpush2.msra.mxu0 %v946_v27  ;;  %v1071_v26 = vcombine.high %v247_v17, %v247_v17  ;;  %v926_v27 = vunpack.c.l.bf16 %v459_v15 }
 0x104   : > { %1638 = vmatpush2.msra.mxu1 %v1010_v28  ;;  %1568 = vmatprep.subr.mxu0 %v945_v31  ;;  %v990_v28 = vunpack.c.l.bf16 %v491_v16  ;;  %v925_v31 = vunpack.c.h.bf16 %v458_v22 }
 0x105   : > { %1639 = vmatprep.subr.mxu1 %v1009_v32  ;;  %1569 = vmatpush2.msra.mxu0 %v944_v33  ;;  %v989_v32 = vunpack.c.h.bf16 %v490_v23  ;;  %v924_v33 = vunpack.c.l.bf16 %v458_v22 }
 0x106   : > { %1640 = vmatpush2.msra.mxu1 %v1008_v34  ;;  %1570 = vmatprep.subr.mxu0 %v943_v38  ;;  %v988_v34 = vunpack.c.l.bf16 %v490_v23  ;;  %v1078_v38 = vrot.slane %v247_v17, %v2120_v51 }
 0x107   : > { %1641 = vmatprep.subr.mxu1 %v1007_v39  ;;  %1571 = vmatpush2.msra.mxu0 %v942_v40  ;;  %v923_v39 = vunpack.c.h.bf16 %v457_v29  ;;  %v987_v40 = vunpack.c.h.bf16 %v489_v30 }
 0x108   : > { %1642 = vmatpush2.msra.mxu1 %v1006_v41  ;;  %1572 = vmatprep.subr.mxu0 %v941_v44  ;;  %v1085_v41 = vrot.slane %v1071_v26, %v2120_v51  ;;  %v921_v44 = vunpack.c.h.bf16 %v456_v35 }
 0x109   : > { %1643 = vmatprep.subr.mxu1 %v1005_v45  ;;  %1573 = vmatpush2.msra.mxu0 %v940_v46  ;;  %v985_v45 = vunpack.c.h.bf16 %v488_v36  ;;  %v920_v46 = vunpack.c.l.bf16 %v456_v35 }
 0x10a   : > { %1644 = vmatpush2.msra.mxu1 %v1004_v47  ;;  %1574 = vmatprep.subr.mxu0 %v939_v50  ;;  %v1086_v47 = vcombine.high %v1078_v38, %v1078_v38  ;;  %v1087_v49 = vcombine.high %v1085_v41, %v1085_v41 }
 0x10b   : > { %1645 = vmatprep.subr.mxu1 %v1003_v52  ;;  %1575 = vmatpush2.msra.mxu0 %v938_v53 }
 0x10c   : > { %1646 = vmatpush2.msra.mxu1 %v1002_v54  ;;  %1576 = vmatprep.subr.mxu0 %v937_v57 }
 0x10d   : > { %1647 = vmatprep.subr.mxu1 %v1001_v58  ;;  %1577 = vmatpush2.msra.mxu0 %v936_v59 }
 0x10e   : > { %1648 = vmatpush2.msra.mxu1 %v1000_v60  ;;  %1578 = vmatprep.subr.mxu0 %v935_v63 }
 0x10f   : > { %1649 = vmatprep.subr.mxu1 %v999_v0  ;;  %1579 = vmatpush2.msra.mxu0 %v934_v1 }
 0x110   : > { %1650 = vmatpush2.msra.mxu1 %v998_v2  ;;  %1580 = vmatprep.subr.mxu0 %v933_v5 }
 0x111   : > { %1651 = vmatprep.subr.mxu1 %v997_v6  ;;  %1581 = vmatpush2.msra.mxu0 %v932_v7 }
 0x112   : > { %1652 = vmatpush2.msra.mxu1 %v996_v8  ;;  %1582 = vmatprep.subr.mxu0 %v931_v11 }
 0x113   : > { %1653 = vmatprep.subr.mxu1 %v995_v12  ;;  %1583 = vmatpush2.msra.mxu0 %v930_v13 }
 0x114   : > { %1654 = vmatpush2.msra.mxu1 %v994_v14  ;;  %1584 = vmatprep.subr.mxu0 %v929_v18  ;;  %v243_v18 = vld [vmem:[#allocation2] sm:$0xf] }
 0x115   : > { %1655 = vmatprep.subr.mxu1 %v993_v19  ;;  %1585 = vmatpush2.msra.mxu0 %v928_v20 }
 0x116   : > { %1656 = vmatpush2.msra.mxu1 %v992_v21  ;;  %1586 = vmatprep.subr.mxu0 %v927_v24 }
 0x117   : > { %1657 = vmatprep.subr.mxu1 %v991_v25  ;;  %1587 = vmatpush2.msra.mxu0 %v926_v27 }
 0x118   : > { %1658 = vmatpush2.msra.mxu1 %v990_v28  ;;  %1588 = vmatprep.subr.mxu0 %v925_v31 }
 0x119   : > { %1659 = vmatprep.subr.mxu1 %v989_v32  ;;  %1589 = vmatpush2.msra.mxu0 %v924_v33  ;;  %v1170_v50 = vpop.f32.mrf.mxu0 }
 0x11a   : > { %1660 = vmatpush2.msra.mxu1 %v988_v34  ;;  %1590 = vmatprep.subr.mxu0 %v923_v39  ;;  %v1241_v52 = vpop.f32.mrf.mxu1 }
 0x11b   : > { %1661 = vmatprep.subr.mxu1 %v987_v40  ;;  %1591 = vmatpush2.msra.mxu0 %v922_v42  ;;  %v1172_v53 = vpop.f32.mrf.mxu0  ;;  %v1242_v56 = vadd.f32 %v1241_v52, %v1170_v50 }
 0x11c   : > { %1662 = vmatpush2.msra.mxu1 %v986_v43  ;;  %1592 = vmatprep.subr.mxu0 %v921_v44  ;;  %v1243_v55 = vpop.f32.mrf.mxu1 }
 0x11d   : > { %1663 = vmatprep.subr.mxu1 %v985_v45  ;;  %1593 = vmatpush2.msra.mxu0 %v920_v46  ;;  %v1244_v59 = vadd.f32 %v1243_v55, %v1172_v53 }
 0x11e   : > { %1594 = vmatprep.mubr.f32.mxu0 %v1086_v47  ;;  %1664 = vmatpush2.msra.mxu1 %v984_v48 }
 0x11f   : > { %1665 = vmatprep.mubr.f32.mxu1 %v1087_v49  ;;  %1595 = vmatmul.mubr.f32.vlgmr.msra.gmra.mxu0 %v1078_v38 }
 0x120   : > { %1666 = vmatmul.mubr.f32.vlgmr.msra.gmra.mxu1 %v1085_v41 }
 0x15b   : > { %v1312_v54 = vpop.f32.mrf.mxu0 }
 0x15c   : > { %v1313_v60 = vadd.f32 %v1312_v54, %v1242_v56 }
 0x15d   : > { %v1383_v57 = vpop.f32.mrf.mxu1  ;;  %v1314_v58 = vpop.f32.mrf.mxu0 }
 0x15e   : > { %v1315_v62 = vadd.f32 %v1314_v58, %v1244_v59  ;;  %v1384_v0 = vadd.f32 %v1383_v57, %v1313_v60 }
 0x15f   : > { %v1385_v63 = vpop.f32.mrf.mxu1 }
 0x160   : > { %v1386_v3 = vadd.f32 %v1385_v63, %v1315_v62 }
 0x19d   : > { %v1454_v61 = vpop.f32.mrf.mxu0 }
 0x19e   : > { %v1455_v4 = vadd.f32 %v1454_v61, %v1384_v0 }
 0x19f   : > { %v1525_v1 = vpop.f32.mrf.mxu1  ;;  %v1456_v2 = vpop.f32.mrf.mxu0 }
 0x1a0   : > { %v1457_v5 = vadd.f32 %v1456_v2, %v1386_v3  ;;  %v1526_v7 = vadd.f32 %v1525_v1, %v1455_v4 }
 0x1a1   : > { %v1527_v6 = vpop.f32.mrf.mxu1 }
 0x1a2   : > { %v1528_v10 = vadd.f32 %v1527_v6, %v1457_v5 }
 0x1df   : > { %v1596_v8 = vpop.f32.mrf.mxu0 }
 0x1e0   : > { %v1667_v9 = vpop.f32.mrf.mxu1  ;;  %v1597_v11 = vadd.f32 %v1596_v8, %v1526_v7 }
 0x1e1   : > { %v1598_v12 = vpop.f32.mrf.mxu0 }
 0x1e2   : > { %v1599_v13 = vadd.f32 %v1598_v12, %v1528_v10  ;;  %v1669_v14 = vpop.f32.mrf.mxu1  ;;  %v1668_v15 = vadd.f32 %v1667_v9, %v1597_v11 }
 0x1e4   : > { %v1670_v16 = vadd.f32 %v1669_v14, %v1599_v13 }
 0x1e6   : > { %v1674_v17 = vcombine.low %v1668_v15, %v1670_v16 }
 0x1e8   : > { %v1681_v19 = vrot.slane %v1674_v17, %v2120_v51  ;;  %1688 = sbr.rel (%p1901_p6) target bundleno = 726 (0x2d6), region = 48 }
 0x1ea   : > { %v1683_v20 = vadd.f32 %v1681_v19, %v243_v18 }
 0x1ec   : > { %1684 = vst [vmem:[#allocation2] sm:$0xf] %v1683_v20 }
 0x1ed   : > { %v1742_v21 = vld [vmem:[%s2455_s3 + $0xf8] sm:$0xff]  ;;  %v1741_v23 = vld [vmem:[%s2455_s3 + $0xf0] sm:$0xff]  ;;  %v1740_v25 = vld [vmem:[%s2455_s3 + $0xe8] sm:$0xff]  ;;  %v1694_v32 = vsub.s32 0, %v2112_v37  ;;  %v1698_v33 = vsub.s32 1, %v2112_v37  ;;  %vm1831_vm0 = vcmask 66560  }
 0x1ee   : > { %v1726_v22 = vld [vmem:[%s2455_s3 + $0x78] sm:$0xff]  ;;  %1908 = vmatprep.subr.mxu0 %v1742_v21  ;;  %v1725_v24 = vld [vmem:[%s2455_s3 + $0x70] sm:$0xff]  ;;  %v1724_v26 = vld [vmem:[%s2455_s3 + $0x68] sm:$0xff] }
 0x1ef   : > { %1909 = vmatpush3.msra.mxu0 %v1726_v22  ;;  %v1739_v27 = vld [vmem:[%s2455_s3 + $0xe0] sm:$0xff]  ;;  %v1738_v29 = vld [vmem:[%s2455_s3 + $0xd8] sm:$0xff]  ;;  %v1737_v31 = vld [vmem:[%s2455_s3 + $0xd0] sm:$0xff] }
 0x1f0   : > { %1910 = vmatprep.subr.mxu0 %v1741_v23  ;;  %v1723_v28 = vld [vmem:[%s2455_s3 + $0x60] sm:$0xff]  ;;  %v1722_v30 = vld [vmem:[%s2455_s3 + $0x58] sm:$0xff]  ;;  %v1721_v34 = vld [vmem:[%s2455_s3 + $0x50] sm:$0xff] }
 0x1f1   : > { %1911 = vmatpush3.msra.mxu0 %v1725_v24  ;;  %v1736_v35 = vld [vmem:[%s2455_s3 + $0xc8] sm:$0xff]  ;;  %v1690_v38 = vld [vmem:[%s2454_s2] sm:$0x3]  ;;  %v1734_v42 = vld [vmem:[%s2455_s3 + $0xb8] sm:$0xff] }
 0x1f2   : > { %1912 = vmatprep.subr.mxu0 %v1740_v25  ;;  %v1720_v36 = vld [vmem:[%s2455_s3 + $0x48] sm:$0xff]  ;;  %v1735_v37 = vld [vmem:[%s2455_s3 + $0xc0] sm:$0xff]  ;;  %v1695_v39 = vrot.slane %v1690_v38, %v1694_v32  ;;  %v1699_v40 = vrot.slane %v1690_v38, %v1698_v33  ;;  %v1718_v44 = vld [vmem:[%s2455_s3 + $0x38] sm:$0xff] }
 0x1f3   : > { %1913 = vmatpush3.msra.mxu0 %v1724_v26  ;;  %v1719_v41 = vld [vmem:[%s2455_s3 + $0x40] sm:$0xff]  ;;  %v1733_v46 = vld [vmem:[%s2455_s3 + $0xb0] sm:$0xff]  ;;  %v1732_v49 = vld [vmem:[%s2455_s3 + $0xa8] sm:$0xff] }
 0x1f4   : > { %1914 = vmatprep.subr.mxu0 %v1739_v27  ;;  %v1700_v43 = vcombine.low %v1695_v39, %v1699_v40  ;;  %v1689_v45 = vld [vmem:[#allocation2] sm:$0xf]  ;;  %v1717_v48 = vld [vmem:[%s2455_s3 + $0x30] sm:$0xff]  ;;  %v1716_v52 = vld [vmem:[%s2455_s3 + $0x28] sm:$0xff] }
 0x1f5   : > { %1915 = vmatpush3.msra.mxu0 %v1723_v28  ;;  %v1731_v53 = vld [vmem:[%s2455_s3 + $0xa0] sm:$0xff]  ;;  %v1730_v56 = vld [vmem:[%s2455_s3 + $0x98] sm:$0xff]  ;;  %v1729_v59 = vld [vmem:[%s2455_s3 + $0x90] sm:$0xff] }
 0x1f6   : > { %1916 = vmatprep.subr.mxu0 %v1738_v29  ;;  %v1707_v47 = vrot.slane %v1700_v43, %v2120_v51  ;;  %v1715_v55 = vld [vmem:[%s2455_s3 + $0x20] sm:$0xff]  ;;  %v1714_v58 = vld [vmem:[%s2455_s3 + $0x18] sm:$0xff]  ;;  %v1713_v61 = vld [vmem:[%s2455_s3 + $0x10] sm:$0xff] }
 0x1f7   : > { %1917 = vmatpush3.msra.mxu0 %v1722_v30  ;;  %v1712_v62 = vld [vmem:[%s2455_s3 + $0x8] sm:$0xff]  ;;  %v1727_v63 = vld [vmem:[%s2455_s3 + $0x80] sm:$0xff] }
 0x1f8   : > { %1918 = vmatprep.subr.mxu0 %v1737_v31  ;;  %v1709_v50 = vadd.f32 %v1707_v47, %v1689_v45  ;;  %v1711_v0 = vld [vmem:[%s2455_s3] sm:$0xff] }
 0x1f9   : > { %1919 = vmatpush3.msra.mxu0 %v1721_v34  ;;  %v1902_v2 = vld [vmem:[%s2456_s4] ss:$0 sm:$0xff] }
 0x1fa   : > { %1920 = vmatprep.subr.mxu0 %v1736_v35  ;;  %v1710_v54 = vmax.f32 %v1709_v50, 0.0 }
 0x1fb   : > { %1921 = vmatpush3.msra.mxu0 %v1720_v36 }
 0x1fc   : > { %1922 = vmatprep.subr.mxu0 %v1735_v37  ;;  %v1757_v57 = vrot.slane %v1710_v54, %v2120_v51  ;;  %v1728_v51 = vld [vmem:[%s2455_s3 + $0x88] sm:$0xff] }
 0x1fd   : > { %1923 = vmatpush3.msra.mxu0 %v1719_v41 }
 0x1fe   : > { %1924 = vmatprep.subr.mxu0 %v1734_v42  ;;  %v1758_v60 = vcombine.high %v1757_v57, %v1757_v57 }
 0x1ff   : > { %1925 = vmatpush3.msra.mxu0 %v1718_v44 }
 0x200   : > { %1926 = vmatprep.subr.mxu0 %v1733_v46  ;;  %1825 = vmatprep.mubr.f32.mxu0 %v1758_v60 }
 0x201   : > { %1927 = vmatpush3.msra.mxu0 %v1717_v48 }
 0x202   : > { %1928 = vmatprep.subr.mxu0 %v1732_v49 }
 0x203   : > { %1929 = vmatpush3.msra.mxu0 %v1716_v52 }
 0x204   : > { %1930 = vmatprep.subr.mxu0 %v1731_v53 }
 0x205   : > { %1931 = vmatpush3.msra.mxu0 %v1715_v55 }
 0x206   : > { %1932 = vmatprep.subr.mxu0 %v1730_v56 }
 0x207   : > { %1933 = vmatpush3.msra.mxu0 %v1714_v58 }
 0x208   : > { %1934 = vmatprep.subr.mxu0 %v1729_v59 }
 0x209   : > { %1935 = vmatpush3.msra.mxu0 %v1713_v61 }
 0x20a   : > { %1936 = vmatprep.subr.mxu0 %v1728_v51 }
 0x20b   : > { %1937 = vmatpush3.msra.mxu0 %v1712_v62 }
 0x20c   : > { %1938 = vmatprep.subr.mxu0 %v1727_v63 }
 0x20d   : > { %1939 = vmatpush3.msra.mxu0 %v1711_v0 }
 0x20e   : > { %1826 = vmatmul.mubr.f32.vlgmr.msra.gmra.mxu0 %v1757_v57 }
 0x2ce   : > { %v1940_v1 = vpop.f32.mrf.mxu0 }
 0x2d0   : > { %v1941_v3 = vpop.f32.mrf.mxu0 }
 0x2d1   : > { %v1942_v4 = vadd.f32 %v1941_v3, %v1940_v1 }
 0x2d3   : > { %v1828_v5 = vadd.f32 %v1942_v4, %v1902_v2 }
 0x2d5   : > { %1832 = vst.msk [vmem:[#allocation3] sm:$0x3] %vm1831_vm0, %v1828_v5 }
 0x2d6 PF: > { %p1947_p7 = scmp.eq.s32.totalorder %s2039_s19, 3  ;;  %s2002_s29 = smov [#allocation3]  }
 0x2d7   : > { %s1840_s30 = sshll.u32 %s2002_s29, 4  ;;  %s1841_s30 = int_to_ptr.vmem [resolvable:$true] %s1840_s30 }
 0x2d8   : > { %s1964_s6 = scalar_lea.vmem %s1841_s30, 32  ;;  %p1971_p11 = scmp.lt.s32.totalorder %s1841_s30, %s1841_s30 }
 0x2d9   : > { %p1965_p8 = scmp.ne.s32.totalorder %s1841_s30, %s1964_s6  ;;  %p1972_p12 = scmp.lt.s32.totalorder %s1964_s6, %s1964_s6 }
 0x2db   : > { %p1966_p9 = pnand %p1965_p8, %p1947_p7  ;;  %p1973_p13 = por %p1972_p12, %p1971_p11 }
 0x2dd   : > { %p1967_p10 = pneg %p1966_p9 }
 0x2df   : > { %p1974_p0 = pnand %p1973_p13, %p1967_p10 }
 0x2e1   : > { %1977 = shalt.err (!%p1974_p0)
}
 0x2e2   : > { %1944 = dma.vmem_to_hbm [thread:$0]  (%p1947_p7), %s1841_s30, 32, %s2457_s5, [#allocation4]  }
 0x2e3   : > { %1993 = dma.done.wait (%p1947_p7), [#allocation4], 32  }
 0x2e4   : > { %1995 = vsyncadd (%p1947_p7), [#allocation4], 4294967264 }
 0x2e5 PF: > { %s16_s18 = sadd.s32 1, %s1998_s18  }
 0x2e6   : > { %p13_p1 = scmp.ge.s32.totalorder %s16_s18, 6  }
 0x2e8   :  { %15 = sbr.rel (!%p13_p1) target bundleno = 1 (0x1), region = 78 }
 0x2ed   :  { %1853 = vsyncpa [#allocation4], 1 }
 0x2ee   :  { %1855 = vsyncpa [#allocation4 + $0x1], 1 }

</bundles_post_ra>
